<compile_context>
chip_gen: v7x
topology: tpu7x:2x2x1
jax: 0.10.0
libtpu: 0.0.40
codegen_flags: <defaults>
</compile_context>

<pallas_src>
import jax
import jax.numpy as jnp
from jax.experimental import pallas as pl
from jax.experimental.pallas import tpu as pltpu

IN_DIM = 3000
HID_DIM = 1000
OUT_DIM = 10

IN_PAD = 3072    # 3000 padded up to a multiple of 128
HID_PAD = 1024   # 1000 padded up to a multiple of 128
TK = 1536        # reduction chunk: 3072 / 1536 = 2 grid steps


def _tensorcores_per_chip():
    """2 on dual-TensorCore chips (v7x / v4 / v5p); 1 on v5e / v6e."""
    try:
        kind = jax.devices()[0].device_kind.lower()
    except Exception:
        return 1
    return 2 if any(t in kind for t in ("v7", "v4", "v5p")) else 1


NC = _tensorcores_per_chip()   # hidden-dim split factor (1 or 2)
HID_BLK = HID_PAD // NC        # hidden columns handled per grid-c step


def mlp_kernel(x_ref, w1_ref, b1_ref, w2_ref, o_ref, acc_ref):
    # grid = (NC hidden slices ["parallel"], K chunks ["arbitrary" reduction])
    k = pl.program_id(1)

    @pl.when(k == 0)
    def _init():
        acc_ref[...] = jnp.zeros_like(acc_ref)

    # Layer-1 partial product on this K chunk: bf16 x bf16 -> f32 accumulate.
    acc_ref[...] += jnp.dot(
        x_ref[...], w1_ref[...], preferred_element_type=jnp.float32
    )

    @pl.when(k == pl.num_programs(1) - 1)
    def _epilogue():
        # Bias + ReLU for this hidden slice (exact: both are per-column),
        # then this slice's contribution to the layer-2 logits.
        h = jnp.maximum(acc_ref[...] + b1_ref[...], 0.0).astype(jnp.bfloat16)
        z = jnp.dot(h, w2_ref[...], preferred_element_type=jnp.float32)
        o_ref[...] = z[None, :, :]          # partial logits for slice c


def prepare_params(w1, b1, w2, b2):
    """Pad feature dims to multiples of 128, cast W1/W2 to bf16 (done once)."""
    w1p = (
        jnp.zeros((IN_PAD, HID_PAD), jnp.bfloat16)
        .at[:IN_DIM, :HID_DIM]
        .set(w1.astype(jnp.bfloat16))
    )
    b1p = jnp.zeros((1, HID_PAD), jnp.float32).at[:, :HID_DIM].set(b1)
    w2p = (
        jnp.zeros((HID_PAD, OUT_DIM), jnp.bfloat16)
        .at[:HID_DIM, :]
        .set(w2.astype(jnp.bfloat16))
    )
    b2p = b2.astype(jnp.float32)
    return w1p, b1p, w2p, b2p


@jax.jit
def mlp_forward(x, w1p, b1p, w2p, b2p):
    B = x.shape[0]
    # Zero-pad + bf16-cast the activations (inert through the matmul).
    xp = (
        jnp.zeros((B, IN_PAD), jnp.bfloat16)
        .at[:, :IN_DIM]
        .set(x.astype(jnp.bfloat16))
    )

    # NOTE: for large batches (>~256) add batch as the OUTERMOST "parallel"
    # grid axis with large batch blocks and keep K innermost/"arbitrary", so
    # the 6 MiB weight stream is paid once, not once per batch block.
    partials = pl.pallas_call(
        mlp_kernel,
        out_shape=jax.ShapeDtypeStruct((NC, B, OUT_DIM), jnp.float32),
        grid_spec=pltpu.PrefetchScalarGridSpec(
            num_scalar_prefetch=0,
            grid=(NC, IN_PAD // TK),
            in_specs=[
                pl.BlockSpec((B, TK), lambda c, k: (0, k)),             # x chunk
                pl.BlockSpec((TK, HID_BLK), lambda c, k: (k, c)),       # W1 chunk
                pl.BlockSpec((1, HID_BLK), lambda c, k: (0, c)),        # b1 slice
                pl.BlockSpec((HID_BLK, OUT_DIM), lambda c, k: (c, 0)),  # W2 slice
            ],
            out_specs=pl.BlockSpec((1, B, OUT_DIM), lambda c, k: (c, 0, 0)),
            scratch_shapes=[pltpu.VMEM((B, HID_BLK), jnp.float32)],     # f32 acc
        ),
        compiler_params=pltpu.CompilerParams(
            # c axis shards across the two TensorCores on v7x/v4/v5p;
            # k is the reduction axis with a resident output block.
            dimension_semantics=("parallel", "arbitrary"),
            vmem_limit_bytes=32 << 20,
        ),
    )(xp, w1p, b1p, w2p)

    # Combine the per-slice partial logits; b2 + sigmoid on a (B, 10) tensor
    # are negligible and fuse into the surrounding jit.
    return jax.nn.sigmoid(partials.sum(axis=0) + b2p)


def init_params(key):
    k1, k2, k3, k4 = jax.random.split(key, 4)
    # Deterministic synthetic params (uniform, PyTorch-default-like scale),
    # stored as (in_features, out_features).
    bound1 = 1.0 / (IN_DIM ** 0.5)
    bound2 = 1.0 / (HID_DIM ** 0.5)
    w1 = jax.random.uniform(k1, (IN_DIM, HID_DIM), jnp.float32, -bound1, bound1)
    b1 = jax.random.uniform(k2, (1, HID_DIM), jnp.float32, -bound1, bound1)
    w2 = jax.random.uniform(k3, (HID_DIM, OUT_DIM), jnp.float32, -bound2, bound2)
    b2 = jax.random.uniform(k4, (1, OUT_DIM), jnp.float32, -bound2, bound2)
    return w1, b1, w2, b2


if __name__ == "__main__":
    key = jax.random.PRNGKey(0)
    kx, kp = jax.random.split(key)

    B = 2  # small batch
    x = jax.random.normal(kx, (B, IN_DIM), jnp.float32)
    w1, b1, w2, b2 = init_params(kp)

    params = prepare_params(w1, b1, w2, b2)
    y = mlp_forward(x, *params)
    jax.block_until_ready(y)
    assert y.shape == (B, OUT_DIM)

    hi = jax.lax.Precision.HIGHEST

    # Reference 1: same bf16 rounding of x / W1 / h / W2 as the kernel,
    # f32 math everywhere else.
    x_bf = x.astype(jnp.bfloat16).astype(jnp.float32)
    w1_bf = w1.astype(jnp.bfloat16).astype(jnp.float32)
    w2_bf = w2.astype(jnp.bfloat16).astype(jnp.float32)
    h_bf = jnp.maximum(jnp.dot(x_bf, w1_bf, precision=hi) + b1, 0.0)
    h_q = h_bf.astype(jnp.bfloat16).astype(jnp.float32)
    ref_bf = jax.nn.sigmoid(jnp.dot(h_q, w2_bf, precision=hi) + b2)
    assert jnp.allclose(y, ref_bf, atol=2e-3, rtol=2e-3)

    # Reference 2: full f32 PyTorch-equivalent forward (looser tolerance due
    # to the bf16 weight/activation quantization in the kernel).
    h_ref = jnp.maximum(jnp.dot(x, w1, precision=hi) + b1, 0.0)
    ref = jax.nn.sigmoid(jnp.dot(h_ref, w2, precision=hi) + b2)
    assert jnp.allclose(y, ref, atol=2e-2, rtol=2e-2)

    print("KERNEL_OK")
</pallas_src>

<mosaic_0001>
module attributes {stable_mosaic.version = 11 : i64} {
  func.func @mlp_kernel(%arg0: i32, %arg1: i32, %arg2: memref<2x1536xbf16, #tpu.memory_space<vmem>>, %arg3: memref<1536x1024xbf16, #tpu.memory_space<vmem>>, %arg4: memref<1x1024xf32, #tpu.memory_space<vmem>>, %arg5: memref<1024x10xbf16, #tpu.memory_space<vmem>>, %arg6: memref<1x2x10xf32, #tpu.memory_space<vmem>>, %arg7: memref<2x1024xf32, #tpu.memory_space<vmem>>) attributes {dimension_semantics = [#tpu.dimension_semantics<parallel>, #tpu.dimension_semantics<arbitrary>], iteration_bounds = array<i64: 1, 2>, scalar_prefetch = 0 : i64, scratch_operands = 1 : i64, tpu.core_type = #tpu.core_type<tc>, window_params = [{transform_indices = @transform_0, window_bounds = array<i64: 2, 1536>}, {transform_indices = @transform_1, window_bounds = array<i64: 1536, 1024>}, {transform_indices = @transform_2, window_bounds = array<i64: 1, 1024>}, {transform_indices = @transform_3, window_bounds = array<i64: 1024, 10>}, {transform_indices = @transform_4, window_bounds = array<i64: 1, 2, 10>}]} {
    %c0_i32 = arith.constant 0 : i32
    %0 = arith.cmpi eq, %arg1, %c0_i32 : i32
    %1 = arith.extui %0 : i1 to i32
    %c0_i32_0 = arith.constant 0 : i32
    %2 = arith.cmpi ne, %1, %c0_i32_0 : i32
    scf.if %2 {
      %cst_9 = arith.constant 0.000000e+00 : f32
      %12 = vector.broadcast %cst_9 : f32 to vector<2x1024xf32>
      %c0_10 = arith.constant 0 : index
      %c0_11 = arith.constant 0 : index
      %13 = vector.load %arg7[%c0_10, %c0_11] : memref<2x1024xf32, #tpu.memory_space<vmem>>, vector<2x1024xf32>
      tpu.vector_store %arg7[%c0_10, %c0_11], %12 {strides = array<i32>} : memref<2x1024xf32, #tpu.memory_space<vmem>>, vector<2x1024xf32>,
    } else {
    }
    %c0 = arith.constant 0 : index
    %c0_1 = arith.constant 0 : index
    %3 = vector.load %arg7[%c0, %c0_1] : memref<2x1024xf32, #tpu.memory_space<vmem>>, vector<2x1024xf32>
    %c0_2 = arith.constant 0 : index
    %c0_3 = arith.constant 0 : index
    %4 = vector.load %arg2[%c0_2, %c0_3] : memref<2x1536xbf16, #tpu.memory_space<vmem>>, vector<2x1536xbf16>
    %c0_4 = arith.constant 0 : index
    %c0_5 = arith.constant 0 : index
    %5 = vector.load %arg3[%c0_4, %c0_5] : memref<1536x1024xbf16, #tpu.memory_space<vmem>>, vector<1536x1024xbf16>
    %cst = arith.constant dense<0.000000e+00> : vector<2x1024xf32>
    %6 = tpu.matmul %4, %5, %cst {dimension_numbers = #tpu.dot_dimension_numbers<[1], [0], [0], [1], [0, 0, 1, 1], [], []>} : vector<2x1536xbf16>, vector<1536x1024xbf16>, vector<2x1024xf32> -> vector<2x1024xf32>
    %7 = arith.addf %3, %6 : vector<2x1024xf32>
    %c0_6 = arith.constant 0 : index
    %c0_7 = arith.constant 0 : index
    %8 = vector.load %arg7[%c0_6, %c0_7] : memref<2x1024xf32, #tpu.memory_space<vmem>>, vector<2x1024xf32>
    tpu.vector_store %arg7[%c0_6, %c0_7], %7 {strides = array<i32>} : memref<2x1024xf32, #tpu.memory_space<vmem>>, vector<2x1024xf32>,
    %c1_i32 = arith.constant 1 : i32
    %9 = arith.cmpi eq, %arg1, %c1_i32 : i32
    %10 = arith.extui %9 : i1 to i32
    %c0_i32_8 = arith.constant 0 : i32
    %11 = arith.cmpi ne, %10, %c0_i32_8 : i32
    scf.if %11 {
      %c0_9 = arith.constant 0 : index
      %c0_10 = arith.constant 0 : index
      %12 = vector.load %arg7[%c0_9, %c0_10] : memref<2x1024xf32, #tpu.memory_space<vmem>>, vector<2x1024xf32>
      %c0_11 = arith.constant 0 : index
      %c0_12 = arith.constant 0 : index
      %13 = vector.load %arg4[%c0_11, %c0_12] : memref<1x1024xf32, #tpu.memory_space<vmem>>, vector<1x1024xf32>
      %14 = vector.broadcast %13 : vector<1x1024xf32> to vector<2x1024xf32>
      %15 = arith.addf %12, %14 : vector<2x1024xf32>
      %cst_13 = arith.constant 0.000000e+00 : f32
      %16 = vector.broadcast %cst_13 : f32 to vector<2x1024xf32>
      %17 = arith.maximumf %15, %16 : vector<2x1024xf32>
      %18 = arith.truncf %17 : vector<2x1024xf32> to vector<2x1024xbf16>
      %c0_14 = arith.constant 0 : index
      %c0_15 = arith.constant 0 : index
      %19 = vector.load %arg5[%c0_14, %c0_15] : memref<1024x10xbf16, #tpu.memory_space<vmem>>, vector<1024x10xbf16>
      %cst_16 = arith.constant dense<0.000000e+00> : vector<2x10xf32>
      %20 = tpu.matmul %18, %19, %cst_16 {dimension_numbers = #tpu.dot_dimension_numbers<[1], [0], [0], [1], [0, 0, 1, 1], [], []>} : vector<2x1024xbf16>, vector<1024x10xbf16>, vector<2x10xf32> -> vector<2x10xf32>
      %21 = vector.shape_cast %20 : vector<2x10xf32> to vector<1x2x10xf32>
      %c0_17 = arith.constant 0 : index
      %c0_18 = arith.constant 0 : index
      %c0_19 = arith.constant 0 : index
      %22 = vector.load %arg6[%c0_17, %c0_18, %c0_19] : memref<1x2x10xf32, #tpu.memory_space<vmem>>, vector<1x2x10xf32>
      tpu.vector_store %arg6[%c0_17, %c0_18, %c0_19], %21 {strides = array<i32>} : memref<1x2x10xf32, #tpu.memory_space<vmem>>, vector<1x2x10xf32>,
    } else {
    }
    return
  }
  func.func @transform_0(%arg0: i32, %arg1: i32) -> (i32, i32) {
    %c0_i32 = arith.constant 0 : i32
    %c0_i32_0 = arith.constant 0 : i32
    return %c0_i32, %arg1 : i32, i32
  }
  func.func @transform_1(%arg0: i32, %arg1: i32) -> (i32, i32) {
    %c0_i32 = arith.constant 0 : i32
    return %arg1, %arg0 : i32, i32
  }
  func.func @transform_2(%arg0: i32, %arg1: i32) -> (i32, i32) {
    %c0_i32 = arith.constant 0 : i32
    %c0_i32_0 = arith.constant 0 : i32
    return %c0_i32, %arg0 : i32, i32
  }
  func.func @transform_3(%arg0: i32, %arg1: i32) -> (i32, i32) {
    %c0_i32 = arith.constant 0 : i32
    %c0_i32_0 = arith.constant 0 : i32
    return %arg0, %c0_i32 : i32, i32
  }
  func.func @transform_4(%arg0: i32, %arg1: i32) -> (i32, i32, i32) {
    %c0_i32 = arith.constant 0 : i32
    %c0_i32_0 = arith.constant 0 : i32
    %c0_i32_1 = arith.constant 0 : i32
    return %arg0, %c0_i32, %c0_i32_0 : i32, i32, i32
  }
}

</mosaic_0001>

<bundles_post_ra>
// kernel: mlp_forward.1
= control target key start
LH: loop header
LB: loop body
LE: loop exit
PB: predicated region body
PF: predicated region fallthrough
CT: control target
= control target key end

     0   :  { %9 = vsyncpa [#allocation4], 0  ;;  %s9533_s0 = inlined_call_operand.vmem [shape: bf16[2,3072], index: 0, kind: input, shape index: {}]   ;;  %s9534_s1 = inlined_call_operand.hbm [shape: bf16[3072,1024], index: 1, kind: input, shape index: {}]   ;;  %s9535_s2 = inlined_call_operand.hbm [shape: f32[1,1024], index: 2, kind: input, shape index: {}]   ;;  %s9536_s3 = inlined_call_operand.vmem [shape: bf16[1024,10], index: 3, kind: input, shape index: {}]   ;;  %s9537_s4 = inlined_call_operand.vmem [shape: f32[1,2,10], index: 4, kind: output, shape index: {}]  }
   0x1   :  { %11 = vsyncpa [#allocation4 + $0x1], 0 }
   0x2   :  { %12 = vsyncpa [#allocation6], 0  ;;  %s8253_s15 = smov 0   ;;  %s8255_s16 = smov 0  }
   0x3   :  { %s8257_s17 = smov 0   ;;  %s8259_s18 = smov 0  }
   0x4   :  { %s8261_s19 = smov 0   ;;  %s8263_s20 = smov 0  }
   0x5 LB: > { %s6951_s21 = sadd.s32 4294967295, %s8219_s20   ;;  %s65_s22 = sadd.s32 1, %s8207_s17  ;;  %s8219_s20 = sphi %s8263_s20, %s18_s20   ;;  %s8215_s19 = sphi %s8261_s19, %s9558_s19   ;;  %s8211_s18 = sphi %s8259_s18, %s9557_s18   ;;  %s8207_s17 = sphi %s8257_s17, %s9556_s17   ;;  %s8203_s16 = sphi %s8255_s16, %s9555_s16   ;;  %s8199_s15 = sphi %s8253_s15, %s9554_s15  }
   0x6   : > { %p72_p0 = scmp.ne.s32.totalorder %s8207_s17, %s8203_s16  ;;  %p73_p1 = scmp.eq.s32.totalorder %s8219_s20, 0 }
   0x7   : > { %p78_p2 = scmp.ne.s32.totalorder %s8203_s16, %s8199_s15  ;;  %p8287_p3 = scmp.eq.s32.totalorder %s6951_s21, 0 }
   0x8   : > { %p74_p4 = por %p73_p1, %p72_p0  ;;  %p6952_p5 = scmp.ge.s32.totalorder %s8219_s20, 1 }
   0x9   : > { %s9543_s23 = scalar_select %p8287_p3, 1, 0 }
   0xa   : > { %p8294_p6 = por %p8287_p3, %p78_p2  ;;  %p167_p7 = scmp.lt.s32.totalorder %s8219_s20, 3 }
   0xb   : > { %s8221_s26 = smov [#allocation5]   ;;  %p7986_p10 = scmp.lt.s32.totalorder %s8219_s20, 2 }
   0xc   : > { %s9544_s24 = scalar_select %p8294_p6, 1, 0 }
   0xd   : > { %p8299_p8 = pnand %p6952_p5, %p167_p7  ;;  %s183_s27 = sshll.u32 %s8221_s26, 4  ;;  %s184_s27 = int_to_ptr.vmem [resolvable:$true] %s183_s27 }
   0xe   : > { %s211_s28 = sand.u32 1, %s8207_s17   ;;  %p8313_p12 = pnand %p7986_p10, %p74_p4 }
   0xf   : > { %s9545_s25 = scalar_select %p8299_p8, 1, 0 }
  0x10   : > { %p7977_p9 = pneg %p8299_p8  ;;  %s8107_s7 = scalar_lea.hbm %s9535_s2, 128 }
  0x11   : > { %s9547_s30 = scalar_select %p8313_p12, 1, 0 }
  0x12   : > { %p8309_p11 = pnand %p7977_p9, %p8287_p3  ;;  %p8108_p13 = scmp.ne.s32.totalorder %s9535_s2, %s8107_s7 }
  0x13   : > { %p8114_p5 = scmp.lt.u32.totalorder %s8107_s7, %s9535_s2 }
  0x14   : > { %p8109_p0 = pneg %p8309_p11 }
  0x16   : > { %p8110_p1 = pnand %p8109_p0, %p8108_p13 }
  0x18   : > { %p8111_p2 = pneg %p8110_p1 }
  0x1a   : > { %p8116_p4 = pnand %p8114_p5, %p8111_p2 }
  0x1c   : > { %8119 = shalt.err (!%p8116_p4)
}
  0x1d   : > { %s8120_s12 = scalar_lea.vmem %s184_s27, 128  ;;  %p8128_p3 = scmp.lt.s32.totalorder %s184_s27, %s184_s27 }
  0x1e   : > { %p8121_p7 = scmp.ne.s32.totalorder %s184_s27, %s8120_s12  ;;  %p8129_p6 = scmp.lt.s32.totalorder %s8120_s12, %s8120_s12 }
  0x20   : > { %p8123_p9 = pnand %p8121_p7, %p8109_p0  ;;  %p8130_p8 = por %p8129_p6, %p8128_p3 }
  0x22   : > { %p8124_p10 = pneg %p8123_p9 }
  0x24   : > { %p8131_p12 = pnand %p8130_p8, %p8124_p10 }
  0x26   : > { %8134 = shalt.err (!%p8131_p12)
}
  0x27   : > { %7980 = dma.hbm_to_vmem [thread:$0]  (!%p8309_p11), %s9535_s2, 128, %s184_s27, [#allocation6]  }
  0x28   : > { %s27_s15 = sadd.s32 1, %s8215_s19  ;;  %s7969_s21 = smul.u32 6144, %s211_s28 }
  0x29   : > { %p28_p13 = scmp.ge.s32.totalorder %s27_s15, 2  ;;  %s7800_s26 = smul.u32 98304, %s8215_s19 }
  0x2a   : > { %s215_s7 = scalar_lea.vmem [#allocation3], %s7969_s21  ;;  %s8354_s10 = scalar_lea.sflag [#allocation4], %s211_s28 }
  0x2b   : > { %s9560_s15 = smov (%p28_p13, %s27_s15), 0  ;;  %s8342_s6 = scalar_lea.hbm %s9534_s1, %s7800_s26 }
  0x2c   : > { %s225_s27 = sshll.u32 %s215_s7, 4  ;;  %s60_s8 = ssub.s32 %s8215_s19, %s9560_s15  ;;  %s8346_s27 = int_to_ptr.vmem [resolvable:$true] %s225_s27 }
  0x2d   : > { %p8348_p3 = scmp.eq.s32.totalorder %s60_s8, 0  ;;  %s8135_s11 = scalar_lea.hbm %s8342_s6, 98304 }
  0x2e   : > { %p8136_p6 = scmp.ne.s32.totalorder %s8342_s6, %s8135_s11  ;;  %p9549_p8 = scmp.ne.s32.totalorder %s9547_s30, 0 }
  0x2f   : > { %s8140_s14 = scalar_lea.hbm %s9534_s1, 196608  ;;  %p8141_p1 = scmp.lt.u32.totalorder %s8342_s6, %s9534_s1 }
  0x30   : > { %p8137_p11 = pneg %p9549_p8  ;;  %p8142_p2 = scmp.lt.u32.totalorder %s8140_s14, %s8135_s11 }
  0x31   : > { %p8144_p4 = scmp.lt.u32.totalorder %s8135_s11, %s8342_s6 }
  0x32   : > { %p8138_p12 = pnand %p8137_p11, %p8136_p6  ;;  %p8143_p5 = por %p8142_p2, %p8141_p1 }
  0x34   : > { %p8139_p0 = pneg %p8138_p12  ;;  %p8145_p7 = por %p8144_p4, %p8143_p5 }
  0x36   : > { %p8146_p9 = pnand %p8145_p7, %p8139_p0 }
  0x38   : > { %8149 = shalt.err (!%p8146_p9)
}
  0x39   : > { %s8150_s28 = scalar_lea.vmem %s8346_s27, 98304  ;;  %s8222_s5 = smov [#allocation3]  }
  0x3a   : > { %p8151_p10 = scmp.ne.s32.totalorder %s8346_s27, %s8150_s28  ;;  %s8155_s29 = sshll.u32 %s8222_s5, 4  ;;  %s8156_s29 = int_to_ptr.vmem [resolvable:$false] %s8155_s29 }
  0x3b   : > { %s8157_s7 = scalar_lea.vmem %s8156_s29, 196608  ;;  %p8158_p12 = scmp.lt.s32.totalorder %s8346_s27, %s8156_s29 }
  0x3c   : > { %p8153_p13 = pnand %p8151_p10, %p8137_p11  ;;  %p8159_p1 = scmp.lt.s32.totalorder %s8157_s7, %s8150_s28 }
  0x3e   : > { %p8154_p6 = pneg %p8153_p13  ;;  %p8160_p2 = por %p8159_p1, %p8158_p12 }
  0x40   : > { %p8161_p5 = pnand %p8160_p2, %p8154_p6 }
  0x42   : > { %8164 = shalt.err (!%p8161_p5)
}
  0x43   : > { %s8223_s8 = smov 512   ;;  %s8224_s11 = smov 32  }
  0x44   : > { %7984 = dma.hbm_to_vmem [thread:$0]  (!%p9549_p8), %s8342_s6, 98304, %s8346_s27, %s8354_s10, %s8223_s8, %s8223_s8, %s8224_s11  }
  0x45   : > { %s8387_s12 = scalar_select %p8348_p3, %s8207_s17, %s65_s22  }
  0x46   : > { %p9550_p11 = scmp.ne.s32.totalorder %s9545_s25, 0 }
  0x47   : > { %s239_s13 = sand.u32 (!%p9550_p11), 1, %s8203_s16   ;;  %p9551_p0 = scmp.ne.s32.totalorder (!%p9550_p11), %s9544_s24, 0 }
  0x48   : > { %237 = sbr.rel (%p9550_p11) target bundleno = 1342 (0x53e), region = 36  ;;  %s240_s21 = scalar_lea.sflag (!%p9550_p11), [#allocation4], %s239_s13 }
  0x49   : > { %s7970_s14 = smul.u32 (!%p9550_p11), 6144, %s239_s13 }
  0x4b   : > { %s8392_s26 = scalar_lea.vmem (!%p9550_p11), [#allocation3], %s7970_s14 }
  0x4f   : > { %8190 = dma.done.wait (%p9551_p0), %s240_s21, 98304  }
  0x50   : > { %8192 = vsyncadd (%p9551_p0), %s240_s21, 4294868992  ;;  %p9552_p8 = scmp.ne.s32.totalorder %s9543_s23, 0 }
  0x52   : > { %8194 = dma.done.wait (%p9552_p8), [#allocation6], 128  }
  0x53   : > { %8196 = vsyncadd (%p9552_p8), [#allocation6], 4294967168  ;;  %s280_s22 = smul.u32 12, %s8211_s18  ;;  %p6960_p4 = scmp.ne.s32.totalorder %s8211_s18, 0 }
  0x54   : > { %v8225_v0 = vmov (!%p6960_p4), 0.0  }
  0x55   : > { %p281_p3 = scmp.lt.s32.totalorder %s280_s22, 23  ;;  %302 = sbr.rel (%p6960_p4) target bundleno = 92 (0x5c), region = 48  ;;  %303 = vst [vmem:[#allocation2] sm:$0xff] (!%p6960_p4), %v8225_v0  ;;  %304 = vst [vmem:[#allocation2 + $0x8] sm:$0xff] (!%p6960_p4), %v8225_v0 }
  0x57   : > { %s9562_s22 = smov (!%p281_p3, %s280_s22), 23 }
  0x58   : > { %s8406_s6 = scalar_lea.vmem %s9533_s0, %s9562_s22 }
  0x5c PF: > { %v309_v1 = vld [vmem:[%s8392_s26] sm:$0xff]  ;;  %v310_v3 = vld [vmem:[%s8392_s26 + $0x8] sm:$0xff]  ;;  %v8226_v33 = vmov 1966171168   ;;  %v1083_v35 = vlaneseq  ;;  %v8443_v60 = vld [vmem:[%s8406_s6] sm:$0xff]  ;;  %p7730_p7 = scmp.ne.s32.totalorder %s8211_s18, 1 }
  0x5d   : > { %v313_v2 = vld [vmem:[%s8392_s26 + $0x20] sm:$0xff]  ;;  %v314_v5 = vld [vmem:[%s8392_s26 + $0x28] sm:$0xff]  ;;  %v1081_v34 = vunpack.c.l.s4 %v8226_v33  ;;  %vm6840_vm0 = vcmask (!%p7730_p7), 74752  }
  0x5e   : > { %v6963_v4 = vcombine.high %v309_v1, %v313_v2  ;;  %v6962_v6 = vcombine.low %v309_v1, %v313_v2  ;;  %v317_v7 = vld [vmem:[%s8392_s26 + $0x40] sm:$0xff]  ;;  %v6965_v9 = vcombine.high %v310_v3, %v314_v5  ;;  %v6964_v10 = vcombine.low %v310_v3, %v314_v5  ;;  %v318_v12 = vld [vmem:[%s8392_s26 + $0x48] sm:$0xff] }
  0x5f   : > { %v321_v8 = vld [vmem:[%s8392_s26 + $0x60] sm:$0xff]  ;;  %v322_v13 = vld [vmem:[%s8392_s26 + $0x68] sm:$0xff]  ;;  %v1082_v44 = vunpack.c.0.s8 %v1081_v34  ;;  %v8431_v45 = vshrl.u32 %v1083_v35, 7 }
  0x60   : > { %v6971_v11 = vcombine.high %v317_v7, %v321_v8  ;;  %v325_v14 = vld [vmem:[%s8392_s26 + $0x80] sm:$0xff]  ;;  %5004 = vmatprep.subr.bf16.mxu0 %v6963_v4  ;;  %v6973_v15 = vcombine.high %v318_v12, %v322_v13  ;;  %v326_v17 = vld [vmem:[%s8392_s26 + $0x88] sm:$0xff]  ;;  %5250 = vmatprep.subr.bf16.mxu1 %v6965_v9  ;;  %v6970_v19 = vcombine.low %v317_v7, %v321_v8 }
  0x61   : > { %v329_v16 = vld [vmem:[%s8392_s26 + $0xa0] sm:$0xff]  ;;  %v330_v18 = vld [vmem:[%s8392_s26 + $0xa8] sm:$0xff]  ;;  %5005 = vmatpush1.bf16.msra.mxu0 %v6962_v6  ;;  %5251 = vmatpush1.bf16.msra.mxu1 %v6964_v10  ;;  %v6972_v20 = vcombine.low %v318_v12, %v322_v13  ;;  %v8438_v54 = vsub.s32 %v1082_v44, %v8431_v45 }
  0x62   : > { %5006 = vmatprep.subr.bf16.mxu0 %v6971_v11  ;;  %v6979_v21 = vcombine.high %v325_v14, %v329_v16  ;;  %5252 = vmatprep.subr.bf16.mxu1 %v6973_v15  ;;  %v6981_v22 = vcombine.high %v326_v17, %v330_v18  ;;  %v333_v23 = vld [vmem:[%s8392_s26 + $0xc0] sm:$0xff]  ;;  %v334_v25 = vld [vmem:[%s8392_s26 + $0xc8] sm:$0xff]  ;;  %v6978_v27 = vcombine.low %v325_v14, %v329_v16 }
  0x63   : > { %v337_v24 = vld [vmem:[%s8392_s26 + $0xe0] sm:$0xff]  ;;  %v338_v26 = vld [vmem:[%s8392_s26 + $0xe8] sm:$0xff]  ;;  %v6980_v28 = vcombine.low %v326_v17, %v330_v18  ;;  %v8449_v0 = vrot.slane %v8443_v60, %v8438_v54 }
  0x64   : > { %v6987_v29 = vcombine.high %v333_v23, %v337_v24  ;;  %v6989_v30 = vcombine.high %v334_v25, %v338_v26  ;;  %v341_v31 = vld [vmem:[%s8392_s26 + $0x100] sm:$0xff]  ;;  %v342_v36 = vld [vmem:[%s8392_s26 + $0x108] sm:$0xff]  ;;  %v6986_v38 = vcombine.low %v333_v23, %v337_v24  ;;  %v6988_v39 = vcombine.low %v334_v25, %v338_v26 }
  0x65   : > { %5007 = vmatpush1.bf16.msra.mxu0 %v6970_v19  ;;  %5253 = vmatpush1.bf16.msra.mxu1 %v6972_v20  ;;  %v345_v32 = vld [vmem:[%s8392_s26 + $0x120] sm:$0xff]  ;;  %v346_v37 = vld [vmem:[%s8392_s26 + $0x128] sm:$0xff]  ;;  %v1094_v4 = vcombine.high %v8449_v0, %v8449_v0 }
  0x66   : > { %5008 = vmatprep.subr.bf16.mxu0 %v6979_v21  ;;  %5254 = vmatprep.subr.bf16.mxu1 %v6981_v22  ;;  %v6995_v40 = vcombine.high %v341_v31, %v345_v32  ;;  %v6997_v41 = vcombine.high %v342_v36, %v346_v37  ;;  %v349_v42 = vld [vmem:[%s8392_s26 + $0x140] sm:$0xff]  ;;  %v350_v46 = vld [vmem:[%s8392_s26 + $0x148] sm:$0xff]  ;;  %v6994_v48 = vcombine.low %v341_v31, %v345_v32 }
  0x67   : > { %v353_v43 = vld [vmem:[%s8392_s26 + $0x160] sm:$0xff]  ;;  %v354_v47 = vld [vmem:[%s8392_s26 + $0x168] sm:$0xff]  ;;  %v6996_v49 = vcombine.low %v342_v36, %v346_v37  ;;  %v8458_v10 = vrot.slane %v1094_v4, %v8438_v54 }
  0x68   : > { %v7003_v50 = vcombine.high %v349_v42, %v353_v43  ;;  %v7005_v51 = vcombine.high %v350_v46, %v354_v47  ;;  %v357_v52 = vld [vmem:[%s8392_s26 + $0x180] sm:$0xff]  ;;  %v358_v55 = vld [vmem:[%s8392_s26 + $0x188] sm:$0xff]  ;;  %v7002_v57 = vcombine.low %v349_v42, %v353_v43  ;;  %v7004_v58 = vcombine.low %v350_v46, %v354_v47 }
  0x69   : > { %5009 = vmatpush1.bf16.msra.mxu0 %v6978_v27  ;;  %5255 = vmatpush1.bf16.msra.mxu1 %v6980_v28  ;;  %v361_v53 = vld [vmem:[%s8392_s26 + $0x1a0] sm:$0xff]  ;;  %v362_v56 = vld [vmem:[%s8392_s26 + $0x1a8] sm:$0xff] }
  0x6a   : > { %5010 = vmatprep.subr.bf16.mxu0 %v6987_v29  ;;  %5256 = vmatprep.subr.bf16.mxu1 %v6989_v30  ;;  %v7011_v59 = vcombine.high %v357_v52, %v361_v53  ;;  %v7013_v61 = vcombine.high %v358_v55, %v362_v56  ;;  %v365_v62 = vld [vmem:[%s8392_s26 + $0x1c0] sm:$0xff]  ;;  %v366_v1 = vld [vmem:[%s8392_s26 + $0x1c8] sm:$0xff]  ;;  %v7010_v3 = vcombine.low %v357_v52, %v361_v53 }
  0x6b   : > { %v369_v63 = vld [vmem:[%s8392_s26 + $0x1e0] sm:$0xff]  ;;  %v370_v2 = vld [vmem:[%s8392_s26 + $0x1e8] sm:$0xff]  ;;  %v7012_v5 = vcombine.low %v358_v55, %v362_v56  ;;  %5036 = vmatprep.mubr.bf16.mxu0 %v8458_v10  ;;  %5282 = vmatprep.mubr.bf16.mxu1 %v8458_v10 }
  0x6c   : > { %v7019_v6 = vcombine.high %v365_v62, %v369_v63  ;;  %v7021_v7 = vcombine.high %v366_v1, %v370_v2  ;;  %v373_v8 = vld [vmem:[%s8392_s26 + $0x200] sm:$0xff]  ;;  %v374_v11 = vld [vmem:[%s8392_s26 + $0x208] sm:$0xff]  ;;  %v7018_v13 = vcombine.low %v365_v62, %v369_v63  ;;  %v7020_v14 = vcombine.low %v366_v1, %v370_v2 }
  0x6d   : > { %5011 = vmatpush1.bf16.msra.mxu0 %v6986_v38  ;;  %5257 = vmatpush1.bf16.msra.mxu1 %v6988_v39  ;;  %v377_v9 = vld [vmem:[%s8392_s26 + $0x220] sm:$0xff]  ;;  %v378_v12 = vld [vmem:[%s8392_s26 + $0x228] sm:$0xff] }
  0x6e   : > { %5012 = vmatprep.subr.bf16.mxu0 %v6995_v40  ;;  %5258 = vmatprep.subr.bf16.mxu1 %v6997_v41  ;;  %v7027_v15 = vcombine.high %v373_v8, %v377_v9  ;;  %v7029_v16 = vcombine.high %v374_v11, %v378_v12  ;;  %v381_v17 = vld [vmem:[%s8392_s26 + $0x240] sm:$0xff]  ;;  %v382_v19 = vld [vmem:[%s8392_s26 + $0x248] sm:$0xff]  ;;  %v7026_v21 = vcombine.low %v373_v8, %v377_v9 }
  0x6f   : > { %v385_v18 = vld [vmem:[%s8392_s26 + $0x260] sm:$0xff]  ;;  %v386_v20 = vld [vmem:[%s8392_s26 + $0x268] sm:$0xff]  ;;  %v7028_v22 = vcombine.low %v374_v11, %v378_v12 }
  0x70   : > { %v7035_v23 = vcombine.high %v381_v17, %v385_v18  ;;  %v7037_v24 = vcombine.high %v382_v19, %v386_v20  ;;  %v389_v25 = vld [vmem:[%s8392_s26 + $0x280] sm:$0xff]  ;;  %v390_v27 = vld [vmem:[%s8392_s26 + $0x288] sm:$0xff]  ;;  %v7034_v29 = vcombine.low %v381_v17, %v385_v18  ;;  %v7036_v30 = vcombine.low %v382_v19, %v386_v20 }
  0x71   : > { %5013 = vmatpush1.bf16.msra.mxu0 %v6994_v48  ;;  %5259 = vmatpush1.bf16.msra.mxu1 %v6996_v49  ;;  %v393_v26 = vld [vmem:[%s8392_s26 + $0x2a0] sm:$0xff]  ;;  %v394_v28 = vld [vmem:[%s8392_s26 + $0x2a8] sm:$0xff] }
  0x72   : > { %5014 = vmatprep.subr.bf16.mxu0 %v7003_v50  ;;  %5260 = vmatprep.subr.bf16.mxu1 %v7005_v51  ;;  %v7043_v31 = vcombine.high %v389_v25, %v393_v26  ;;  %v7045_v32 = vcombine.high %v390_v27, %v394_v28  ;;  %v397_v33 = vld [vmem:[%s8392_s26 + $0x2c0] sm:$0xff]  ;;  %v398_v35 = vld [vmem:[%s8392_s26 + $0x2c8] sm:$0xff]  ;;  %v7042_v37 = vcombine.low %v389_v25, %v393_v26 }
  0x73   : > { %v401_v34 = vld [vmem:[%s8392_s26 + $0x2e0] sm:$0xff]  ;;  %v402_v36 = vld [vmem:[%s8392_s26 + $0x2e8] sm:$0xff]  ;;  %v7044_v38 = vcombine.low %v390_v27, %v394_v28 }
  0x74   : > { %v7051_v39 = vcombine.high %v397_v33, %v401_v34  ;;  %v7053_v40 = vcombine.high %v398_v35, %v402_v36  ;;  %v405_v41 = vld [vmem:[%s8392_s26 + $0x300] sm:$0xff]  ;;  %v406_v43 = vld [vmem:[%s8392_s26 + $0x308] sm:$0xff]  ;;  %v7050_v46 = vcombine.low %v397_v33, %v401_v34  ;;  %v7052_v47 = vcombine.low %v398_v35, %v402_v36 }
  0x75   : > { %5015 = vmatpush1.bf16.msra.mxu0 %v7002_v57  ;;  %5261 = vmatpush1.bf16.msra.mxu1 %v7004_v58  ;;  %v409_v42 = vld [vmem:[%s8392_s26 + $0x320] sm:$0xff]  ;;  %v410_v44 = vld [vmem:[%s8392_s26 + $0x328] sm:$0xff]  ;;  %v8508_v33 = vcombine.high %v8458_v10, %v8458_v10 }
  0x76   : > { %5016 = vmatprep.subr.bf16.mxu0 %v7011_v59  ;;  %5262 = vmatprep.subr.bf16.mxu1 %v7013_v61  ;;  %v7059_v48 = vcombine.high %v405_v41, %v409_v42  ;;  %v7061_v49 = vcombine.high %v406_v43, %v410_v44  ;;  %v413_v50 = vld [vmem:[%s8392_s26 + $0x340] sm:$0xff]  ;;  %v414_v52 = vld [vmem:[%s8392_s26 + $0x348] sm:$0xff]  ;;  %v7058_v55 = vcombine.low %v405_v41, %v409_v42 }
  0x77   : > { %v417_v51 = vld [vmem:[%s8392_s26 + $0x360] sm:$0xff]  ;;  %v418_v53 = vld [vmem:[%s8392_s26 + $0x368] sm:$0xff]  ;;  %v7060_v56 = vcombine.low %v406_v43, %v410_v44 }
  0x78   : > { %v7067_v57 = vcombine.high %v413_v50, %v417_v51  ;;  %v7069_v58 = vcombine.high %v414_v52, %v418_v53  ;;  %v421_v59 = vld [vmem:[%s8392_s26 + $0x380] sm:$0xff]  ;;  %v422_v62 = vld [vmem:[%s8392_s26 + $0x388] sm:$0xff]  ;;  %v7066_v1 = vcombine.low %v413_v50, %v417_v51  ;;  %v7068_v2 = vcombine.low %v414_v52, %v418_v53 }
  0x79   : > { %5017 = vmatpush1.bf16.msra.mxu0 %v7010_v3  ;;  %5263 = vmatpush1.bf16.msra.mxu1 %v7012_v5  ;;  %v425_v61 = vld [vmem:[%s8392_s26 + $0x3a0] sm:$0xff]  ;;  %v426_v63 = vld [vmem:[%s8392_s26 + $0x3a8] sm:$0xff] }
  0x7a   : > { %5018 = vmatprep.subr.bf16.mxu0 %v7019_v6  ;;  %5264 = vmatprep.subr.bf16.mxu1 %v7021_v7  ;;  %v7075_v3 = vcombine.high %v421_v59, %v425_v61  ;;  %v7077_v4 = vcombine.high %v422_v62, %v426_v63  ;;  %v429_v5 = vld [vmem:[%s8392_s26 + $0x3c0] sm:$0xff]  ;;  %v430_v7 = vld [vmem:[%s8392_s26 + $0x3c8] sm:$0xff]  ;;  %v7074_v9 = vcombine.low %v421_v59, %v425_v61 }
  0x7b   : > { %v433_v6 = vld [vmem:[%s8392_s26 + $0x3e0] sm:$0xff]  ;;  %v434_v8 = vld [vmem:[%s8392_s26 + $0x3e8] sm:$0xff]  ;;  %v7076_v11 = vcombine.low %v422_v62, %v426_v63 }
  0x7c   : > { %v7083_v12 = vcombine.high %v429_v5, %v433_v6  ;;  %v442_v17 = vld [vmem:[%s8392_s26 + $0x428] sm:$0xff]  ;;  %v7082_v18 = vcombine.low %v429_v5, %v433_v6  ;;  %v7084_v19 = vcombine.low %v430_v7, %v434_v8 }
  0x7d   : > { %5019 = vmatpush1.bf16.msra.mxu0 %v7018_v13  ;;  %5265 = vmatpush1.bf16.msra.mxu1 %v7020_v14  ;;  %v7085_v13 = vcombine.high %v430_v7, %v434_v8  ;;  %v437_v14 = vld [vmem:[%s8392_s26 + $0x400] sm:$0xff]  ;;  %v446_v25 = vld [vmem:[%s8392_s26 + $0x448] sm:$0xff] }
  0x7e   : > { %5020 = vmatprep.subr.bf16.mxu0 %v7027_v15  ;;  %5266 = vmatprep.subr.bf16.mxu1 %v7029_v16  ;;  %v441_v15 = vld [vmem:[%s8392_s26 + $0x420] sm:$0xff]  ;;  %v438_v16 = vld [vmem:[%s8392_s26 + $0x408] sm:$0xff] }
  0x7f   : > { %v7091_v20 = vcombine.high %v437_v14, %v441_v15  ;;  %v450_v26 = vld [vmem:[%s8392_s26 + $0x468] sm:$0xff]  ;;  %v7090_v27 = vcombine.low %v437_v14, %v441_v15  ;;  %v7092_v28 = vcombine.low %v438_v16, %v442_v17 }
  0x80   : > { %v458_v34 = vld [vmem:[%s8392_s26 + $0x4a8] sm:$0xff]  ;;  %v7100_v36 = vcombine.low %v446_v25, %v450_v26 }
  0x81   : > { %5021 = vmatpush1.bf16.msra.mxu0 %v7026_v21  ;;  %5267 = vmatpush1.bf16.msra.mxu1 %v7028_v22  ;;  %v7093_v21 = vcombine.high %v438_v16, %v442_v17  ;;  %v445_v22 = vld [vmem:[%s8392_s26 + $0x440] sm:$0xff]  ;;  %v462_v41 = vld [vmem:[%s8392_s26 + $0x4c8] sm:$0xff] }
  0x82   : > { %5022 = vmatprep.subr.bf16.mxu0 %v7035_v23  ;;  %5268 = vmatprep.subr.bf16.mxu1 %v7037_v24  ;;  %v449_v23 = vld [vmem:[%s8392_s26 + $0x460] sm:$0xff]  ;;  %v8500_v24 = vrot.slane %v8449_v0, %v8438_v54  ;;  %v454_v0 = vld [vmem:[%s8392_s26 + $0x488] sm:$0xff] }
  0x83   : > { %v7098_v35 = vcombine.low %v445_v22, %v449_v23  ;;  %v466_v42 = vld [vmem:[%s8392_s26 + $0x4e8] sm:$0xff]  ;;  %v7108_v44 = vcombine.low %v454_v0, %v458_v34 }
  0x84   : > { %v470_v50 = vld [vmem:[%s8392_s26 + $0x508] sm:$0xff]  ;;  %v7116_v53 = vcombine.low %v462_v41, %v466_v42 }
  0x85   : > { %5023 = vmatpush1.bf16.msra.mxu0 %v7034_v29  ;;  %5269 = vmatpush1.bf16.msra.mxu1 %v7036_v30  ;;  %v7099_v29 = vcombine.high %v445_v22, %v449_v23  ;;  %v7101_v30 = vcombine.high %v446_v25, %v450_v26  ;;  %v474_v51 = vld [vmem:[%s8392_s26 + $0x528] sm:$0xff] }
  0x86   : > { %5024 = vmatprep.subr.bf16.mxu0 %v7043_v31  ;;  %5270 = vmatprep.subr.bf16.mxu1 %v7045_v32  ;;  %v453_v31 = vld [vmem:[%s8392_s26 + $0x480] sm:$0xff]  ;;  %v478_v59 = vld [vmem:[%s8392_s26 + $0x548] sm:$0xff]  ;;  %v7124_v63 = vcombine.low %v470_v50, %v474_v51 }
  0x87   : > { %v457_v32 = vld [vmem:[%s8392_s26 + $0x4a0] sm:$0xff]  ;;  %v482_v61 = vld [vmem:[%s8392_s26 + $0x568] sm:$0xff] }
  0x88   : > { %v7106_v43 = vcombine.low %v453_v31, %v457_v32  ;;  %v486_v5 = vld [vmem:[%s8392_s26 + $0x588] sm:$0xff]  ;;  %v7132_v8 = vcombine.low %v478_v59, %v482_v61 }
  0x89   : > { %5025 = vmatpush1.bf16.msra.mxu0 %v7042_v37  ;;  %5271 = vmatpush1.bf16.msra.mxu1 %v7044_v38  ;;  %v7107_v37 = vcombine.high %v453_v31, %v457_v32  ;;  %v7109_v38 = vcombine.high %v454_v0, %v458_v34  ;;  %v490_v6 = vld [vmem:[%s8392_s26 + $0x5a8] sm:$0xff] }
  0x8a   : > { %5026 = vmatprep.subr.bf16.mxu0 %v7051_v39  ;;  %5272 = vmatprep.subr.bf16.mxu1 %v7053_v40  ;;  %v461_v39 = vld [vmem:[%s8392_s26 + $0x4c0] sm:$0xff]  ;;  %v494_v14 = vld [vmem:[%s8392_s26 + $0x5c8] sm:$0xff]  ;;  %v7140_v17 = vcombine.low %v486_v5, %v490_v6 }
  0x8b   : > { %v465_v40 = vld [vmem:[%s8392_s26 + $0x4e0] sm:$0xff]  ;;  %v498_v15 = vld [vmem:[%s8392_s26 + $0x5e8] sm:$0xff] }
  0x8c   : > { %v7114_v52 = vcombine.low %v461_v39, %v465_v40  ;;  %v502_v22 = vld [vmem:[%s8392_s26 + $0x608] sm:$0xff]  ;;  %v7148_v26 = vcombine.low %v494_v14, %v498_v15 }
  0x8d   : > { %5027 = vmatpush1.bf16.msra.mxu0 %v7050_v46  ;;  %5273 = vmatpush1.bf16.msra.mxu1 %v7052_v47  ;;  %v7115_v46 = vcombine.high %v461_v39, %v465_v40  ;;  %v7117_v47 = vcombine.high %v462_v41, %v466_v42  ;;  %v506_v23 = vld [vmem:[%s8392_s26 + $0x628] sm:$0xff] }
  0x8e   : > { %5028 = vmatprep.subr.bf16.mxu0 %v7059_v48  ;;  %5274 = vmatprep.subr.bf16.mxu1 %v7061_v49  ;;  %v469_v48 = vld [vmem:[%s8392_s26 + $0x500] sm:$0xff]  ;;  %v510_v31 = vld [vmem:[%s8392_s26 + $0x648] sm:$0xff]  ;;  %v7156_v34 = vcombine.low %v502_v22, %v506_v23 }
  0x8f   : > { %v473_v49 = vld [vmem:[%s8392_s26 + $0x520] sm:$0xff]  ;;  %v514_v32 = vld [vmem:[%s8392_s26 + $0x668] sm:$0xff] }
  0x90   : > { %v7122_v62 = vcombine.low %v469_v48, %v473_v49  ;;  %v518_v39 = vld [vmem:[%s8392_s26 + $0x688] sm:$0xff]  ;;  %v7164_v42 = vcombine.low %v510_v31, %v514_v32 }
  0x91   : > { %5029 = vmatpush1.bf16.msra.mxu0 %v7058_v55  ;;  %5275 = vmatpush1.bf16.msra.mxu1 %v7060_v56  ;;  %v7123_v55 = vcombine.high %v469_v48, %v473_v49  ;;  %v7125_v56 = vcombine.high %v470_v50, %v474_v51  ;;  %v522_v40 = vld [vmem:[%s8392_s26 + $0x6a8] sm:$0xff] }
  0x92   : > { %5030 = vmatprep.subr.bf16.mxu0 %v7067_v57  ;;  %5276 = vmatprep.subr.bf16.mxu1 %v7069_v58  ;;  %v477_v57 = vld [vmem:[%s8392_s26 + $0x540] sm:$0xff]  ;;  %v526_v48 = vld [vmem:[%s8392_s26 + $0x6c8] sm:$0xff]  ;;  %v7172_v51 = vcombine.low %v518_v39, %v522_v40 }
  0x93   : > { %v481_v58 = vld [vmem:[%s8392_s26 + $0x560] sm:$0xff]  ;;  %v530_v49 = vld [vmem:[%s8392_s26 + $0x6e8] sm:$0xff] }
  0x94   : > { %v7130_v7 = vcombine.low %v477_v57, %v481_v58 }
  0x95   : > { %5031 = vmatpush1.bf16.msra.mxu0 %v7066_v1  ;;  %5277 = vmatpush1.bf16.msra.mxu1 %v7068_v2  ;;  %v7131_v1 = vcombine.high %v477_v57, %v481_v58  ;;  %v7133_v2 = vcombine.high %v478_v59, %v482_v61  ;;  %v534_v57 = vld [vmem:[%s8392_s26 + $0x708] sm:$0xff]  ;;  %v7180_v61 = vcombine.low %v526_v48, %v530_v49 }
  0x96   : > { %5032 = vmatprep.subr.bf16.mxu0 %v7075_v3  ;;  %5278 = vmatprep.subr.bf16.mxu1 %v7077_v4  ;;  %v485_v3 = vld [vmem:[%s8392_s26 + $0x580] sm:$0xff]  ;;  %v538_v58 = vld [vmem:[%s8392_s26 + $0x728] sm:$0xff] }
  0x97   : > { %v489_v4 = vld [vmem:[%s8392_s26 + $0x5a0] sm:$0xff] }
  0x98   : > { %v7138_v16 = vcombine.low %v485_v3, %v489_v4 }
  0x99   : > { %5033 = vmatpush1.bf16.msra.mxu0 %v7074_v9  ;;  %5279 = vmatpush1.bf16.msra.mxu1 %v7076_v11  ;;  %v7139_v9 = vcombine.high %v485_v3, %v489_v4  ;;  %v7141_v11 = vcombine.high %v486_v5, %v490_v6  ;;  %v542_v3 = vld [vmem:[%s8392_s26 + $0x748] sm:$0xff]  ;;  %v7188_v6 = vcombine.low %v534_v57, %v538_v58 }
  0x9a   : > { %5034 = vmatprep.subr.bf16.mxu0 %v7083_v12  ;;  %5280 = vmatprep.subr.bf16.mxu1 %v7085_v13  ;;  %v493_v12 = vld [vmem:[%s8392_s26 + $0x5c0] sm:$0xff]  ;;  %v546_v4 = vld [vmem:[%s8392_s26 + $0x768] sm:$0xff] }
  0x9b   : > { %v497_v13 = vld [vmem:[%s8392_s26 + $0x5e0] sm:$0xff] }
  0x9c   : > { %v7146_v25 = vcombine.low %v493_v12, %v497_v13 }
  0x9d   : > { %5035 = vmatpush1.bf16.msra.mxu0 %v7082_v18  ;;  %5281 = vmatpush1.bf16.msra.mxu1 %v7084_v19  ;;  %v7147_v18 = vcombine.high %v493_v12, %v497_v13  ;;  %v7149_v19 = vcombine.high %v494_v14, %v498_v15  ;;  %v550_v12 = vld [vmem:[%s8392_s26 + $0x788] sm:$0xff]  ;;  %v7196_v15 = vcombine.low %v542_v3, %v546_v4 }
  0x9e   : > { %5045 = vmatprep.subr.bf16.mxu0 %v7091_v20  ;;  %5291 = vmatprep.subr.bf16.mxu1 %v7093_v21  ;;  %v501_v20 = vld [vmem:[%s8392_s26 + $0x600] sm:$0xff]  ;;  %v554_v13 = vld [vmem:[%s8392_s26 + $0x7a8] sm:$0xff] }
  0x9f   : > { %v505_v21 = vld [vmem:[%s8392_s26 + $0x620] sm:$0xff] }
  0xa0   : > { %5037 = vmatmul.mubr.bf16.vlgmr.msra.gmra.mrb[0].mxu0 %v8500_v24  ;;  %5283 = vmatmul.mubr.bf16.vlgmr.msra.gmra.mrb[0].mxu1 %v8500_v24  ;;  %v7154_v0 = vcombine.low %v501_v20, %v505_v21 }
  0xa1   : > { %5046 = vmatpush1.bf16.msra.mxu0 %v7090_v27  ;;  %5292 = vmatpush1.bf16.msra.mxu1 %v7092_v28  ;;  %v7155_v27 = vcombine.high %v501_v20, %v505_v21  ;;  %v7157_v28 = vcombine.high %v502_v22, %v506_v23  ;;  %v1079_v20 = vcombine.high %v8443_v60, %v8443_v60  ;;  %v558_v21 = vld [vmem:[%s8392_s26 + $0x7c8] sm:$0xff] }
  0xa2   : > { %5047 = vmatprep.subr.bf16.mxu0 %v7099_v29  ;;  %5293 = vmatprep.subr.bf16.mxu1 %v7101_v30  ;;  %v509_v29 = vld [vmem:[%s8392_s26 + $0x640] sm:$0xff]  ;;  %v562_v22 = vld [vmem:[%s8392_s26 + $0x7e8] sm:$0xff] }
  0xa3   : > { %5077 = vmatprep.mubr.bf16.mxu0 %v8508_v33  ;;  %5323 = vmatprep.mubr.bf16.mxu1 %v8508_v33  ;;  %v513_v30 = vld [vmem:[%s8392_s26 + $0x660] sm:$0xff]  ;;  %v566_v60 = vld [vmem:[%s8392_s26 + $0x808] sm:$0xff] }
  0xa4   : > { %v7162_v41 = vcombine.low %v509_v29, %v513_v30 }
  0xa5   : > { %5048 = vmatpush1.bf16.msra.mxu0 %v7098_v35  ;;  %5294 = vmatpush1.bf16.msra.mxu1 %v7100_v36  ;;  %v7163_v35 = vcombine.high %v509_v29, %v513_v30  ;;  %v7165_v36 = vcombine.high %v510_v31, %v514_v32  ;;  %v569_v29 = vld [vmem:[%s8392_s26 + $0x820] sm:$0xff]  ;;  %v8573_v30 = vrot.slane %v1079_v20, %v8438_v54  ;;  %v570_v31 = vld [vmem:[%s8392_s26 + $0x828] sm:$0xff] }
  0xa6   : > { %5049 = vmatprep.subr.bf16.mxu0 %v7107_v37  ;;  %5295 = vmatprep.subr.bf16.mxu1 %v7109_v38  ;;  %v517_v37 = vld [vmem:[%s8392_s26 + $0x680] sm:$0xff] }
  0xa7   : > { %v521_v38 = vld [vmem:[%s8392_s26 + $0x6a0] sm:$0xff] }
  0xa8   : > { %v7170_v50 = vcombine.low %v517_v37, %v521_v38  ;;  %v613_v20 = vld [vmem:[%s8392_s26 + $0x980] sm:$0xff] }
  0xa9   : > { %5050 = vmatpush1.bf16.msra.mxu0 %v7106_v43  ;;  %5296 = vmatpush1.bf16.msra.mxu1 %v7108_v44  ;;  %v7171_v43 = vcombine.high %v517_v37, %v521_v38  ;;  %v7173_v44 = vcombine.high %v518_v39, %v522_v40  ;;  %v577_v37 = vld [vmem:[%s8392_s26 + $0x860] sm:$0xff]  ;;  %v1095_v38 = vcombine.high %v8573_v30, %v8573_v30  ;;  %v574_v40 = vld [vmem:[%s8392_s26 + $0x848] sm:$0xff] }
  0xaa   : > { %5051 = vmatprep.subr.bf16.mxu0 %v7115_v46  ;;  %5297 = vmatprep.subr.bf16.mxu1 %v7117_v47  ;;  %v525_v46 = vld [vmem:[%s8392_s26 + $0x6c0] sm:$0xff]  ;;  %v8583_v39 = vcombine.high %v8500_v24, %v8500_v24 }
  0xab   : > { %v529_v47 = vld [vmem:[%s8392_s26 + $0x6e0] sm:$0xff] }
  0xac   : > { %v7178_v59 = vcombine.low %v525_v46, %v529_v47 }
  0xad   : > { %5052 = vmatpush1.bf16.msra.mxu0 %v7114_v52  ;;  %5298 = vmatpush1.bf16.msra.mxu1 %v7116_v53  ;;  %v7179_v52 = vcombine.high %v525_v46, %v529_v47  ;;  %v7181_v53 = vcombine.high %v526_v48, %v530_v49  ;;  %v581_v47 = vld [vmem:[%s8392_s26 + $0x880] sm:$0xff]  ;;  %v8590_v49 = vrot.slane %v1095_v38, %v8438_v54 }
  0xae   : > { %5053 = vmatprep.subr.bf16.mxu0 %v7123_v55  ;;  %5299 = vmatprep.subr.bf16.mxu1 %v7125_v56  ;;  %v533_v55 = vld [vmem:[%s8392_s26 + $0x700] sm:$0xff] }
  0xaf   : > { %v537_v56 = vld [vmem:[%s8392_s26 + $0x720] sm:$0xff] }
  0xb0   : > { %v7186_v5 = vcombine.low %v533_v55, %v537_v56  ;;  %v585_v48 = vld [vmem:[%s8392_s26 + $0x8a0] sm:$0xff] }
  0xb1   : > { %5054 = vmatpush1.bf16.msra.mxu0 %v7122_v62  ;;  %5300 = vmatpush1.bf16.msra.mxu1 %v7124_v63  ;;  %v7187_v62 = vcombine.high %v533_v55, %v537_v56  ;;  %v7189_v63 = vcombine.high %v534_v57, %v538_v58  ;;  %v7235_v55 = vcombine.high %v581_v47, %v585_v48  ;;  %v589_v57 = vld [vmem:[%s8392_s26 + $0x8c0] sm:$0xff] }
  0xb2   : > { %5055 = vmatprep.subr.bf16.mxu0 %v7131_v1  ;;  %5301 = vmatprep.subr.bf16.mxu1 %v7133_v2  ;;  %v541_v1 = vld [vmem:[%s8392_s26 + $0x740] sm:$0xff] }
  0xb3   : > { %v545_v2 = vld [vmem:[%s8392_s26 + $0x760] sm:$0xff] }
  0xb4   : > { %v7194_v14 = vcombine.low %v541_v1, %v545_v2  ;;  %v593_v58 = vld [vmem:[%s8392_s26 + $0x8e0] sm:$0xff] }
  0xb5   : > { %5056 = vmatpush1.bf16.msra.mxu0 %v7130_v7  ;;  %5302 = vmatpush1.bf16.msra.mxu1 %v7132_v8  ;;  %v7195_v7 = vcombine.high %v541_v1, %v545_v2  ;;  %v7197_v8 = vcombine.high %v542_v3, %v546_v4  ;;  %v7243_v1 = vcombine.high %v589_v57, %v593_v58  ;;  %v597_v3 = vld [vmem:[%s8392_s26 + $0x900] sm:$0xff] }
  0xb6   : > { %5057 = vmatprep.subr.bf16.mxu0 %v7139_v9  ;;  %5303 = vmatprep.subr.bf16.mxu1 %v7141_v11  ;;  %v549_v9 = vld [vmem:[%s8392_s26 + $0x780] sm:$0xff] }
  0xb7   : > { %v553_v11 = vld [vmem:[%s8392_s26 + $0x7a0] sm:$0xff] }
  0xb8   : > { %v7202_v23 = vcombine.low %v549_v9, %v553_v11  ;;  %v601_v4 = vld [vmem:[%s8392_s26 + $0x920] sm:$0xff] }
  0xb9   : > { %5058 = vmatpush1.bf16.msra.mxu0 %v7138_v16  ;;  %5304 = vmatpush1.bf16.msra.mxu1 %v7140_v17  ;;  %v7203_v16 = vcombine.high %v549_v9, %v553_v11  ;;  %v7205_v17 = vcombine.high %v550_v12, %v554_v13  ;;  %v7251_v9 = vcombine.high %v597_v3, %v601_v4  ;;  %v633_v38 = vld [vmem:[%s8392_s26 + $0xa20] sm:$0xff] }
  0xba   : > { %5059 = vmatprep.subr.bf16.mxu0 %v7147_v18  ;;  %5305 = vmatprep.subr.bf16.mxu1 %v7149_v19  ;;  %v557_v18 = vld [vmem:[%s8392_s26 + $0x7c0] sm:$0xff] }
  0xbb   : > { %v561_v19 = vld [vmem:[%s8392_s26 + $0x7e0] sm:$0xff] }
  0xbc   : > { %v7210_v32 = vcombine.low %v557_v18, %v561_v19 }
  0xbd   : > { %5060 = vmatpush1.bf16.msra.mxu0 %v7146_v25  ;;  %5306 = vmatpush1.bf16.msra.mxu1 %v7148_v26  ;;  %v7204_v25 = vcombine.low %v550_v12, %v554_v13  ;;  %v7211_v26 = vcombine.high %v557_v18, %v561_v19  ;;  %v605_v12 = vld [vmem:[%s8392_s26 + $0x940] sm:$0xff] }
  0xbe   : > { %5061 = vmatprep.subr.bf16.mxu0 %v7155_v27  ;;  %5307 = vmatprep.subr.bf16.mxu1 %v7157_v28  ;;  %v7213_v27 = vcombine.high %v558_v21, %v562_v22  ;;  %v565_v28 = vld [vmem:[%s8392_s26 + $0x800] sm:$0xff] }
  0xbf   : > { %v609_v13 = vld [vmem:[%s8392_s26 + $0x960] sm:$0xff] }
  0xc0   : > { %v7259_v18 = vcombine.high %v605_v12, %v609_v13 }
  0xc1   : > { %5062 = vmatpush1.bf16.msra.mxu0 %v7154_v0  ;;  %5308 = vmatpush1.bf16.msra.mxu1 %v7156_v34  ;;  %v7212_v0 = vcombine.low %v558_v21, %v562_v22  ;;  %v7219_v34 = vcombine.high %v565_v28, %v569_v29  ;;  %v617_v21 = vld [vmem:[%s8392_s26 + $0x9a0] sm:$0xff]  ;;  %v614_v22 = vld [vmem:[%s8392_s26 + $0x988] sm:$0xff] }
  0xc2   : > { %5063 = vmatprep.subr.bf16.mxu0 %v7163_v35  ;;  %5309 = vmatprep.subr.bf16.mxu1 %v7165_v36  ;;  %v7221_v35 = vcombine.high %v566_v60, %v570_v31  ;;  %v573_v36 = vld [vmem:[%s8392_s26 + $0x840] sm:$0xff] }
  0xc5   : > { %5064 = vmatpush1.bf16.msra.mxu0 %v7162_v41  ;;  %5310 = vmatpush1.bf16.msra.mxu1 %v7164_v42  ;;  %v578_v41 = vld [vmem:[%s8392_s26 + $0x868] sm:$0xff]  ;;  %v7218_v42 = vcombine.low %v565_v28, %v569_v29  ;;  %v621_v29 = vld [vmem:[%s8392_s26 + $0x9c0] sm:$0xff] }
  0xc6   : > { %5065 = vmatprep.subr.bf16.mxu0 %v7171_v43  ;;  %5311 = vmatprep.subr.bf16.mxu1 %v7173_v44  ;;  %v7220_v43 = vcombine.low %v566_v60, %v570_v31  ;;  %v7227_v44 = vcombine.high %v573_v36, %v577_v37  ;;  %v7229_v46 = vcombine.high %v574_v40, %v578_v41  ;;  %v625_v60 = vld [vmem:[%s8392_s26 + $0x9e0] sm:$0xff]  ;;  %v622_v31 = vld [vmem:[%s8392_s26 + $0x9c8] sm:$0xff] }
  0xc9   : > { %5066 = vmatpush1.bf16.msra.mxu0 %v7170_v50  ;;  %5312 = vmatpush1.bf16.msra.mxu1 %v7172_v51  ;;  %v582_v50 = vld [vmem:[%s8392_s26 + $0x888] sm:$0xff] }
  0xca   : > { %5067 = vmatprep.subr.bf16.mxu0 %v7179_v52  ;;  %5313 = vmatprep.subr.bf16.mxu1 %v7181_v53  ;;  %v586_v51 = vld [vmem:[%s8392_s26 + $0x8a8] sm:$0xff]  ;;  %v7226_v52 = vcombine.low %v573_v36, %v577_v37  ;;  %v7228_v53 = vcombine.low %v574_v40, %v578_v41  ;;  %v629_v37 = vld [vmem:[%s8392_s26 + $0xa00] sm:$0xff] }
  0xcb   : > { %v7237_v56 = vcombine.high %v582_v50, %v586_v51  ;;  %v630_v40 = vld [vmem:[%s8392_s26 + $0xa08] sm:$0xff] }
  0xcc   : > { %v634_v41 = vld [vmem:[%s8392_s26 + $0xa28] sm:$0xff] }
  0xcd   : > { %5068 = vmatpush1.bf16.msra.mxu0 %v7178_v59  ;;  %5314 = vmatpush1.bf16.msra.mxu1 %v7180_v61  ;;  %v590_v59 = vld [vmem:[%s8392_s26 + $0x8c8] sm:$0xff] }
  0xce   : > { %5069 = vmatprep.subr.bf16.mxu0 %v7187_v62  ;;  %5315 = vmatprep.subr.bf16.mxu1 %v7189_v63  ;;  %v594_v61 = vld [vmem:[%s8392_s26 + $0x8e8] sm:$0xff]  ;;  %v7234_v62 = vcombine.low %v581_v47, %v585_v48  ;;  %v7236_v63 = vcombine.low %v582_v50, %v586_v51  ;;  %v637_v47 = vld [vmem:[%s8392_s26 + $0xa40] sm:$0xff] }
  0xcf   : > { %v7245_v2 = vcombine.high %v590_v59, %v594_v61  ;;  %v641_v48 = vld [vmem:[%s8392_s26 + $0xa60] sm:$0xff]  ;;  %v638_v50 = vld [vmem:[%s8392_s26 + $0xa48] sm:$0xff] }
  0xd0   : > { %v642_v51 = vld [vmem:[%s8392_s26 + $0xa68] sm:$0xff] }
  0xd1   : > { %5070 = vmatpush1.bf16.msra.mxu0 %v7186_v5  ;;  %5316 = vmatpush1.bf16.msra.mxu1 %v7188_v6  ;;  %v598_v5 = vld [vmem:[%s8392_s26 + $0x908] sm:$0xff] }
  0xd2   : > { %5071 = vmatprep.subr.bf16.mxu0 %v7195_v7  ;;  %5317 = vmatprep.subr.bf16.mxu1 %v7197_v8  ;;  %v602_v6 = vld [vmem:[%s8392_s26 + $0x928] sm:$0xff]  ;;  %v7242_v7 = vcombine.low %v589_v57, %v593_v58  ;;  %v7244_v8 = vcombine.low %v590_v59, %v594_v61  ;;  %v645_v57 = vld [vmem:[%s8392_s26 + $0xa80] sm:$0xff] }
  0xd3   : > { %v7253_v11 = vcombine.high %v598_v5, %v602_v6  ;;  %v649_v58 = vld [vmem:[%s8392_s26 + $0xaa0] sm:$0xff]  ;;  %v646_v59 = vld [vmem:[%s8392_s26 + $0xa88] sm:$0xff] }
  0xd4   : > { %v650_v61 = vld [vmem:[%s8392_s26 + $0xaa8] sm:$0xff] }
  0xd5   : > { %5072 = vmatpush1.bf16.msra.mxu0 %v7194_v14  ;;  %5318 = vmatpush1.bf16.msra.mxu1 %v7196_v15  ;;  %v606_v14 = vld [vmem:[%s8392_s26 + $0x948] sm:$0xff] }
  0xd6   : > { %5073 = vmatprep.subr.bf16.mxu0 %v7203_v16  ;;  %5319 = vmatprep.subr.bf16.mxu1 %v7205_v17  ;;  %v610_v15 = vld [vmem:[%s8392_s26 + $0x968] sm:$0xff]  ;;  %v7250_v16 = vcombine.low %v597_v3, %v601_v4  ;;  %v7252_v17 = vcombine.low %v598_v5, %v602_v6  ;;  %v653_v3 = vld [vmem:[%s8392_s26 + $0xac0] sm:$0xff] }
  0xd7   : > { %v7261_v19 = vcombine.high %v606_v14, %v610_v15  ;;  %v657_v4 = vld [vmem:[%s8392_s26 + $0xae0] sm:$0xff]  ;;  %v654_v5 = vld [vmem:[%s8392_s26 + $0xac8] sm:$0xff] }
  0xd8   : > { %v658_v6 = vld [vmem:[%s8392_s26 + $0xae8] sm:$0xff] }
  0xd9   : > { %5074 = vmatpush1.bf16.msra.mxu0 %v7202_v23  ;;  %5320 = vmatpush1.bf16.msra.mxu1 %v7204_v25  ;;  %v618_v23 = vld [vmem:[%s8392_s26 + $0x9a8] sm:$0xff]  ;;  %v7258_v25 = vcombine.low %v605_v12, %v609_v13  ;;  %v661_v12 = vld [vmem:[%s8392_s26 + $0xb00] sm:$0xff] }
  0xda   : > { %5075 = vmatprep.subr.bf16.mxu0 %v7211_v26  ;;  %5321 = vmatprep.subr.bf16.mxu1 %v7213_v27  ;;  %v7260_v26 = vcombine.low %v606_v14, %v610_v15  ;;  %v7267_v27 = vcombine.high %v613_v20, %v617_v21  ;;  %v7269_v28 = vcombine.high %v614_v22, %v618_v23  ;;  %v665_v13 = vld [vmem:[%s8392_s26 + $0xb20] sm:$0xff]  ;;  %v662_v14 = vld [vmem:[%s8392_s26 + $0xb08] sm:$0xff] }
  0xdb   : > { %v666_v15 = vld [vmem:[%s8392_s26 + $0xb28] sm:$0xff] }
  0xdd   : > { %5076 = vmatpush1.bf16.msra.mxu0 %v7210_v32  ;;  %5322 = vmatpush1.bf16.msra.mxu1 %v7212_v0  ;;  %v626_v32 = vld [vmem:[%s8392_s26 + $0x9e8] sm:$0xff]  ;;  %v7266_v0 = vcombine.low %v613_v20, %v617_v21  ;;  %v669_v20 = vld [vmem:[%s8392_s26 + $0xb40] sm:$0xff] }
  0xde   : > { %5086 = vmatprep.subr.bf16.mxu0 %v7219_v34  ;;  %5332 = vmatprep.subr.bf16.mxu1 %v7221_v35  ;;  %v7268_v34 = vcombine.low %v614_v22, %v618_v23  ;;  %v7275_v35 = vcombine.high %v621_v29, %v625_v60  ;;  %v7277_v36 = vcombine.high %v622_v31, %v626_v32  ;;  %v673_v21 = vld [vmem:[%s8392_s26 + $0xb60] sm:$0xff]  ;;  %v670_v22 = vld [vmem:[%s8392_s26 + $0xb48] sm:$0xff] }
  0xdf   : > { %v674_v23 = vld [vmem:[%s8392_s26 + $0xb68] sm:$0xff] }
  0xe0   : > { %5078 = vmatmul.mubr.bf16.vlgmr.msra.gmra.mrb[0].mxu0 %v8583_v39  ;;  %5324 = vmatmul.mubr.bf16.vlgmr.msra.gmra.mrb[0].mxu1 %v8583_v39 }
  0xe1   : > { %5087 = vmatpush1.bf16.msra.mxu0 %v7218_v42  ;;  %5333 = vmatpush1.bf16.msra.mxu1 %v7220_v43  ;;  %v7274_v42 = vcombine.low %v621_v29, %v625_v60  ;;  %v7276_v43 = vcombine.low %v622_v31, %v626_v32  ;;  %v677_v29 = vld [vmem:[%s8392_s26 + $0xb80] sm:$0xff]  ;;  %v678_v31 = vld [vmem:[%s8392_s26 + $0xb88] sm:$0xff] }
  0xe2   : > { %5088 = vmatprep.subr.bf16.mxu0 %v7227_v44  ;;  %5334 = vmatprep.subr.bf16.mxu1 %v7229_v46  ;;  %v7283_v44 = vcombine.high %v629_v37, %v633_v38  ;;  %v7285_v46 = vcombine.high %v630_v40, %v634_v41  ;;  %v681_v60 = vld [vmem:[%s8392_s26 + $0xba0] sm:$0xff]  ;;  %v682_v32 = vld [vmem:[%s8392_s26 + $0xba8] sm:$0xff] }
  0xe3   : > { %5118 = vmatprep.mubr.bf16.mxu0 %v8590_v49  ;;  %5364 = vmatprep.mubr.bf16.mxu1 %v8590_v49 }
  0xe5   : > { %5089 = vmatpush1.bf16.msra.mxu0 %v7226_v52  ;;  %5335 = vmatpush1.bf16.msra.mxu1 %v7228_v53  ;;  %v7282_v52 = vcombine.low %v629_v37, %v633_v38  ;;  %v7284_v53 = vcombine.low %v630_v40, %v634_v41  ;;  %v685_v37 = vld [vmem:[%s8392_s26 + $0xbc0] sm:$0xff]  ;;  %v686_v40 = vld [vmem:[%s8392_s26 + $0xbc8] sm:$0xff] }
  0xe6   : > { %5090 = vmatprep.subr.bf16.mxu0 %v7235_v55  ;;  %5336 = vmatprep.subr.bf16.mxu1 %v7237_v56  ;;  %v7291_v55 = vcombine.high %v637_v47, %v641_v48  ;;  %v7293_v56 = vcombine.high %v638_v50, %v642_v51  ;;  %v689_v38 = vld [vmem:[%s8392_s26 + $0xbe0] sm:$0xff]  ;;  %v690_v41 = vld [vmem:[%s8392_s26 + $0xbe8] sm:$0xff] }
  0xe9   : > { %5091 = vmatpush1.bf16.msra.mxu0 %v7234_v62  ;;  %5337 = vmatpush1.bf16.msra.mxu1 %v7236_v63  ;;  %v7290_v62 = vcombine.low %v637_v47, %v641_v48  ;;  %v7292_v63 = vcombine.low %v638_v50, %v642_v51  ;;  %v693_v47 = vld [vmem:[%s8392_s26 + $0xc00] sm:$0xff]  ;;  %v694_v50 = vld [vmem:[%s8392_s26 + $0xc08] sm:$0xff] }
  0xea   : > { %5092 = vmatprep.subr.bf16.mxu0 %v7243_v1  ;;  %5338 = vmatprep.subr.bf16.mxu1 %v7245_v2  ;;  %v7299_v1 = vcombine.high %v645_v57, %v649_v58  ;;  %v7301_v2 = vcombine.high %v646_v59, %v650_v61  ;;  %v697_v48 = vld [vmem:[%s8392_s26 + $0xc20] sm:$0xff]  ;;  %v698_v51 = vld [vmem:[%s8392_s26 + $0xc28] sm:$0xff] }
  0xed   : > { %5093 = vmatpush1.bf16.msra.mxu0 %v7242_v7  ;;  %5339 = vmatpush1.bf16.msra.mxu1 %v7244_v8  ;;  %v7298_v7 = vcombine.low %v645_v57, %v649_v58  ;;  %v7300_v8 = vcombine.low %v646_v59, %v650_v61  ;;  %v701_v57 = vld [vmem:[%s8392_s26 + $0xc40] sm:$0xff]  ;;  %v8658_v59 = vrot.slane %v8573_v30, %v8438_v54  ;;  %v702_v61 = vld [vmem:[%s8392_s26 + $0xc48] sm:$0xff] }
  0xee   : > { %5094 = vmatprep.subr.bf16.mxu0 %v7251_v9  ;;  %5340 = vmatprep.subr.bf16.mxu1 %v7253_v11  ;;  %v7307_v9 = vcombine.high %v653_v3, %v657_v4  ;;  %v7309_v11 = vcombine.high %v654_v5, %v658_v6  ;;  %v705_v58 = vld [vmem:[%s8392_s26 + $0xc60] sm:$0xff]  ;;  %v710_v30 = vld [vmem:[%s8392_s26 + $0xc88] sm:$0xff] }
  0xf1   : > { %5095 = vmatpush1.bf16.msra.mxu0 %v7250_v16  ;;  %5341 = vmatpush1.bf16.msra.mxu1 %v7252_v17  ;;  %v7306_v16 = vcombine.low %v653_v3, %v657_v4  ;;  %v7308_v17 = vcombine.low %v654_v5, %v658_v6  ;;  %v709_v4 = vld [vmem:[%s8392_s26 + $0xc80] sm:$0xff]  ;;  %v8666_v6 = vcombine.high %v8590_v49, %v8590_v49 }
  0xf2   : > { %5096 = vmatprep.subr.bf16.mxu0 %v7259_v18  ;;  %5342 = vmatprep.subr.bf16.mxu1 %v7261_v19  ;;  %v7315_v18 = vcombine.high %v661_v12, %v665_v13  ;;  %v7317_v19 = vcombine.high %v662_v14, %v666_v15  ;;  %v713_v5 = vld [vmem:[%s8392_s26 + $0xca0] sm:$0xff] }
  0xf5   : > { %5097 = vmatpush1.bf16.msra.mxu0 %v7258_v25  ;;  %5343 = vmatpush1.bf16.msra.mxu1 %v7260_v26  ;;  %v7314_v25 = vcombine.low %v661_v12, %v665_v13  ;;  %v7316_v26 = vcombine.low %v662_v14, %v666_v15  ;;  %v717_v13 = vld [vmem:[%s8392_s26 + $0xcc0] sm:$0xff]  ;;  %v718_v15 = vld [vmem:[%s8392_s26 + $0xcc8] sm:$0xff] }
  0xf6   : > { %5098 = vmatprep.subr.bf16.mxu0 %v7267_v27  ;;  %5344 = vmatprep.subr.bf16.mxu1 %v7269_v28  ;;  %v7323_v27 = vcombine.high %v669_v20, %v673_v21  ;;  %v7325_v28 = vcombine.high %v670_v22, %v674_v23  ;;  %v721_v14 = vld [vmem:[%s8392_s26 + $0xce0] sm:$0xff] }
  0xf9   : > { %5099 = vmatpush1.bf16.msra.mxu0 %v7266_v0  ;;  %5345 = vmatpush1.bf16.msra.mxu1 %v7268_v34  ;;  %v7322_v0 = vcombine.low %v669_v20, %v673_v21  ;;  %v7324_v34 = vcombine.low %v670_v22, %v674_v23  ;;  %v725_v21 = vld [vmem:[%s8392_s26 + $0xd00] sm:$0xff]  ;;  %v726_v23 = vld [vmem:[%s8392_s26 + $0xd08] sm:$0xff] }
  0xfa   : > { %5100 = vmatprep.subr.bf16.mxu0 %v7275_v35  ;;  %5346 = vmatprep.subr.bf16.mxu1 %v7277_v36  ;;  %v7331_v35 = vcombine.high %v677_v29, %v681_v60  ;;  %v7333_v36 = vcombine.high %v678_v31, %v682_v32  ;;  %v729_v22 = vld [vmem:[%s8392_s26 + $0xd20] sm:$0xff] }
  0xfd   : > { %5101 = vmatpush1.bf16.msra.mxu0 %v7274_v42  ;;  %5347 = vmatpush1.bf16.msra.mxu1 %v7276_v43  ;;  %v7330_v42 = vcombine.low %v677_v29, %v681_v60  ;;  %v7332_v43 = vcombine.low %v678_v31, %v682_v32  ;;  %v733_v60 = vld [vmem:[%s8392_s26 + $0xd40] sm:$0xff]  ;;  %v734_v32 = vld [vmem:[%s8392_s26 + $0xd48] sm:$0xff] }
  0xfe   : > { %5102 = vmatprep.subr.bf16.mxu0 %v7283_v44  ;;  %5348 = vmatprep.subr.bf16.mxu1 %v7285_v46  ;;  %v7339_v44 = vcombine.high %v685_v37, %v689_v38  ;;  %v7341_v46 = vcombine.high %v686_v40, %v690_v41  ;;  %v737_v31 = vld [vmem:[%s8392_s26 + $0xd60] sm:$0xff] }
 0x101   : > { %5103 = vmatpush1.bf16.msra.mxu0 %v7282_v52  ;;  %5349 = vmatpush1.bf16.msra.mxu1 %v7284_v53  ;;  %v7338_v52 = vcombine.low %v685_v37, %v689_v38  ;;  %v7340_v53 = vcombine.low %v686_v40, %v690_v41  ;;  %v741_v38 = vld [vmem:[%s8392_s26 + $0xd80] sm:$0xff]  ;;  %v742_v41 = vld [vmem:[%s8392_s26 + $0xd88] sm:$0xff] }
 0x102   : > { %5104 = vmatprep.subr.bf16.mxu0 %v7291_v55  ;;  %5350 = vmatprep.subr.bf16.mxu1 %v7293_v56  ;;  %v7347_v55 = vcombine.high %v693_v47, %v697_v48  ;;  %v7349_v56 = vcombine.high %v694_v50, %v698_v51  ;;  %v745_v40 = vld [vmem:[%s8392_s26 + $0xda0] sm:$0xff] }
 0x105   : > { %5105 = vmatpush1.bf16.msra.mxu0 %v7290_v62  ;;  %5351 = vmatpush1.bf16.msra.mxu1 %v7292_v63  ;;  %v706_v62 = vld [vmem:[%s8392_s26 + $0xc68] sm:$0xff]  ;;  %v7346_v63 = vcombine.low %v693_v47, %v697_v48  ;;  %v749_v48 = vld [vmem:[%s8392_s26 + $0xdc0] sm:$0xff] }
 0x106   : > { %5106 = vmatprep.subr.bf16.mxu0 %v7299_v1  ;;  %5352 = vmatprep.subr.bf16.mxu1 %v7301_v2  ;;  %v7348_v1 = vcombine.low %v694_v50, %v698_v51  ;;  %v7355_v2 = vcombine.high %v701_v57, %v705_v58  ;;  %v7357_v3 = vcombine.high %v702_v61, %v706_v62  ;;  %v753_v50 = vld [vmem:[%s8392_s26 + $0xde0] sm:$0xff]  ;;  %v750_v51 = vld [vmem:[%s8392_s26 + $0xdc8] sm:$0xff] }
 0x109   : > { %5107 = vmatpush1.bf16.msra.mxu0 %v7298_v7  ;;  %5353 = vmatpush1.bf16.msra.mxu1 %v7300_v8  ;;  %v714_v7 = vld [vmem:[%s8392_s26 + $0xca8] sm:$0xff]  ;;  %v7354_v8 = vcombine.low %v701_v57, %v705_v58  ;;  %v757_v58 = vld [vmem:[%s8392_s26 + $0xe00] sm:$0xff] }
 0x10a   : > { %5108 = vmatprep.subr.bf16.mxu0 %v7307_v9  ;;  %5354 = vmatprep.subr.bf16.mxu1 %v7309_v11  ;;  %v7356_v9 = vcombine.low %v702_v61, %v706_v62  ;;  %v7363_v11 = vcombine.high %v709_v4, %v713_v5  ;;  %v7365_v12 = vcombine.high %v710_v30, %v714_v7  ;;  %v761_v61 = vld [vmem:[%s8392_s26 + $0xe20] sm:$0xff]  ;;  %v758_v62 = vld [vmem:[%s8392_s26 + $0xe08] sm:$0xff] }
 0x10d   : > { %5109 = vmatpush1.bf16.msra.mxu0 %v7306_v16  ;;  %5355 = vmatpush1.bf16.msra.mxu1 %v7308_v17  ;;  %v722_v16 = vld [vmem:[%s8392_s26 + $0xce8] sm:$0xff]  ;;  %v7362_v17 = vcombine.low %v709_v4, %v713_v5  ;;  %v765_v5 = vld [vmem:[%s8392_s26 + $0xe40] sm:$0xff] }
 0x10e   : > { %5110 = vmatprep.subr.bf16.mxu0 %v7315_v18  ;;  %5356 = vmatprep.subr.bf16.mxu1 %v7317_v19  ;;  %v7364_v18 = vcombine.low %v710_v30, %v714_v7  ;;  %v7371_v19 = vcombine.high %v717_v13, %v721_v14  ;;  %v7373_v20 = vcombine.high %v718_v15, %v722_v16  ;;  %v769_v30 = vld [vmem:[%s8392_s26 + $0xe60] sm:$0xff]  ;;  %v766_v7 = vld [vmem:[%s8392_s26 + $0xe48] sm:$0xff] }
 0x111   : > { %5111 = vmatpush1.bf16.msra.mxu0 %v7314_v25  ;;  %5357 = vmatpush1.bf16.msra.mxu1 %v7316_v26  ;;  %v730_v25 = vld [vmem:[%s8392_s26 + $0xd28] sm:$0xff]  ;;  %v7370_v26 = vcombine.low %v717_v13, %v721_v14  ;;  %v773_v14 = vld [vmem:[%s8392_s26 + $0xe80] sm:$0xff] }
 0x112   : > { %5112 = vmatprep.subr.bf16.mxu0 %v7323_v27  ;;  %5358 = vmatprep.subr.bf16.mxu1 %v7325_v28  ;;  %v7372_v27 = vcombine.low %v718_v15, %v722_v16  ;;  %v7379_v28 = vcombine.high %v725_v21, %v729_v22  ;;  %v7381_v29 = vcombine.high %v726_v23, %v730_v25  ;;  %v777_v15 = vld [vmem:[%s8392_s26 + $0xea0] sm:$0xff]  ;;  %v774_v16 = vld [vmem:[%s8392_s26 + $0xe88] sm:$0xff] }
 0x115   : > { %5113 = vmatpush1.bf16.msra.mxu0 %v7322_v0  ;;  %5359 = vmatpush1.bf16.msra.mxu1 %v7324_v34  ;;  %v738_v0 = vld [vmem:[%s8392_s26 + $0xd68] sm:$0xff]  ;;  %v7378_v34 = vcombine.low %v725_v21, %v729_v22  ;;  %v781_v22 = vld [vmem:[%s8392_s26 + $0xec0] sm:$0xff] }
 0x116   : > { %5114 = vmatprep.subr.bf16.mxu0 %v7331_v35  ;;  %5360 = vmatprep.subr.bf16.mxu1 %v7333_v36  ;;  %v7380_v35 = vcombine.low %v726_v23, %v730_v25  ;;  %v7387_v36 = vcombine.high %v733_v60, %v737_v31  ;;  %v7389_v37 = vcombine.high %v734_v32, %v738_v0  ;;  %v785_v23 = vld [vmem:[%s8392_s26 + $0xee0] sm:$0xff]  ;;  %v782_v25 = vld [vmem:[%s8392_s26 + $0xec8] sm:$0xff] }
 0x119   : > { %5115 = vmatpush1.bf16.msra.mxu0 %v7330_v42  ;;  %5361 = vmatpush1.bf16.msra.mxu1 %v7332_v43  ;;  %v746_v42 = vld [vmem:[%s8392_s26 + $0xda8] sm:$0xff]  ;;  %v7386_v43 = vcombine.low %v733_v60, %v737_v31  ;;  %v789_v31 = vld [vmem:[%s8392_s26 + $0xf00] sm:$0xff] }
 0x11a   : > { %5116 = vmatprep.subr.bf16.mxu0 %v7339_v44  ;;  %5362 = vmatprep.subr.bf16.mxu1 %v7341_v46  ;;  %v7388_v44 = vcombine.low %v734_v32, %v738_v0  ;;  %v7395_v46 = vcombine.high %v741_v38, %v745_v40  ;;  %v7397_v47 = vcombine.high %v742_v41, %v746_v42  ;;  %v793_v32 = vld [vmem:[%s8392_s26 + $0xf20] sm:$0xff]  ;;  %v790_v0 = vld [vmem:[%s8392_s26 + $0xf08] sm:$0xff] }
 0x11d   : > { %5117 = vmatpush1.bf16.msra.mxu0 %v7338_v52  ;;  %5363 = vmatpush1.bf16.msra.mxu1 %v7340_v53  ;;  %v754_v52 = vld [vmem:[%s8392_s26 + $0xde8] sm:$0xff]  ;;  %v7394_v53 = vcombine.low %v741_v38, %v745_v40  ;;  %v797_v40 = vld [vmem:[%s8392_s26 + $0xf40] sm:$0xff] }
 0x11e   : > { %5127 = vmatprep.subr.bf16.mxu0 %v7347_v55  ;;  %5373 = vmatprep.subr.bf16.mxu1 %v7349_v56  ;;  %v7396_v55 = vcombine.low %v742_v41, %v746_v42  ;;  %v7403_v56 = vcombine.high %v749_v48, %v753_v50  ;;  %v7405_v57 = vcombine.high %v750_v51, %v754_v52  ;;  %v801_v41 = vld [vmem:[%s8392_s26 + $0xf60] sm:$0xff]  ;;  %v798_v42 = vld [vmem:[%s8392_s26 + $0xf48] sm:$0xff] }
 0x120   : > { %5119 = vmatmul.mubr.bf16.vlgmr.msra.gmra.mrb[0].mxu0 %v8658_v59  ;;  %5365 = vmatmul.mubr.bf16.vlgmr.msra.gmra.mrb[0].mxu1 %v8658_v59 }
 0x121   : > { %5128 = vmatpush1.bf16.msra.mxu0 %v7346_v63  ;;  %5374 = vmatpush1.bf16.msra.mxu1 %v7348_v1  ;;  %v762_v63 = vld [vmem:[%s8392_s26 + $0xe28] sm:$0xff]  ;;  %v7402_v1 = vcombine.low %v749_v48, %v753_v50  ;;  %v805_v50 = vld [vmem:[%s8392_s26 + $0xf80] sm:$0xff] }
 0x122   : > { %5129 = vmatprep.subr.bf16.mxu0 %v7355_v2  ;;  %5375 = vmatprep.subr.bf16.mxu1 %v7357_v3  ;;  %v7404_v2 = vcombine.low %v750_v51, %v754_v52  ;;  %v7411_v3 = vcombine.high %v757_v58, %v761_v61  ;;  %v7413_v4 = vcombine.high %v758_v62, %v762_v63  ;;  %v809_v51 = vld [vmem:[%s8392_s26 + $0xfa0] sm:$0xff]  ;;  %v806_v52 = vld [vmem:[%s8392_s26 + $0xf88] sm:$0xff] }
 0x123   : > { %5159 = vmatprep.mubr.bf16.mxu0 %v8666_v6  ;;  %5405 = vmatprep.mubr.bf16.mxu1 %v8666_v6 }
 0x125   : > { %5130 = vmatpush1.bf16.msra.mxu0 %v7354_v8  ;;  %5376 = vmatpush1.bf16.msra.mxu1 %v7356_v9  ;;  %v770_v8 = vld [vmem:[%s8392_s26 + $0xe68] sm:$0xff]  ;;  %v7410_v9 = vcombine.low %v757_v58, %v761_v61  ;;  %v813_v61 = vld [vmem:[%s8392_s26 + $0xfc0] sm:$0xff] }
 0x126   : > { %5131 = vmatprep.subr.bf16.mxu0 %v7363_v11  ;;  %5377 = vmatprep.subr.bf16.mxu1 %v7365_v12  ;;  %v7412_v11 = vcombine.low %v758_v62, %v762_v63  ;;  %v7419_v12 = vcombine.high %v765_v5, %v769_v30  ;;  %v7421_v13 = vcombine.high %v766_v7, %v770_v8  ;;  %v817_v62 = vld [vmem:[%s8392_s26 + $0xfe0] sm:$0xff]  ;;  %v814_v63 = vld [vmem:[%s8392_s26 + $0xfc8] sm:$0xff] }
 0x129   : > { %5132 = vmatpush1.bf16.msra.mxu0 %v7362_v17  ;;  %5378 = vmatpush1.bf16.msra.mxu1 %v7364_v18  ;;  %v778_v17 = vld [vmem:[%s8392_s26 + $0xea8] sm:$0xff]  ;;  %v7418_v18 = vcombine.low %v765_v5, %v769_v30  ;;  %v821_v30 = vld [vmem:[%s8392_s26 + $0x1000] sm:$0xff] }
 0x12a   : > { %5133 = vmatprep.subr.bf16.mxu0 %v7371_v19  ;;  %5379 = vmatprep.subr.bf16.mxu1 %v7373_v20  ;;  %v7420_v19 = vcombine.low %v766_v7, %v770_v8  ;;  %v7427_v20 = vcombine.high %v773_v14, %v777_v15  ;;  %v7429_v21 = vcombine.high %v774_v16, %v778_v17  ;;  %v825_v7 = vld [vmem:[%s8392_s26 + $0x1020] sm:$0xff]  ;;  %v822_v8 = vld [vmem:[%s8392_s26 + $0x1008] sm:$0xff] }
 0x12d   : > { %5134 = vmatpush1.bf16.msra.mxu0 %v7370_v26  ;;  %5380 = vmatpush1.bf16.msra.mxu1 %v7372_v27  ;;  %v786_v26 = vld [vmem:[%s8392_s26 + $0xee8] sm:$0xff]  ;;  %v7426_v27 = vcombine.low %v773_v14, %v777_v15  ;;  %v7475_v14 = vcombine.high %v821_v30, %v825_v7 }
 0x12e   : > { %5135 = vmatprep.subr.bf16.mxu0 %v7379_v28  ;;  %5381 = vmatprep.subr.bf16.mxu1 %v7381_v29  ;;  %v7428_v28 = vcombine.low %v774_v16, %v778_v17  ;;  %v7435_v29 = vcombine.high %v781_v22, %v785_v23  ;;  %v7437_v60 = vcombine.high %v782_v25, %v786_v26  ;;  %v829_v16 = vld [vmem:[%s8392_s26 + $0x1040] sm:$0xff] }
 0x12f   : > { %v833_v17 = vld [vmem:[%s8392_s26 + $0x1060] sm:$0xff] }
 0x131   : > { %5136 = vmatpush1.bf16.msra.mxu0 %v7378_v34  ;;  %5382 = vmatpush1.bf16.msra.mxu1 %v7380_v35  ;;  %v794_v34 = vld [vmem:[%s8392_s26 + $0xf28] sm:$0xff]  ;;  %v7434_v35 = vcombine.low %v781_v22, %v785_v23  ;;  %v7474_v22 = vcombine.low %v821_v30, %v825_v7 }
 0x132   : > { %5137 = vmatprep.subr.bf16.mxu0 %v7387_v36  ;;  %5383 = vmatprep.subr.bf16.mxu1 %v7389_v37  ;;  %v7436_v36 = vcombine.low %v782_v25, %v786_v26  ;;  %v7443_v37 = vcombine.high %v789_v31, %v793_v32  ;;  %v7445_v38 = vcombine.high %v790_v0, %v794_v34  ;;  %v874_v30 = vld [vmem:[%s8392_s26 + $0x11a8] sm:$0xff] }
 0x133   : > { %v7483_v25 = vcombine.high %v829_v16, %v833_v17 }
 0x135   : > { %5138 = vmatpush1.bf16.msra.mxu0 %v7386_v43  ;;  %5384 = vmatpush1.bf16.msra.mxu1 %v7388_v44  ;;  %v802_v43 = vld [vmem:[%s8392_s26 + $0xf68] sm:$0xff]  ;;  %v7442_v44 = vcombine.low %v789_v31, %v793_v32  ;;  %v7482_v32 = vcombine.low %v829_v16, %v833_v17 }
 0x136   : > { %5139 = vmatprep.subr.bf16.mxu0 %v7395_v46  ;;  %5385 = vmatprep.subr.bf16.mxu1 %v7397_v47  ;;  %v7444_v46 = vcombine.low %v790_v0, %v794_v34  ;;  %v7451_v47 = vcombine.high %v797_v40, %v801_v41  ;;  %v7453_v48 = vcombine.high %v798_v42, %v802_v43  ;;  %v842_v31 = vld [vmem:[%s8392_s26 + $0x10a8] sm:$0xff] }
 0x137   : > { %v882_v16 = vld [vmem:[%s8392_s26 + $0x11e8] sm:$0xff] }
 0x139   : > { %5140 = vmatpush1.bf16.msra.mxu0 %v7394_v53  ;;  %5386 = vmatpush1.bf16.msra.mxu1 %v7396_v55  ;;  %v810_v53 = vld [vmem:[%s8392_s26 + $0xfa8] sm:$0xff]  ;;  %v7450_v55 = vcombine.low %v797_v40, %v801_v41 }
 0x13a   : > { %5141 = vmatprep.subr.bf16.mxu0 %v7403_v56  ;;  %5387 = vmatprep.subr.bf16.mxu1 %v7405_v57  ;;  %v7452_v56 = vcombine.low %v798_v42, %v802_v43  ;;  %v7459_v57 = vcombine.high %v805_v50, %v809_v51  ;;  %v7461_v58 = vcombine.high %v806_v52, %v810_v53  ;;  %v850_v40 = vld [vmem:[%s8392_s26 + $0x10e8] sm:$0xff] }
 0x13d   : > { %5142 = vmatpush1.bf16.msra.mxu0 %v7402_v1  ;;  %5388 = vmatpush1.bf16.msra.mxu1 %v7404_v2  ;;  %v818_v1 = vld [vmem:[%s8392_s26 + $0xfe8] sm:$0xff]  ;;  %v7458_v2 = vcombine.low %v805_v50, %v809_v51 }
 0x13e   : > { %5143 = vmatprep.subr.bf16.mxu0 %v7411_v3  ;;  %5389 = vmatprep.subr.bf16.mxu1 %v7413_v4  ;;  %v7460_v3 = vcombine.low %v806_v52, %v810_v53  ;;  %v7467_v4 = vcombine.high %v813_v61, %v817_v62  ;;  %v7469_v5 = vcombine.high %v814_v63, %v818_v1  ;;  %v858_v50 = vld [vmem:[%s8392_s26 + $0x1128] sm:$0xff] }
 0x141   : > { %5144 = vmatpush1.bf16.msra.mxu0 %v7410_v9  ;;  %5390 = vmatpush1.bf16.msra.mxu1 %v7412_v11  ;;  %v826_v9 = vld [vmem:[%s8392_s26 + $0x1028] sm:$0xff]  ;;  %v8731_v11 = vld.sshfl [vmem:[%s8406_s6 + $0x8] sm:$0x33 pattern:$0x75316420] }
 0x142   : > { %5145 = vmatprep.subr.bf16.mxu0 %v7419_v12  ;;  %5391 = vmatprep.subr.bf16.mxu1 %v7421_v13  ;;  %v7466_v12 = vcombine.low %v813_v61, %v817_v62  ;;  %v7468_v13 = vcombine.low %v814_v63, %v818_v1  ;;  %v7477_v15 = vcombine.high %v822_v8, %v826_v9  ;;  %v866_v61 = vld [vmem:[%s8392_s26 + $0x1168] sm:$0xff] }
 0x143   : > { %v7476_v23 = vcombine.low %v822_v8, %v826_v9 }
 0x145   : > { %5146 = vmatpush1.bf16.msra.mxu0 %v7418_v18  ;;  %5392 = vmatpush1.bf16.msra.mxu1 %v7420_v19  ;;  %v1135_v18 = vcombine.high %v8731_v11, %v8731_v11  ;;  %v8739_v19 = vcombine.high %v8658_v59, %v8658_v59 }
 0x146   : > { %5147 = vmatprep.subr.bf16.mxu0 %v7427_v20  ;;  %5393 = vmatprep.subr.bf16.mxu1 %v7429_v21  ;;  %v830_v20 = vld [vmem:[%s8392_s26 + $0x1048] sm:$0xff] }
 0x147   : > { %v834_v21 = vld [vmem:[%s8392_s26 + $0x1068] sm:$0xff] }
 0x148   : > { %v7485_v26 = vcombine.high %v830_v20, %v834_v21  ;;  %v7484_v0 = vcombine.low %v830_v20, %v834_v21 }
 0x149   : > { %5148 = vmatpush1.bf16.msra.mxu0 %v7426_v27  ;;  %5394 = vmatpush1.bf16.msra.mxu1 %v7428_v28  ;;  %v837_v27 = vld [vmem:[%s8392_s26 + $0x1080] sm:$0xff] }
 0x14a   : > { %5149 = vmatprep.subr.bf16.mxu0 %v7435_v29  ;;  %5395 = vmatprep.subr.bf16.mxu1 %v7437_v60  ;;  %v841_v28 = vld [vmem:[%s8392_s26 + $0x10a0] sm:$0xff]  ;;  %v8746_v29 = vrot.slane %v1135_v18, %v8438_v54  ;;  %v838_v60 = vld [vmem:[%s8392_s26 + $0x1088] sm:$0xff] }
 0x14b   : > { %v7491_v34 = vcombine.high %v837_v27, %v841_v28  ;;  %v7490_v41 = vcombine.low %v837_v27, %v841_v28  ;;  %v7492_v42 = vcombine.low %v838_v60, %v842_v31 }
 0x14d   : > { %5150 = vmatpush1.bf16.msra.mxu0 %v7434_v35  ;;  %5396 = vmatpush1.bf16.msra.mxu1 %v7436_v36  ;;  %v7493_v35 = vcombine.high %v838_v60, %v842_v31  ;;  %v845_v36 = vld [vmem:[%s8392_s26 + $0x10c0] sm:$0xff] }
 0x14e   : > { %5151 = vmatprep.subr.bf16.mxu0 %v7443_v37  ;;  %5397 = vmatprep.subr.bf16.mxu1 %v7445_v38  ;;  %v849_v37 = vld [vmem:[%s8392_s26 + $0x10e0] sm:$0xff]  ;;  %v846_v38 = vld [vmem:[%s8392_s26 + $0x10c8] sm:$0xff] }
 0x14f   : > { %v7499_v43 = vcombine.high %v845_v36, %v849_v37  ;;  %v7498_v51 = vcombine.low %v845_v36, %v849_v37  ;;  %v7500_v52 = vcombine.low %v846_v38, %v850_v40 }
 0x151   : > { %5152 = vmatpush1.bf16.msra.mxu0 %v7442_v44  ;;  %5398 = vmatpush1.bf16.msra.mxu1 %v7444_v46  ;;  %v7501_v44 = vcombine.high %v846_v38, %v850_v40  ;;  %v853_v46 = vld [vmem:[%s8392_s26 + $0x1100] sm:$0xff] }
 0x152   : > { %5153 = vmatprep.subr.bf16.mxu0 %v7451_v47  ;;  %5399 = vmatprep.subr.bf16.mxu1 %v7453_v48  ;;  %v857_v47 = vld [vmem:[%s8392_s26 + $0x1120] sm:$0xff]  ;;  %v854_v48 = vld [vmem:[%s8392_s26 + $0x1108] sm:$0xff] }
 0x153   : > { %v7507_v53 = vcombine.high %v853_v46, %v857_v47  ;;  %v7506_v62 = vcombine.low %v853_v46, %v857_v47  ;;  %v7508_v63 = vcombine.low %v854_v48, %v858_v50 }
 0x155   : > { %5154 = vmatpush1.bf16.msra.mxu0 %v7450_v55  ;;  %5400 = vmatpush1.bf16.msra.mxu1 %v7452_v56  ;;  %v7509_v55 = vcombine.high %v854_v48, %v858_v50  ;;  %v861_v56 = vld [vmem:[%s8392_s26 + $0x1140] sm:$0xff] }
 0x156   : > { %5155 = vmatprep.subr.bf16.mxu0 %v7459_v57  ;;  %5401 = vmatprep.subr.bf16.mxu1 %v7461_v58  ;;  %v865_v57 = vld [vmem:[%s8392_s26 + $0x1160] sm:$0xff]  ;;  %v862_v58 = vld [vmem:[%s8392_s26 + $0x1148] sm:$0xff] }
 0x157   : > { %v7515_v1 = vcombine.high %v861_v56, %v865_v57  ;;  %v7514_v7 = vcombine.low %v861_v56, %v865_v57  ;;  %v7516_v8 = vcombine.low %v862_v58, %v866_v61 }
 0x159   : > { %5156 = vmatpush1.bf16.msra.mxu0 %v7458_v2  ;;  %5402 = vmatpush1.bf16.msra.mxu1 %v7460_v3  ;;  %v7517_v2 = vcombine.high %v862_v58, %v866_v61  ;;  %v869_v3 = vld [vmem:[%s8392_s26 + $0x1180] sm:$0xff] }
 0x15a   : > { %5157 = vmatprep.subr.bf16.mxu0 %v7467_v4  ;;  %5403 = vmatprep.subr.bf16.mxu1 %v7469_v5  ;;  %v873_v4 = vld [vmem:[%s8392_s26 + $0x11a0] sm:$0xff]  ;;  %v870_v5 = vld [vmem:[%s8392_s26 + $0x1188] sm:$0xff] }
 0x15b   : > { %v7523_v9 = vcombine.high %v869_v3, %v873_v4  ;;  %v7522_v17 = vcombine.low %v869_v3, %v873_v4  ;;  %v7524_v18 = vcombine.low %v870_v5, %v874_v30 }
 0x15d   : > { %5158 = vmatpush1.bf16.msra.mxu0 %v7466_v12  ;;  %5404 = vmatpush1.bf16.msra.mxu1 %v7468_v13  ;;  %v7525_v12 = vcombine.high %v870_v5, %v874_v30  ;;  %v877_v13 = vld [vmem:[%s8392_s26 + $0x11c0] sm:$0xff] }
 0x15e   : > { %5168 = vmatprep.subr.bf16.mxu0 %v7475_v14  ;;  %5414 = vmatprep.subr.bf16.mxu1 %v7477_v15  ;;  %v881_v14 = vld [vmem:[%s8392_s26 + $0x11e0] sm:$0xff]  ;;  %v878_v15 = vld [vmem:[%s8392_s26 + $0x11c8] sm:$0xff] }
 0x15f   : > { %v7531_v20 = vcombine.high %v877_v13, %v881_v14  ;;  %v7533_v21 = vcombine.high %v878_v15, %v882_v16  ;;  %v7530_v27 = vcombine.low %v877_v13, %v881_v14  ;;  %v7532_v28 = vcombine.low %v878_v15, %v882_v16 }
 0x160   : > { %5160 = vmatmul.mubr.bf16.vlgmr.msra.gmra.mrb[0].mxu0 %v8739_v19  ;;  %5406 = vmatmul.mubr.bf16.vlgmr.msra.gmra.mrb[0].mxu1 %v8739_v19 }
 0x161   : > { %5169 = vmatpush1.bf16.msra.mxu0 %v7474_v22  ;;  %5415 = vmatpush1.bf16.msra.mxu1 %v7476_v23  ;;  %v885_v22 = vld [vmem:[%s8392_s26 + $0x1200] sm:$0xff] }
 0x162   : > { %5170 = vmatprep.subr.bf16.mxu0 %v7483_v25  ;;  %5416 = vmatprep.subr.bf16.mxu1 %v7485_v26  ;;  %v889_v23 = vld [vmem:[%s8392_s26 + $0x1220] sm:$0xff]  ;;  %v886_v25 = vld [vmem:[%s8392_s26 + $0x1208] sm:$0xff] }
 0x163   : > { %5200 = vmatprep.mubr.bf16.mxu0 %v8746_v29  ;;  %5446 = vmatprep.mubr.bf16.mxu1 %v8746_v29  ;;  %v890_v26 = vld [vmem:[%s8392_s26 + $0x1228] sm:$0xff]  ;;  %v7539_v60 = vcombine.high %v885_v22, %v889_v23  ;;  %v7538_v36 = vcombine.low %v885_v22, %v889_v23 }
 0x164   : > { %v7541_v31 = vcombine.high %v886_v25, %v890_v26  ;;  %v7540_v37 = vcombine.low %v886_v25, %v890_v26 }
 0x165   : > { %5171 = vmatpush1.bf16.msra.mxu0 %v7482_v32  ;;  %5417 = vmatpush1.bf16.msra.mxu1 %v7484_v0  ;;  %v893_v32 = vld [vmem:[%s8392_s26 + $0x1240] sm:$0xff] }
 0x166   : > { %5172 = vmatprep.subr.bf16.mxu0 %v7491_v34  ;;  %5418 = vmatprep.subr.bf16.mxu1 %v7493_v35  ;;  %v897_v0 = vld [vmem:[%s8392_s26 + $0x1260] sm:$0xff]  ;;  %v894_v34 = vld [vmem:[%s8392_s26 + $0x1248] sm:$0xff] }
 0x167   : > { %v898_v35 = vld [vmem:[%s8392_s26 + $0x1268] sm:$0xff]  ;;  %v7547_v38 = vcombine.high %v893_v32, %v897_v0  ;;  %v7546_v46 = vcombine.low %v893_v32, %v897_v0 }
 0x168   : > { %v7549_v40 = vcombine.high %v894_v34, %v898_v35  ;;  %v7548_v47 = vcombine.low %v894_v34, %v898_v35 }
 0x169   : > { %5173 = vmatpush1.bf16.msra.mxu0 %v7490_v41  ;;  %5419 = vmatpush1.bf16.msra.mxu1 %v7492_v42  ;;  %v901_v41 = vld [vmem:[%s8392_s26 + $0x1280] sm:$0xff] }
 0x16a   : > { %5174 = vmatprep.subr.bf16.mxu0 %v7499_v43  ;;  %5420 = vmatprep.subr.bf16.mxu1 %v7501_v44  ;;  %v905_v42 = vld [vmem:[%s8392_s26 + $0x12a0] sm:$0xff]  ;;  %v902_v43 = vld [vmem:[%s8392_s26 + $0x1288] sm:$0xff] }
 0x16b   : > { %v906_v44 = vld [vmem:[%s8392_s26 + $0x12a8] sm:$0xff]  ;;  %v7555_v48 = vcombine.high %v901_v41, %v905_v42  ;;  %v7554_v56 = vcombine.low %v901_v41, %v905_v42 }
 0x16c   : > { %v7557_v50 = vcombine.high %v902_v43, %v906_v44  ;;  %v7556_v57 = vcombine.low %v902_v43, %v906_v44 }
 0x16d   : > { %5175 = vmatpush1.bf16.msra.mxu0 %v7498_v51  ;;  %5421 = vmatpush1.bf16.msra.mxu1 %v7500_v52  ;;  %v909_v51 = vld [vmem:[%s8392_s26 + $0x12c0] sm:$0xff] }
 0x16e   : > { %5176 = vmatprep.subr.bf16.mxu0 %v7507_v53  ;;  %5422 = vmatprep.subr.bf16.mxu1 %v7509_v55  ;;  %v913_v52 = vld [vmem:[%s8392_s26 + $0x12e0] sm:$0xff]  ;;  %v910_v53 = vld [vmem:[%s8392_s26 + $0x12c8] sm:$0xff] }
 0x16f   : > { %v914_v55 = vld [vmem:[%s8392_s26 + $0x12e8] sm:$0xff]  ;;  %v7563_v58 = vcombine.high %v909_v51, %v913_v52  ;;  %v7562_v3 = vcombine.low %v909_v51, %v913_v52 }
 0x170   : > { %v7565_v61 = vcombine.high %v910_v53, %v914_v55  ;;  %v7564_v4 = vcombine.low %v910_v53, %v914_v55  ;;  %v962_v51 = vld [vmem:[%s8392_s26 + $0x1468] sm:$0xff] }
 0x171   : > { %5177 = vmatpush1.bf16.msra.mxu0 %v7506_v62  ;;  %5423 = vmatpush1.bf16.msra.mxu1 %v7508_v63  ;;  %v917_v62 = vld [vmem:[%s8392_s26 + $0x1300] sm:$0xff] }
 0x172   : > { %5178 = vmatprep.subr.bf16.mxu0 %v7515_v1  ;;  %5424 = vmatprep.subr.bf16.mxu1 %v7517_v2  ;;  %v921_v63 = vld [vmem:[%s8392_s26 + $0x1320] sm:$0xff]  ;;  %v918_v1 = vld [vmem:[%s8392_s26 + $0x1308] sm:$0xff] }
 0x173   : > { %v922_v2 = vld [vmem:[%s8392_s26 + $0x1328] sm:$0xff]  ;;  %v7571_v5 = vcombine.high %v917_v62, %v921_v63  ;;  %v7570_v13 = vcombine.low %v917_v62, %v921_v63 }
 0x174   : > { %v7573_v30 = vcombine.high %v918_v1, %v922_v2  ;;  %v7572_v14 = vcombine.low %v918_v1, %v922_v2 }
 0x175   : > { %5179 = vmatpush1.bf16.msra.mxu0 %v7514_v7  ;;  %5425 = vmatpush1.bf16.msra.mxu1 %v7516_v8  ;;  %v925_v7 = vld [vmem:[%s8392_s26 + $0x1340] sm:$0xff] }
 0x176   : > { %5180 = vmatprep.subr.bf16.mxu0 %v7523_v9  ;;  %5426 = vmatprep.subr.bf16.mxu1 %v7525_v12  ;;  %v929_v8 = vld [vmem:[%s8392_s26 + $0x1360] sm:$0xff]  ;;  %v926_v9 = vld [vmem:[%s8392_s26 + $0x1348] sm:$0xff] }
 0x177   : > { %v930_v12 = vld [vmem:[%s8392_s26 + $0x1368] sm:$0xff]  ;;  %v7579_v15 = vcombine.high %v925_v7, %v929_v8  ;;  %v7578_v22 = vcombine.low %v925_v7, %v929_v8 }
 0x178   : > { %v7581_v16 = vcombine.high %v926_v9, %v930_v12  ;;  %v7580_v23 = vcombine.low %v926_v9, %v930_v12 }
 0x179   : > { %5181 = vmatpush1.bf16.msra.mxu0 %v7522_v17  ;;  %5427 = vmatpush1.bf16.msra.mxu1 %v7524_v18  ;;  %v933_v17 = vld [vmem:[%s8392_s26 + $0x1380] sm:$0xff] }
 0x17a   : > { %5182 = vmatprep.subr.bf16.mxu0 %v7531_v20  ;;  %5428 = vmatprep.subr.bf16.mxu1 %v7533_v21  ;;  %v937_v18 = vld [vmem:[%s8392_s26 + $0x13a0] sm:$0xff]  ;;  %v934_v20 = vld [vmem:[%s8392_s26 + $0x1388] sm:$0xff] }
 0x17b   : > { %v938_v21 = vld [vmem:[%s8392_s26 + $0x13a8] sm:$0xff]  ;;  %v7587_v25 = vcombine.high %v933_v17, %v937_v18  ;;  %v7586_v32 = vcombine.low %v933_v17, %v937_v18 }
 0x17c   : > { %v7589_v26 = vcombine.high %v934_v20, %v938_v21  ;;  %v7588_v0 = vcombine.low %v934_v20, %v938_v21 }
 0x17d   : > { %5183 = vmatpush1.bf16.msra.mxu0 %v7530_v27  ;;  %5429 = vmatpush1.bf16.msra.mxu1 %v7532_v28  ;;  %v941_v27 = vld [vmem:[%s8392_s26 + $0x13c0] sm:$0xff] }
 0x17e   : > { %5184 = vmatprep.subr.bf16.mxu0 %v7539_v60  ;;  %5430 = vmatprep.subr.bf16.mxu1 %v7541_v31  ;;  %v945_v28 = vld [vmem:[%s8392_s26 + $0x13e0] sm:$0xff]  ;;  %v942_v60 = vld [vmem:[%s8392_s26 + $0x13c8] sm:$0xff] }
 0x17f   : > { %v946_v31 = vld [vmem:[%s8392_s26 + $0x13e8] sm:$0xff]  ;;  %v7595_v34 = vcombine.high %v941_v27, %v945_v28  ;;  %v7594_v41 = vcombine.low %v941_v27, %v945_v28 }
 0x180   : > { %v7597_v35 = vcombine.high %v942_v60, %v946_v31  ;;  %v7596_v42 = vcombine.low %v942_v60, %v946_v31 }
 0x181   : > { %5185 = vmatpush1.bf16.msra.mxu0 %v7538_v36  ;;  %5431 = vmatpush1.bf16.msra.mxu1 %v7540_v37  ;;  %v949_v36 = vld [vmem:[%s8392_s26 + $0x1400] sm:$0xff] }
 0x182   : > { %5186 = vmatprep.subr.bf16.mxu0 %v7547_v38  ;;  %5432 = vmatprep.subr.bf16.mxu1 %v7549_v40  ;;  %v953_v37 = vld [vmem:[%s8392_s26 + $0x1420] sm:$0xff]  ;;  %v950_v38 = vld [vmem:[%s8392_s26 + $0x1408] sm:$0xff] }
 0x183   : > { %v954_v40 = vld [vmem:[%s8392_s26 + $0x1428] sm:$0xff]  ;;  %v7603_v43 = vcombine.high %v949_v36, %v953_v37  ;;  %v7602_v52 = vcombine.low %v949_v36, %v953_v37 }
 0x184   : > { %v7605_v44 = vcombine.high %v950_v38, %v954_v40  ;;  %v7604_v53 = vcombine.low %v950_v38, %v954_v40 }
 0x185   : > { %5187 = vmatpush1.bf16.msra.mxu0 %v7546_v46  ;;  %5433 = vmatpush1.bf16.msra.mxu1 %v7548_v47  ;;  %v957_v46 = vld [vmem:[%s8392_s26 + $0x1440] sm:$0xff] }
 0x186   : > { %5188 = vmatprep.subr.bf16.mxu0 %v7555_v48  ;;  %5434 = vmatprep.subr.bf16.mxu1 %v7557_v50  ;;  %v961_v47 = vld [vmem:[%s8392_s26 + $0x1460] sm:$0xff]  ;;  %v8814_v48 = vrot.slane %v8731_v11, %v8438_v54  ;;  %v958_v50 = vld [vmem:[%s8392_s26 + $0x1448] sm:$0xff] }
 0x187   : > { %v7611_v55 = vcombine.high %v957_v46, %v961_v47  ;;  %v966_v54 = vld [vmem:[%s8392_s26 + $0x1488] sm:$0xff]  ;;  %v7610_v62 = vcombine.low %v957_v46, %v961_v47  ;;  %v7612_v63 = vcombine.low %v958_v50, %v962_v51 }
 0x188   : > { %v970_v11 = vld [vmem:[%s8392_s26 + $0x14a8] sm:$0xff] }
 0x189   : > { %5189 = vmatpush1.bf16.msra.mxu0 %v7554_v56  ;;  %5435 = vmatpush1.bf16.msra.mxu1 %v7556_v57  ;;  %v7613_v56 = vcombine.high %v958_v50, %v962_v51  ;;  %v965_v57 = vld [vmem:[%s8392_s26 + $0x1480] sm:$0xff]  ;;  %v7621_v2 = vcombine.high %v966_v54, %v970_v11  ;;  %v7620_v8 = vcombine.low %v966_v54, %v970_v11 }
 0x18a   : > { %5190 = vmatprep.subr.bf16.mxu0 %v7563_v58  ;;  %5436 = vmatprep.subr.bf16.mxu1 %v7565_v61  ;;  %v969_v58 = vld [vmem:[%s8392_s26 + $0x14a0] sm:$0xff]  ;;  %v8822_v61 = vcombine.high %v8746_v29, %v8746_v29 }
 0x18b   : > { %v7619_v1 = vcombine.high %v965_v57, %v969_v58  ;;  %v7618_v7 = vcombine.low %v965_v57, %v969_v58 }
 0x18d   : > { %5191 = vmatpush1.bf16.msra.mxu0 %v7562_v3  ;;  %5437 = vmatpush1.bf16.msra.mxu1 %v7564_v4  ;;  %v973_v3 = vld [vmem:[%s8392_s26 + $0x14c0] sm:$0xff] }
 0x18e   : > { %5192 = vmatprep.subr.bf16.mxu0 %v7571_v5  ;;  %5438 = vmatprep.subr.bf16.mxu1 %v7573_v30  ;;  %v977_v4 = vld [vmem:[%s8392_s26 + $0x14e0] sm:$0xff]  ;;  %v974_v5 = vld [vmem:[%s8392_s26 + $0x14c8] sm:$0xff] }
 0x18f   : > { %v978_v30 = vld [vmem:[%s8392_s26 + $0x14e8] sm:$0xff]  ;;  %v7627_v9 = vcombine.high %v973_v3, %v977_v4  ;;  %v7626_v17 = vcombine.low %v973_v3, %v977_v4 }
 0x190   : > { %v7629_v12 = vcombine.high %v974_v5, %v978_v30  ;;  %v7628_v18 = vcombine.low %v974_v5, %v978_v30 }
 0x191   : > { %5193 = vmatpush1.bf16.msra.mxu0 %v7570_v13  ;;  %5439 = vmatpush1.bf16.msra.mxu1 %v7572_v14  ;;  %v981_v13 = vld [vmem:[%s8392_s26 + $0x1500] sm:$0xff] }
 0x192   : > { %5194 = vmatprep.subr.bf16.mxu0 %v7579_v15  ;;  %5440 = vmatprep.subr.bf16.mxu1 %v7581_v16  ;;  %v985_v14 = vld [vmem:[%s8392_s26 + $0x1520] sm:$0xff]  ;;  %v982_v15 = vld [vmem:[%s8392_s26 + $0x1508] sm:$0xff] }
 0x193   : > { %v986_v16 = vld [vmem:[%s8392_s26 + $0x1528] sm:$0xff]  ;;  %v7635_v20 = vcombine.high %v981_v13, %v985_v14  ;;  %v7634_v27 = vcombine.low %v981_v13, %v985_v14 }
 0x194   : > { %v7637_v21 = vcombine.high %v982_v15, %v986_v16  ;;  %v7636_v28 = vcombine.low %v982_v15, %v986_v16 }
 0x195   : > { %5195 = vmatpush1.bf16.msra.mxu0 %v7578_v22  ;;  %5441 = vmatpush1.bf16.msra.mxu1 %v7580_v23  ;;  %v989_v22 = vld [vmem:[%s8392_s26 + $0x1540] sm:$0xff] }
 0x196   : > { %5196 = vmatprep.subr.bf16.mxu0 %v7587_v25  ;;  %5442 = vmatprep.subr.bf16.mxu1 %v7589_v26  ;;  %v993_v23 = vld [vmem:[%s8392_s26 + $0x1560] sm:$0xff]  ;;  %v990_v25 = vld [vmem:[%s8392_s26 + $0x1548] sm:$0xff] }
 0x197   : > { %v994_v26 = vld [vmem:[%s8392_s26 + $0x1568] sm:$0xff]  ;;  %v7643_v60 = vcombine.high %v989_v22, %v993_v23  ;;  %v7642_v36 = vcombine.low %v989_v22, %v993_v23 }
 0x198   : > { %v7645_v31 = vcombine.high %v990_v25, %v994_v26  ;;  %v7644_v37 = vcombine.low %v990_v25, %v994_v26 }
 0x199   : > { %5197 = vmatpush1.bf16.msra.mxu0 %v7586_v32  ;;  %5443 = vmatpush1.bf16.msra.mxu1 %v7588_v0  ;;  %v997_v32 = vld [vmem:[%s8392_s26 + $0x1580] sm:$0xff] }
 0x19a   : > { %5198 = vmatprep.subr.bf16.mxu0 %v7595_v34  ;;  %5444 = vmatprep.subr.bf16.mxu1 %v7597_v35  ;;  %v1001_v0 = vld [vmem:[%s8392_s26 + $0x15a0] sm:$0xff]  ;;  %v998_v34 = vld [vmem:[%s8392_s26 + $0x1588] sm:$0xff] }
 0x19b   : > { %v1002_v35 = vld [vmem:[%s8392_s26 + $0x15a8] sm:$0xff]  ;;  %v7651_v38 = vcombine.high %v997_v32, %v1001_v0  ;;  %v7650_v46 = vcombine.low %v997_v32, %v1001_v0 }
 0x19c   : > { %v7653_v40 = vcombine.high %v998_v34, %v1002_v35  ;;  %v7652_v47 = vcombine.low %v998_v34, %v1002_v35 }
 0x19d   : > { %5199 = vmatpush1.bf16.msra.mxu0 %v7594_v41  ;;  %5445 = vmatpush1.bf16.msra.mxu1 %v7596_v42  ;;  %v1005_v41 = vld [vmem:[%s8392_s26 + $0x15c0] sm:$0xff] }
 0x19e   : > { %5209 = vmatprep.subr.bf16.mxu0 %v7603_v43  ;;  %5455 = vmatprep.subr.bf16.mxu1 %v7605_v44  ;;  %v1009_v42 = vld [vmem:[%s8392_s26 + $0x15e0] sm:$0xff]  ;;  %v1006_v43 = vld [vmem:[%s8392_s26 + $0x15c8] sm:$0xff] }
 0x19f   : > { %v1010_v44 = vld [vmem:[%s8392_s26 + $0x15e8] sm:$0xff]  ;;  %v7659_v50 = vcombine.high %v1005_v41, %v1009_v42  ;;  %v7658_v57 = vcombine.low %v1005_v41, %v1009_v42 }
 0x1a0   : > { %5201 = vmatmul.mubr.bf16.vlgmr.msra.gmra.mrb[0].mxu0 %v8814_v48  ;;  %5447 = vmatmul.mubr.bf16.vlgmr.msra.gmra.mrb[0].mxu1 %v8814_v48  ;;  %v7661_v51 = vcombine.high %v1006_v43, %v1010_v44  ;;  %v7660_v58 = vcombine.low %v1006_v43, %v1010_v44 }
 0x1a1   : > { %5210 = vmatpush1.bf16.msra.mxu0 %v7602_v52  ;;  %5456 = vmatpush1.bf16.msra.mxu1 %v7604_v53  ;;  %v1013_v52 = vld [vmem:[%s8392_s26 + $0x1600] sm:$0xff] }
 0x1a2   : > { %5211 = vmatprep.subr.bf16.mxu0 %v7611_v55  ;;  %5457 = vmatprep.subr.bf16.mxu1 %v7613_v56  ;;  %v1017_v53 = vld [vmem:[%s8392_s26 + $0x1620] sm:$0xff]  ;;  %v1014_v55 = vld [vmem:[%s8392_s26 + $0x1608] sm:$0xff] }
 0x1a3   : > { %5241 = vmatprep.mubr.bf16.mxu0 %v8822_v61  ;;  %5487 = vmatprep.mubr.bf16.mxu1 %v8822_v61  ;;  %v1018_v56 = vld [vmem:[%s8392_s26 + $0x1628] sm:$0xff]  ;;  %v7667_v54 = vcombine.high %v1013_v52, %v1017_v53  ;;  %v7666_v3 = vcombine.low %v1013_v52, %v1017_v53 }
 0x1a4   : > { %v7669_v11 = vcombine.high %v1014_v55, %v1018_v56  ;;  %v7668_v4 = vcombine.low %v1014_v55, %v1018_v56 }
 0x1a5   : > { %5212 = vmatpush1.bf16.msra.mxu0 %v7610_v62  ;;  %5458 = vmatpush1.bf16.msra.mxu1 %v7612_v63  ;;  %v1021_v62 = vld [vmem:[%s8392_s26 + $0x1640] sm:$0xff] }
 0x1a6   : > { %5213 = vmatprep.subr.bf16.mxu0 %v7619_v1  ;;  %5459 = vmatprep.subr.bf16.mxu1 %v7621_v2  ;;  %v1025_v63 = vld [vmem:[%s8392_s26 + $0x1660] sm:$0xff]  ;;  %v1022_v1 = vld [vmem:[%s8392_s26 + $0x1648] sm:$0xff] }
 0x1a7   : > { %v1026_v2 = vld [vmem:[%s8392_s26 + $0x1668] sm:$0xff]  ;;  %v7675_v5 = vcombine.high %v1021_v62, %v1025_v63  ;;  %v7674_v13 = vcombine.low %v1021_v62, %v1025_v63 }
 0x1a8   : > { %v7677_v30 = vcombine.high %v1022_v1, %v1026_v2  ;;  %v7676_v14 = vcombine.low %v1022_v1, %v1026_v2 }
 0x1a9   : > { %5214 = vmatpush1.bf16.msra.mxu0 %v7618_v7  ;;  %5460 = vmatpush1.bf16.msra.mxu1 %v7620_v8  ;;  %v1029_v7 = vld [vmem:[%s8392_s26 + $0x1680] sm:$0xff] }
 0x1aa   : > { %5215 = vmatprep.subr.bf16.mxu0 %v7627_v9  ;;  %5461 = vmatprep.subr.bf16.mxu1 %v7629_v12  ;;  %v1033_v8 = vld [vmem:[%s8392_s26 + $0x16a0] sm:$0xff]  ;;  %v1030_v9 = vld [vmem:[%s8392_s26 + $0x1688] sm:$0xff] }
 0x1ab   : > { %v1034_v12 = vld [vmem:[%s8392_s26 + $0x16a8] sm:$0xff]  ;;  %v7683_v15 = vcombine.high %v1029_v7, %v1033_v8  ;;  %v7682_v22 = vcombine.low %v1029_v7, %v1033_v8 }
 0x1ac   : > { %v7685_v16 = vcombine.high %v1030_v9, %v1034_v12  ;;  %v7684_v23 = vcombine.low %v1030_v9, %v1034_v12 }
 0x1ad   : > { %5216 = vmatpush1.bf16.msra.mxu0 %v7626_v17  ;;  %5462 = vmatpush1.bf16.msra.mxu1 %v7628_v18  ;;  %v1037_v17 = vld [vmem:[%s8392_s26 + $0x16c0] sm:$0xff] }
 0x1ae   : > { %5217 = vmatprep.subr.bf16.mxu0 %v7635_v20  ;;  %5463 = vmatprep.subr.bf16.mxu1 %v7637_v21  ;;  %v1041_v18 = vld [vmem:[%s8392_s26 + $0x16e0] sm:$0xff]  ;;  %v1038_v20 = vld [vmem:[%s8392_s26 + $0x16c8] sm:$0xff] }
 0x1af   : > { %v1042_v21 = vld [vmem:[%s8392_s26 + $0x16e8] sm:$0xff]  ;;  %v7691_v25 = vcombine.high %v1037_v17, %v1041_v18  ;;  %v7690_v32 = vcombine.low %v1037_v17, %v1041_v18  ;;  %v324_v17 = vld [vmem:[%s8392_s26 + $0x78] sm:$0xff] }
 0x1b0   : > { %v7693_v26 = vcombine.high %v1038_v20, %v1042_v21  ;;  %v7692_v0 = vcombine.low %v1038_v20, %v1042_v21 }
 0x1b1   : > { %5218 = vmatpush1.bf16.msra.mxu0 %v7634_v27  ;;  %5464 = vmatpush1.bf16.msra.mxu1 %v7636_v28  ;;  %v1045_v27 = vld [vmem:[%s8392_s26 + $0x1700] sm:$0xff] }
 0x1b2   : > { %5219 = vmatprep.subr.bf16.mxu0 %v7643_v60  ;;  %5465 = vmatprep.subr.bf16.mxu1 %v7645_v31  ;;  %v1049_v28 = vld [vmem:[%s8392_s26 + $0x1720] sm:$0xff]  ;;  %v1046_v60 = vld [vmem:[%s8392_s26 + $0x1708] sm:$0xff] }
 0x1b3   : > { %v1050_v31 = vld [vmem:[%s8392_s26 + $0x1728] sm:$0xff]  ;;  %v7699_v34 = vcombine.high %v1045_v27, %v1049_v28  ;;  %v7698_v41 = vcombine.low %v1045_v27, %v1049_v28  ;;  %v332_v27 = vld [vmem:[%s8392_s26 + $0xb8] sm:$0xff] }
 0x1b4   : > { %v7701_v35 = vcombine.high %v1046_v60, %v1050_v31  ;;  %v7700_v42 = vcombine.low %v1046_v60, %v1050_v31 }
 0x1b5   : > { %5220 = vmatpush1.bf16.msra.mxu0 %v7642_v36  ;;  %5466 = vmatpush1.bf16.msra.mxu1 %v7644_v37  ;;  %v1053_v36 = vld [vmem:[%s8392_s26 + $0x1740] sm:$0xff] }
 0x1b6   : > { %5221 = vmatprep.subr.bf16.mxu0 %v7651_v38  ;;  %5467 = vmatprep.subr.bf16.mxu1 %v7653_v40  ;;  %v1057_v37 = vld [vmem:[%s8392_s26 + $0x1760] sm:$0xff]  ;;  %v1054_v38 = vld [vmem:[%s8392_s26 + $0x1748] sm:$0xff] }
 0x1b7   : > { %v1058_v40 = vld [vmem:[%s8392_s26 + $0x1768] sm:$0xff]  ;;  %v7707_v43 = vcombine.high %v1053_v36, %v1057_v37  ;;  %v7706_v52 = vcombine.low %v1053_v36, %v1057_v37  ;;  %v340_v36 = vld [vmem:[%s8392_s26 + $0xf8] sm:$0xff] }
 0x1b8   : > { %v7709_v44 = vcombine.high %v1054_v38, %v1058_v40  ;;  %v7708_v53 = vcombine.low %v1054_v38, %v1058_v40 }
 0x1b9   : > { %5222 = vmatpush1.bf16.msra.mxu0 %v7650_v46  ;;  %5468 = vmatpush1.bf16.msra.mxu1 %v7652_v47  ;;  %v1061_v46 = vld [vmem:[%s8392_s26 + $0x1780] sm:$0xff] }
 0x1ba   : > { %5223 = vmatprep.subr.bf16.mxu0 %v7659_v50  ;;  %5469 = vmatprep.subr.bf16.mxu1 %v7661_v51  ;;  %v1065_v47 = vld [vmem:[%s8392_s26 + $0x17a0] sm:$0xff]  ;;  %v1062_v50 = vld [vmem:[%s8392_s26 + $0x1788] sm:$0xff] }
 0x1bb   : > { %v1066_v51 = vld [vmem:[%s8392_s26 + $0x17a8] sm:$0xff]  ;;  %v7715_v55 = vcombine.high %v1061_v46, %v1065_v47  ;;  %v7714_v62 = vcombine.low %v1061_v46, %v1065_v47  ;;  %v348_v46 = vld [vmem:[%s8392_s26 + $0x138] sm:$0xff] }
 0x1bc   : > { %v7717_v56 = vcombine.high %v1062_v50, %v1066_v51  ;;  %v7716_v63 = vcombine.low %v1062_v50, %v1066_v51 }
 0x1bd   : > { %5224 = vmatpush1.bf16.msra.mxu0 %v7658_v57  ;;  %5470 = vmatpush1.bf16.msra.mxu1 %v7660_v58  ;;  %v1069_v57 = vld [vmem:[%s8392_s26 + $0x17c0] sm:$0xff] }
 0x1be   : > { %5225 = vmatprep.subr.bf16.mxu0 %v7667_v54  ;;  %5471 = vmatprep.subr.bf16.mxu1 %v7669_v11  ;;  %v1073_v58 = vld [vmem:[%s8392_s26 + $0x17e0] sm:$0xff]  ;;  %v1070_v54 = vld [vmem:[%s8392_s26 + $0x17c8] sm:$0xff] }
 0x1bf   : > { %v1074_v11 = vld [vmem:[%s8392_s26 + $0x17e8] sm:$0xff]  ;;  %v7723_v1 = vcombine.high %v1069_v57, %v1073_v58  ;;  %v7722_v7 = vcombine.low %v1069_v57, %v1073_v58 }
 0x1c0   : > { %v7725_v2 = vcombine.high %v1070_v54, %v1074_v11  ;;  %v7724_v8 = vcombine.low %v1070_v54, %v1074_v11 }
 0x1c1   : > { %5226 = vmatpush1.bf16.msra.mxu0 %v7666_v3  ;;  %5472 = vmatpush1.bf16.msra.mxu1 %v7668_v4  ;;  %v311_v3 = vld [vmem:[%s8392_s26 + $0x10] sm:$0xff] }
 0x1c2   : > { %5227 = vmatprep.subr.bf16.mxu0 %v7675_v5  ;;  %5473 = vmatprep.subr.bf16.mxu1 %v7677_v30  ;;  %v315_v4 = vld [vmem:[%s8392_s26 + $0x30] sm:$0xff]  ;;  %v312_v5 = vld [vmem:[%s8392_s26 + $0x18] sm:$0xff] }
 0x1c3   : > { %v316_v30 = vld [vmem:[%s8392_s26 + $0x38] sm:$0xff]  ;;  %v6967_v9 = vcombine.high %v311_v3, %v315_v4  ;;  %v6966_v18 = vcombine.low %v311_v3, %v315_v4 }
 0x1c4   : > { %v6969_v12 = vcombine.high %v312_v5, %v316_v30  ;;  %v6968_v20 = vcombine.low %v312_v5, %v316_v30 }
 0x1c5   : > { %5228 = vmatpush1.bf16.msra.mxu0 %v7674_v13  ;;  %5474 = vmatpush1.bf16.msra.mxu1 %v7676_v14  ;;  %v319_v13 = vld [vmem:[%s8392_s26 + $0x50] sm:$0xff] }
 0x1c6   : > { %5229 = vmatprep.subr.bf16.mxu0 %v7683_v15  ;;  %5475 = vmatprep.subr.bf16.mxu1 %v7685_v16  ;;  %v323_v14 = vld [vmem:[%s8392_s26 + $0x70] sm:$0xff]  ;;  %v8890_v15 = vcombine.high %v8814_v48, %v8814_v48  ;;  %v320_v16 = vld [vmem:[%s8392_s26 + $0x58] sm:$0xff] }
 0x1c7   : > { %v6975_v21 = vcombine.high %v319_v13, %v323_v14  ;;  %v6974_v28 = vcombine.low %v319_v13, %v323_v14  ;;  %v6976_v60 = vcombine.low %v320_v16, %v324_v17 }
 0x1c9   : > { %5230 = vmatpush1.bf16.msra.mxu0 %v7682_v22  ;;  %5476 = vmatpush1.bf16.msra.mxu1 %v7684_v23  ;;  %v6977_v22 = vcombine.high %v320_v16, %v324_v17  ;;  %v327_v23 = vld [vmem:[%s8392_s26 + $0x90] sm:$0xff] }
 0x1ca   : > { %5231 = vmatprep.subr.bf16.mxu0 %v7691_v25  ;;  %5477 = vmatprep.subr.bf16.mxu1 %v7693_v26  ;;  %v331_v25 = vld [vmem:[%s8392_s26 + $0xb0] sm:$0xff]  ;;  %v328_v26 = vld [vmem:[%s8392_s26 + $0x98] sm:$0xff] }
 0x1cb   : > { %v6983_v31 = vcombine.high %v327_v23, %v331_v25  ;;  %v6982_v37 = vcombine.low %v327_v23, %v331_v25  ;;  %v6984_v38 = vcombine.low %v328_v26, %v332_v27 }
 0x1cd   : > { %5232 = vmatpush1.bf16.msra.mxu0 %v7690_v32  ;;  %5478 = vmatpush1.bf16.msra.mxu1 %v7692_v0  ;;  %v6985_v32 = vcombine.high %v328_v26, %v332_v27  ;;  %v335_v0 = vld [vmem:[%s8392_s26 + $0xd0] sm:$0xff] }
 0x1ce   : > { %5233 = vmatprep.subr.bf16.mxu0 %v7699_v34  ;;  %5479 = vmatprep.subr.bf16.mxu1 %v7701_v35  ;;  %v339_v34 = vld [vmem:[%s8392_s26 + $0xf0] sm:$0xff]  ;;  %v336_v35 = vld [vmem:[%s8392_s26 + $0xd8] sm:$0xff] }
 0x1cf   : > { %v6991_v40 = vcombine.high %v335_v0, %v339_v34  ;;  %v6990_v47 = vcombine.low %v335_v0, %v339_v34 }
 0x1d1   : > { %5234 = vmatpush1.bf16.msra.mxu0 %v7698_v41  ;;  %5480 = vmatpush1.bf16.msra.mxu1 %v7700_v42  ;;  %v6993_v41 = vcombine.high %v336_v35, %v340_v36  ;;  %v343_v42 = vld [vmem:[%s8392_s26 + $0x110] sm:$0xff] }
 0x1d2   : > { %5235 = vmatprep.subr.bf16.mxu0 %v7707_v43  ;;  %5481 = vmatprep.subr.bf16.mxu1 %v7709_v44  ;;  %v347_v43 = vld [vmem:[%s8392_s26 + $0x130] sm:$0xff]  ;;  %v344_v44 = vld [vmem:[%s8392_s26 + $0x118] sm:$0xff] }
 0x1d3   : > { %v6999_v50 = vcombine.high %v343_v42, %v347_v43  ;;  %v7001_v51 = vcombine.high %v344_v44, %v348_v46  ;;  %v6998_v57 = vcombine.low %v343_v42, %v347_v43  ;;  %v7000_v58 = vcombine.low %v344_v44, %v348_v46 }
 0x1d5   : > { %5236 = vmatpush1.bf16.msra.mxu0 %v7706_v52  ;;  %5482 = vmatpush1.bf16.msra.mxu1 %v7708_v53  ;;  %v351_v52 = vld [vmem:[%s8392_s26 + $0x150] sm:$0xff] }
 0x1d6   : > { %5237 = vmatprep.subr.bf16.mxu0 %v7715_v55  ;;  %5483 = vmatprep.subr.bf16.mxu1 %v7717_v56  ;;  %v355_v53 = vld [vmem:[%s8392_s26 + $0x170] sm:$0xff]  ;;  %v352_v55 = vld [vmem:[%s8392_s26 + $0x158] sm:$0xff] }
 0x1d7   : > { %v356_v56 = vld [vmem:[%s8392_s26 + $0x178] sm:$0xff]  ;;  %v7007_v54 = vcombine.high %v351_v52, %v355_v53  ;;  %v7006_v3 = vcombine.low %v351_v52, %v355_v53 }
 0x1d8   : > { %v7009_v11 = vcombine.high %v352_v55, %v356_v56  ;;  %v7008_v4 = vcombine.low %v352_v55, %v356_v56 }
 0x1d9   : > { %5238 = vmatpush1.bf16.msra.mxu0 %v7714_v62  ;;  %5484 = vmatpush1.bf16.msra.mxu1 %v7716_v63  ;;  %v359_v62 = vld [vmem:[%s8392_s26 + $0x190] sm:$0xff] }
 0x1da   : > { %5239 = vmatprep.subr.bf16.mxu0 %v7723_v1  ;;  %5485 = vmatprep.subr.bf16.mxu1 %v7725_v2  ;;  %v363_v63 = vld [vmem:[%s8392_s26 + $0x1b0] sm:$0xff]  ;;  %v360_v1 = vld [vmem:[%s8392_s26 + $0x198] sm:$0xff] }
 0x1db   : > { %v364_v2 = vld [vmem:[%s8392_s26 + $0x1b8] sm:$0xff]  ;;  %v7015_v5 = vcombine.high %v359_v62, %v363_v63  ;;  %v7014_v13 = vcombine.low %v359_v62, %v363_v63 }
 0x1dc   : > { %v7017_v30 = vcombine.high %v360_v1, %v364_v2  ;;  %v7016_v14 = vcombine.low %v360_v1, %v364_v2 }
 0x1dd   : > { %5240 = vmatpush1.bf16.msra.mxu0 %v7722_v7  ;;  %5486 = vmatpush1.bf16.msra.mxu1 %v7724_v8  ;;  %v367_v7 = vld [vmem:[%s8392_s26 + $0x1d0] sm:$0xff] }
 0x1de   : > { %5496 = vmatprep.subr.bf16.mxu0 %v6967_v9  ;;  %5742 = vmatprep.subr.bf16.mxu1 %v6969_v12  ;;  %v371_v8 = vld [vmem:[%s8392_s26 + $0x1f0] sm:$0xff]  ;;  %v368_v9 = vld [vmem:[%s8392_s26 + $0x1d8] sm:$0xff] }
 0x1df   : > { %v372_v12 = vld [vmem:[%s8392_s26 + $0x1f8] sm:$0xff]  ;;  %v7023_v16 = vcombine.high %v367_v7, %v371_v8  ;;  %v7022_v23 = vcombine.low %v367_v7, %v371_v8 }
 0x1e0   : > { %5242 = vmatmul.mubr.bf16.vlgmr.msra.gmra.mrb[0].mxu0 %v8890_v15  ;;  %5488 = vmatmul.mubr.bf16.vlgmr.msra.gmra.mrb[0].mxu1 %v8890_v15  ;;  %v7025_v17 = vcombine.high %v368_v9, %v372_v12  ;;  %v7024_v25 = vcombine.low %v368_v9, %v372_v12 }
 0x1e1   : > { %5497 = vmatpush1.bf16.msra.mxu0 %v6966_v18  ;;  %5743 = vmatpush1.bf16.msra.mxu1 %v6968_v20  ;;  %v375_v18 = vld [vmem:[%s8392_s26 + $0x210] sm:$0xff] }
 0x1e2   : > { %5498 = vmatprep.subr.bf16.mxu0 %v6975_v21  ;;  %5744 = vmatprep.subr.bf16.mxu1 %v6977_v22  ;;  %v379_v20 = vld [vmem:[%s8392_s26 + $0x230] sm:$0xff]  ;;  %v376_v21 = vld [vmem:[%s8392_s26 + $0x218] sm:$0xff] }
 0x1e3   : > { %5528 = vmatprep.mubr.bf16.mxu0 %v8458_v10  ;;  %5774 = vmatprep.mubr.bf16.mxu1 %v8458_v10  ;;  %v6992_v10 = vcombine.low %v336_v35, %v340_v36  ;;  %v380_v22 = vld [vmem:[%s8392_s26 + $0x238] sm:$0xff]  ;;  %v7031_v26 = vcombine.high %v375_v18, %v379_v20  ;;  %v7030_v0 = vcombine.low %v375_v18, %v379_v20 }
 0x1e4   : > { %v7033_v27 = vcombine.high %v376_v21, %v380_v22  ;;  %v7032_v34 = vcombine.low %v376_v21, %v380_v22 }
 0x1e5   : > { %5499 = vmatpush1.bf16.msra.mxu0 %v6974_v28  ;;  %5745 = vmatpush1.bf16.msra.mxu1 %v6976_v60  ;;  %v383_v28 = vld [vmem:[%s8392_s26 + $0x250] sm:$0xff] }
 0x1e6   : > { %5500 = vmatprep.subr.bf16.mxu0 %v6983_v31  ;;  %5746 = vmatprep.subr.bf16.mxu1 %v6985_v32  ;;  %v387_v60 = vld [vmem:[%s8392_s26 + $0x270] sm:$0xff]  ;;  %v384_v31 = vld [vmem:[%s8392_s26 + $0x258] sm:$0xff] }
 0x1e7   : > { %v388_v32 = vld [vmem:[%s8392_s26 + $0x278] sm:$0xff]  ;;  %v7039_v35 = vcombine.high %v383_v28, %v387_v60  ;;  %v7038_v42 = vcombine.low %v383_v28, %v387_v60 }
 0x1e8   : > { %v7041_v36 = vcombine.high %v384_v31, %v388_v32  ;;  %v7040_v43 = vcombine.low %v384_v31, %v388_v32 }
 0x1e9   : > { %5501 = vmatpush1.bf16.msra.mxu0 %v6982_v37  ;;  %5747 = vmatpush1.bf16.msra.mxu1 %v6984_v38  ;;  %v391_v37 = vld [vmem:[%s8392_s26 + $0x290] sm:$0xff] }
 0x1ea   : > { %5502 = vmatprep.subr.bf16.mxu0 %v6991_v40  ;;  %5748 = vmatprep.subr.bf16.mxu1 %v6993_v41  ;;  %v395_v38 = vld [vmem:[%s8392_s26 + $0x2b0] sm:$0xff]  ;;  %v392_v40 = vld [vmem:[%s8392_s26 + $0x298] sm:$0xff] }
 0x1eb   : > { %v396_v41 = vld [vmem:[%s8392_s26 + $0x2b8] sm:$0xff]  ;;  %v7047_v44 = vcombine.high %v391_v37, %v395_v38  ;;  %v7046_v52 = vcombine.low %v391_v37, %v395_v38 }
 0x1ec   : > { %v7049_v46 = vcombine.high %v392_v40, %v396_v41  ;;  %v7048_v53 = vcombine.low %v392_v40, %v396_v41 }
 0x1ed   : > { %5503 = vmatpush1.bf16.msra.mxu0 %v6990_v47  ;;  %5749 = vmatpush1.bf16.msra.mxu1 %v6992_v10  ;;  %v399_v47 = vld [vmem:[%s8392_s26 + $0x2d0] sm:$0xff] }
 0x1ee   : > { %5504 = vmatprep.subr.bf16.mxu0 %v6999_v50  ;;  %5750 = vmatprep.subr.bf16.mxu1 %v7001_v51  ;;  %v403_v10 = vld [vmem:[%s8392_s26 + $0x2f0] sm:$0xff]  ;;  %v400_v50 = vld [vmem:[%s8392_s26 + $0x2d8] sm:$0xff] }
 0x1ef   : > { %v404_v51 = vld [vmem:[%s8392_s26 + $0x2f8] sm:$0xff]  ;;  %v7055_v55 = vcombine.high %v399_v47, %v403_v10  ;;  %v7054_v62 = vcombine.low %v399_v47, %v403_v10 }
 0x1f0   : > { %v7057_v56 = vcombine.high %v400_v50, %v404_v51  ;;  %v7056_v63 = vcombine.low %v400_v50, %v404_v51 }
 0x1f1   : > { %5505 = vmatpush1.bf16.msra.mxu0 %v6998_v57  ;;  %5751 = vmatpush1.bf16.msra.mxu1 %v7000_v58  ;;  %v407_v57 = vld [vmem:[%s8392_s26 + $0x310] sm:$0xff] }
 0x1f2   : > { %5506 = vmatprep.subr.bf16.mxu0 %v7007_v54  ;;  %5752 = vmatprep.subr.bf16.mxu1 %v7009_v11  ;;  %v411_v58 = vld [vmem:[%s8392_s26 + $0x330] sm:$0xff]  ;;  %v408_v54 = vld [vmem:[%s8392_s26 + $0x318] sm:$0xff] }
 0x1f3   : > { %v412_v11 = vld [vmem:[%s8392_s26 + $0x338] sm:$0xff]  ;;  %v7063_v1 = vcombine.high %v407_v57, %v411_v58  ;;  %v7062_v7 = vcombine.low %v407_v57, %v411_v58 }
 0x1f4   : > { %v7065_v2 = vcombine.high %v408_v54, %v412_v11  ;;  %v7064_v8 = vcombine.low %v408_v54, %v412_v11 }
 0x1f5   : > { %5507 = vmatpush1.bf16.msra.mxu0 %v7006_v3  ;;  %5753 = vmatpush1.bf16.msra.mxu1 %v7008_v4  ;;  %v415_v3 = vld [vmem:[%s8392_s26 + $0x350] sm:$0xff] }
 0x1f6   : > { %5508 = vmatprep.subr.bf16.mxu0 %v7015_v5  ;;  %5754 = vmatprep.subr.bf16.mxu1 %v7017_v30  ;;  %v419_v4 = vld [vmem:[%s8392_s26 + $0x370] sm:$0xff]  ;;  %v416_v5 = vld [vmem:[%s8392_s26 + $0x358] sm:$0xff] }
 0x1f7   : > { %v420_v30 = vld [vmem:[%s8392_s26 + $0x378] sm:$0xff]  ;;  %v7071_v9 = vcombine.high %v415_v3, %v419_v4  ;;  %v7070_v18 = vcombine.low %v415_v3, %v419_v4 }
 0x1f8   : > { %v7073_v12 = vcombine.high %v416_v5, %v420_v30  ;;  %v7072_v20 = vcombine.low %v416_v5, %v420_v30  ;;  %v471_v30 = vld [vmem:[%s8392_s26 + $0x510] sm:$0xff] }
 0x1f9   : > { %5509 = vmatpush1.bf16.msra.mxu0 %v7014_v13  ;;  %5755 = vmatpush1.bf16.msra.mxu1 %v7016_v14  ;;  %v423_v13 = vld [vmem:[%s8392_s26 + $0x390] sm:$0xff] }
 0x1fa   : > { %5510 = vmatprep.subr.bf16.mxu0 %v7023_v16  ;;  %5756 = vmatprep.subr.bf16.mxu1 %v7025_v17  ;;  %v427_v14 = vld [vmem:[%s8392_s26 + $0x3b0] sm:$0xff]  ;;  %v424_v16 = vld [vmem:[%s8392_s26 + $0x398] sm:$0xff] }
 0x1fb   : > { %v428_v17 = vld [vmem:[%s8392_s26 + $0x3b8] sm:$0xff]  ;;  %v7079_v21 = vcombine.high %v423_v13, %v427_v14  ;;  %v7078_v28 = vcombine.low %v423_v13, %v427_v14 }
 0x1fc   : > { %v7081_v22 = vcombine.high %v424_v16, %v428_v17  ;;  %v7080_v60 = vcombine.low %v424_v16, %v428_v17  ;;  %v479_v16 = vld [vmem:[%s8392_s26 + $0x550] sm:$0xff] }
 0x1fd   : > { %5511 = vmatpush1.bf16.msra.mxu0 %v7022_v23  ;;  %5757 = vmatpush1.bf16.msra.mxu1 %v7024_v25  ;;  %v431_v23 = vld [vmem:[%s8392_s26 + $0x3d0] sm:$0xff] }
 0x1fe   : > { %5512 = vmatprep.subr.bf16.mxu0 %v7031_v26  ;;  %5758 = vmatprep.subr.bf16.mxu1 %v7033_v27  ;;  %v435_v25 = vld [vmem:[%s8392_s26 + $0x3f0] sm:$0xff]  ;;  %v432_v26 = vld [vmem:[%s8392_s26 + $0x3d8] sm:$0xff] }
 0x1ff   : > { %v436_v27 = vld [vmem:[%s8392_s26 + $0x3f8] sm:$0xff]  ;;  %v7087_v31 = vcombine.high %v431_v23, %v435_v25  ;;  %v7086_v37 = vcombine.low %v431_v23, %v435_v25  ;;  %v483_v17 = vld [vmem:[%s8392_s26 + $0x570] sm:$0xff] }
 0x200   : > { %v7089_v32 = vcombine.high %v432_v26, %v436_v27  ;;  %v7088_v38 = vcombine.low %v432_v26, %v436_v27  ;;  %v7135_v23 = vcombine.high %v479_v16, %v483_v17  ;;  %v487_v26 = vld [vmem:[%s8392_s26 + $0x590] sm:$0xff] }
 0x201   : > { %5513 = vmatpush1.bf16.msra.mxu0 %v7030_v0  ;;  %5759 = vmatpush1.bf16.msra.mxu1 %v7032_v34  ;;  %v439_v0 = vld [vmem:[%s8392_s26 + $0x410] sm:$0xff] }
 0x202   : > { %5514 = vmatprep.subr.bf16.mxu0 %v7039_v35  ;;  %5760 = vmatprep.subr.bf16.mxu1 %v7041_v36  ;;  %v443_v34 = vld [vmem:[%s8392_s26 + $0x430] sm:$0xff]  ;;  %v440_v35 = vld [vmem:[%s8392_s26 + $0x418] sm:$0xff] }
 0x203   : > { %v444_v36 = vld [vmem:[%s8392_s26 + $0x438] sm:$0xff]  ;;  %v7095_v40 = vcombine.high %v439_v0, %v443_v34  ;;  %v7094_v47 = vcombine.low %v439_v0, %v443_v34  ;;  %v491_v27 = vld [vmem:[%s8392_s26 + $0x5b0] sm:$0xff] }
 0x204   : > { %v7097_v41 = vcombine.high %v440_v35, %v444_v36  ;;  %v7096_v10 = vcombine.low %v440_v35, %v444_v36  ;;  %v7143_v0 = vcombine.high %v487_v26, %v491_v27  ;;  %v495_v35 = vld [vmem:[%s8392_s26 + $0x5d0] sm:$0xff] }
 0x205   : > { %5515 = vmatpush1.bf16.msra.mxu0 %v7038_v42  ;;  %5761 = vmatpush1.bf16.msra.mxu1 %v7040_v43  ;;  %v447_v42 = vld [vmem:[%s8392_s26 + $0x450] sm:$0xff] }
 0x206   : > { %5516 = vmatprep.subr.bf16.mxu0 %v7047_v44  ;;  %5762 = vmatprep.subr.bf16.mxu1 %v7049_v46  ;;  %v451_v43 = vld [vmem:[%s8392_s26 + $0x470] sm:$0xff]  ;;  %v448_v44 = vld [vmem:[%s8392_s26 + $0x458] sm:$0xff] }
 0x207   : > { %v452_v46 = vld [vmem:[%s8392_s26 + $0x478] sm:$0xff]  ;;  %v7103_v50 = vcombine.high %v447_v42, %v451_v43  ;;  %v7102_v57 = vcombine.low %v447_v42, %v451_v43  ;;  %v499_v36 = vld [vmem:[%s8392_s26 + $0x5f0] sm:$0xff] }
 0x208   : > { %v7105_v51 = vcombine.high %v448_v44, %v452_v46  ;;  %v7104_v58 = vcombine.low %v448_v44, %v452_v46  ;;  %v7151_v42 = vcombine.high %v495_v35, %v499_v36  ;;  %v503_v44 = vld [vmem:[%s8392_s26 + $0x610] sm:$0xff] }
 0x209   : > { %5517 = vmatpush1.bf16.msra.mxu0 %v7046_v52  ;;  %5763 = vmatpush1.bf16.msra.mxu1 %v7048_v53  ;;  %v455_v52 = vld [vmem:[%s8392_s26 + $0x490] sm:$0xff] }
 0x20a   : > { %5518 = vmatprep.subr.bf16.mxu0 %v7055_v55  ;;  %5764 = vmatprep.subr.bf16.mxu1 %v7057_v56  ;;  %v459_v53 = vld [vmem:[%s8392_s26 + $0x4b0] sm:$0xff]  ;;  %v456_v55 = vld [vmem:[%s8392_s26 + $0x498] sm:$0xff] }
 0x20b   : > { %v460_v56 = vld [vmem:[%s8392_s26 + $0x4b8] sm:$0xff]  ;;  %v7111_v54 = vcombine.high %v455_v52, %v459_v53  ;;  %v507_v46 = vld [vmem:[%s8392_s26 + $0x630] sm:$0xff] }
 0x20c   : > { %v7113_v11 = vcombine.high %v456_v55, %v460_v56  ;;  %v7112_v3 = vcombine.low %v456_v55, %v460_v56  ;;  %v511_v55 = vld [vmem:[%s8392_s26 + $0x650] sm:$0xff] }
 0x20d   : > { %5519 = vmatpush1.bf16.msra.mxu0 %v7054_v62  ;;  %5765 = vmatpush1.bf16.msra.mxu1 %v7056_v63  ;;  %v463_v62 = vld [vmem:[%s8392_s26 + $0x4d0] sm:$0xff] }
 0x20e   : > { %5520 = vmatprep.subr.bf16.mxu0 %v7063_v1  ;;  %5766 = vmatprep.subr.bf16.mxu1 %v7065_v2  ;;  %v467_v63 = vld [vmem:[%s8392_s26 + $0x4f0] sm:$0xff]  ;;  %v464_v1 = vld [vmem:[%s8392_s26 + $0x4d8] sm:$0xff] }
 0x20f   : > { %v468_v2 = vld [vmem:[%s8392_s26 + $0x4f8] sm:$0xff]  ;;  %v7119_v4 = vcombine.high %v463_v62, %v467_v63  ;;  %v515_v56 = vld [vmem:[%s8392_s26 + $0x670] sm:$0xff] }
 0x210   : > { %v7121_v5 = vcombine.high %v464_v1, %v468_v2 }
 0x211   : > { %5521 = vmatpush1.bf16.msra.mxu0 %v7062_v7  ;;  %5767 = vmatpush1.bf16.msra.mxu1 %v7064_v8  ;;  %v475_v7 = vld [vmem:[%s8392_s26 + $0x530] sm:$0xff]  ;;  %v472_v8 = vld [vmem:[%s8392_s26 + $0x518] sm:$0xff] }
 0x212   : > { %5522 = vmatprep.subr.bf16.mxu0 %v7071_v9  ;;  %5768 = vmatprep.subr.bf16.mxu1 %v7073_v12  ;;  %v476_v9 = vld [vmem:[%s8392_s26 + $0x538] sm:$0xff]  ;;  %v7118_v12 = vcombine.low %v463_v62, %v467_v63  ;;  %v7127_v13 = vcombine.high %v471_v30, %v475_v7  ;;  %v7167_v62 = vcombine.high %v511_v55, %v515_v56 }
 0x213   : > { %v7129_v14 = vcombine.high %v472_v8, %v476_v9 }
 0x215   : > { %5523 = vmatpush1.bf16.msra.mxu0 %v7070_v18  ;;  %5769 = vmatpush1.bf16.msra.mxu1 %v7072_v20  ;;  %v480_v18 = vld [vmem:[%s8392_s26 + $0x558] sm:$0xff] }
 0x216   : > { %5524 = vmatprep.subr.bf16.mxu0 %v7079_v21  ;;  %5770 = vmatprep.subr.bf16.mxu1 %v7081_v22  ;;  %v484_v20 = vld [vmem:[%s8392_s26 + $0x578] sm:$0xff]  ;;  %v7126_v21 = vcombine.low %v471_v30, %v475_v7  ;;  %v7128_v22 = vcombine.low %v472_v8, %v476_v9  ;;  %v527_v8 = vld [vmem:[%s8392_s26 + $0x6d0] sm:$0xff] }
 0x217   : > { %v7137_v25 = vcombine.high %v480_v18, %v484_v20  ;;  %v531_v9 = vld [vmem:[%s8392_s26 + $0x6f0] sm:$0xff] }
 0x219   : > { %5525 = vmatpush1.bf16.msra.mxu0 %v7078_v28  ;;  %5771 = vmatpush1.bf16.msra.mxu1 %v7080_v60  ;;  %v488_v28 = vld [vmem:[%s8392_s26 + $0x598] sm:$0xff] }
 0x21a   : > { %5526 = vmatprep.subr.bf16.mxu0 %v7087_v31  ;;  %5772 = vmatprep.subr.bf16.mxu1 %v7089_v32  ;;  %v492_v60 = vld [vmem:[%s8392_s26 + $0x5b8] sm:$0xff]  ;;  %v7134_v31 = vcombine.low %v479_v16, %v483_v17  ;;  %v7136_v32 = vcombine.low %v480_v18, %v484_v20  ;;  %v7183_v16 = vcombine.high %v527_v8, %v531_v9  ;;  %v535_v18 = vld [vmem:[%s8392_s26 + $0x710] sm:$0xff] }
 0x21b   : > { %v7145_v34 = vcombine.high %v488_v28, %v492_v60  ;;  %v539_v20 = vld [vmem:[%s8392_s26 + $0x730] sm:$0xff] }
 0x21d   : > { %5527 = vmatpush1.bf16.msra.mxu0 %v7086_v37  ;;  %5773 = vmatpush1.bf16.msra.mxu1 %v7088_v38  ;;  %v496_v37 = vld [vmem:[%s8392_s26 + $0x5d8] sm:$0xff] }
 0x21e   : > { %5537 = vmatprep.subr.bf16.mxu0 %v7095_v40  ;;  %5783 = vmatprep.subr.bf16.mxu1 %v7097_v41  ;;  %v500_v38 = vld [vmem:[%s8392_s26 + $0x5f8] sm:$0xff]  ;;  %v7142_v40 = vcombine.low %v487_v26, %v491_v27  ;;  %v7144_v41 = vcombine.low %v488_v28, %v492_v60  ;;  %v7191_v26 = vcombine.high %v535_v18, %v539_v20  ;;  %v543_v28 = vld [vmem:[%s8392_s26 + $0x750] sm:$0xff] }
 0x21f   : > { %v7153_v43 = vcombine.high %v496_v37, %v500_v38  ;;  %v547_v60 = vld [vmem:[%s8392_s26 + $0x770] sm:$0xff] }
 0x220   : > { %5529 = vmatmul.mubr.bf16.vlgmr.msra.gmra.mrb[4].mxu0 %v8500_v24  ;;  %5775 = vmatmul.mubr.bf16.vlgmr.msra.gmra.mrb[4].mxu1 %v8500_v24  ;;  %v7110_v24 = vcombine.low %v455_v52, %v459_v53  ;;  %v7159_v52 = vcombine.high %v503_v44, %v507_v46 }
 0x221   : > { %5538 = vmatpush1.bf16.msra.mxu0 %v7094_v47  ;;  %5784 = vmatpush1.bf16.msra.mxu1 %v7096_v10  ;;  %v504_v47 = vld [vmem:[%s8392_s26 + $0x618] sm:$0xff] }
 0x222   : > { %5539 = vmatprep.subr.bf16.mxu0 %v7103_v50  ;;  %5785 = vmatprep.subr.bf16.mxu1 %v7105_v51  ;;  %v508_v10 = vld [vmem:[%s8392_s26 + $0x638] sm:$0xff]  ;;  %v7150_v50 = vcombine.low %v495_v35, %v499_v36  ;;  %v7152_v51 = vcombine.low %v496_v37, %v500_v38  ;;  %v7199_v35 = vcombine.high %v543_v28, %v547_v60  ;;  %v551_v37 = vld [vmem:[%s8392_s26 + $0x790] sm:$0xff] }
 0x223   : > { %5569 = vmatprep.mubr.bf16.mxu0 %v8508_v33  ;;  %5815 = vmatprep.mubr.bf16.mxu1 %v8508_v33  ;;  %v7120_v33 = vcombine.low %v464_v1, %v468_v2  ;;  %v7161_v53 = vcombine.high %v504_v47, %v508_v10  ;;  %v519_v1 = vld [vmem:[%s8392_s26 + $0x690] sm:$0xff] }
 0x224   : > { %v523_v2 = vld [vmem:[%s8392_s26 + $0x6b0] sm:$0xff] }
 0x225   : > { %5540 = vmatpush1.bf16.msra.mxu0 %v7102_v57  ;;  %5786 = vmatpush1.bf16.msra.mxu1 %v7104_v58  ;;  %v512_v57 = vld [vmem:[%s8392_s26 + $0x658] sm:$0xff]  ;;  %v7175_v30 = vcombine.high %v519_v1, %v523_v2  ;;  %v555_v38 = vld [vmem:[%s8392_s26 + $0x7b0] sm:$0xff] }
 0x226   : > { %5541 = vmatprep.subr.bf16.mxu0 %v7111_v54  ;;  %5787 = vmatprep.subr.bf16.mxu1 %v7113_v11  ;;  %v516_v58 = vld [vmem:[%s8392_s26 + $0x678] sm:$0xff]  ;;  %v7158_v54 = vcombine.low %v503_v44, %v507_v46  ;;  %v7160_v11 = vcombine.low %v504_v47, %v508_v10  ;;  %v7207_v44 = vcombine.high %v551_v37, %v555_v38  ;;  %v559_v47 = vld [vmem:[%s8392_s26 + $0x7d0] sm:$0xff] }
 0x227   : > { %v7169_v63 = vcombine.high %v512_v57, %v516_v58  ;;  %v563_v10 = vld [vmem:[%s8392_s26 + $0x7f0] sm:$0xff] }
 0x229   : > { %5542 = vmatpush1.bf16.msra.mxu0 %v7110_v24  ;;  %5788 = vmatpush1.bf16.msra.mxu1 %v7112_v3  ;;  %v520_v24 = vld [vmem:[%s8392_s26 + $0x698] sm:$0xff] }
 0x22a   : > { %5543 = vmatprep.subr.bf16.mxu0 %v7119_v4  ;;  %5789 = vmatprep.subr.bf16.mxu1 %v7121_v5  ;;  %v524_v3 = vld [vmem:[%s8392_s26 + $0x6b8] sm:$0xff]  ;;  %v7166_v4 = vcombine.low %v511_v55, %v515_v56  ;;  %v7168_v5 = vcombine.low %v512_v57, %v516_v58  ;;  %v7215_v55 = vcombine.high %v559_v47, %v563_v10  ;;  %v567_v57 = vld [vmem:[%s8392_s26 + $0x810] sm:$0xff] }
 0x22b   : > { %v7177_v7 = vcombine.high %v520_v24, %v524_v3  ;;  %v571_v58 = vld [vmem:[%s8392_s26 + $0x830] sm:$0xff] }
 0x22d   : > { %5544 = vmatpush1.bf16.msra.mxu0 %v7118_v12  ;;  %5790 = vmatpush1.bf16.msra.mxu1 %v7120_v33  ;;  %v528_v12 = vld [vmem:[%s8392_s26 + $0x6d8] sm:$0xff] }
 0x22e   : > { %5545 = vmatprep.subr.bf16.mxu0 %v7127_v13  ;;  %5791 = vmatprep.subr.bf16.mxu1 %v7129_v14  ;;  %v532_v33 = vld [vmem:[%s8392_s26 + $0x6f8] sm:$0xff]  ;;  %v7174_v13 = vcombine.low %v519_v1, %v523_v2  ;;  %v7176_v14 = vcombine.low %v520_v24, %v524_v3  ;;  %v7223_v1 = vcombine.high %v567_v57, %v571_v58  ;;  %v575_v24 = vld [vmem:[%s8392_s26 + $0x850] sm:$0xff] }
 0x22f   : > { %v7185_v17 = vcombine.high %v528_v12, %v532_v33  ;;  %v579_v3 = vld [vmem:[%s8392_s26 + $0x870] sm:$0xff] }
 0x231   : > { %5546 = vmatpush1.bf16.msra.mxu0 %v7126_v21  ;;  %5792 = vmatpush1.bf16.msra.mxu1 %v7128_v22  ;;  %v536_v21 = vld [vmem:[%s8392_s26 + $0x718] sm:$0xff] }
 0x232   : > { %5547 = vmatprep.subr.bf16.mxu0 %v7135_v23  ;;  %5793 = vmatprep.subr.bf16.mxu1 %v7137_v25  ;;  %v540_v22 = vld [vmem:[%s8392_s26 + $0x738] sm:$0xff]  ;;  %v7182_v23 = vcombine.low %v527_v8, %v531_v9  ;;  %v7184_v25 = vcombine.low %v528_v12, %v532_v33  ;;  %v7231_v8 = vcombine.high %v575_v24, %v579_v3  ;;  %v583_v12 = vld [vmem:[%s8392_s26 + $0x890] sm:$0xff] }
 0x233   : > { %v7193_v27 = vcombine.high %v536_v21, %v540_v22  ;;  %v587_v33 = vld [vmem:[%s8392_s26 + $0x8b0] sm:$0xff] }
 0x235   : > { %5548 = vmatpush1.bf16.msra.mxu0 %v7134_v31  ;;  %5794 = vmatpush1.bf16.msra.mxu1 %v7136_v32  ;;  %v544_v31 = vld [vmem:[%s8392_s26 + $0x758] sm:$0xff] }
 0x236   : > { %5549 = vmatprep.subr.bf16.mxu0 %v7143_v0  ;;  %5795 = vmatprep.subr.bf16.mxu1 %v7145_v34  ;;  %v548_v32 = vld [vmem:[%s8392_s26 + $0x778] sm:$0xff]  ;;  %v7190_v0 = vcombine.low %v535_v18, %v539_v20  ;;  %v7192_v34 = vcombine.low %v536_v21, %v540_v22  ;;  %v7239_v18 = vcombine.high %v583_v12, %v587_v33  ;;  %v591_v21 = vld [vmem:[%s8392_s26 + $0x8d0] sm:$0xff] }
 0x237   : > { %v7201_v36 = vcombine.high %v544_v31, %v548_v32  ;;  %v595_v22 = vld [vmem:[%s8392_s26 + $0x8f0] sm:$0xff] }
 0x239   : > { %5550 = vmatpush1.bf16.msra.mxu0 %v7142_v40  ;;  %5796 = vmatpush1.bf16.msra.mxu1 %v7144_v41  ;;  %v552_v40 = vld [vmem:[%s8392_s26 + $0x798] sm:$0xff] }
 0x23a   : > { %5551 = vmatprep.subr.bf16.mxu0 %v7151_v42  ;;  %5797 = vmatprep.subr.bf16.mxu1 %v7153_v43  ;;  %v556_v41 = vld [vmem:[%s8392_s26 + $0x7b8] sm:$0xff]  ;;  %v7198_v42 = vcombine.low %v543_v28, %v547_v60  ;;  %v7200_v43 = vcombine.low %v544_v31, %v548_v32  ;;  %v599_v60 = vld [vmem:[%s8392_s26 + $0x910] sm:$0xff] }
 0x23b   : > { %v7209_v46 = vcombine.high %v552_v40, %v556_v41  ;;  %v603_v31 = vld [vmem:[%s8392_s26 + $0x930] sm:$0xff]  ;;  %v600_v32 = vld [vmem:[%s8392_s26 + $0x918] sm:$0xff] }
 0x23d   : > { %5552 = vmatpush1.bf16.msra.mxu0 %v7150_v50  ;;  %5798 = vmatpush1.bf16.msra.mxu1 %v7152_v51  ;;  %v560_v50 = vld [vmem:[%s8392_s26 + $0x7d8] sm:$0xff] }
 0x23e   : > { %5553 = vmatprep.subr.bf16.mxu0 %v7159_v52  ;;  %5799 = vmatprep.subr.bf16.mxu1 %v7161_v53  ;;  %v564_v51 = vld [vmem:[%s8392_s26 + $0x7f8] sm:$0xff]  ;;  %v7206_v52 = vcombine.low %v551_v37, %v555_v38  ;;  %v7208_v53 = vcombine.low %v552_v40, %v556_v41  ;;  %v607_v37 = vld [vmem:[%s8392_s26 + $0x950] sm:$0xff] }
 0x23f   : > { %v7217_v56 = vcombine.high %v560_v50, %v564_v51  ;;  %v611_v38 = vld [vmem:[%s8392_s26 + $0x970] sm:$0xff]  ;;  %v608_v40 = vld [vmem:[%s8392_s26 + $0x958] sm:$0xff] }
 0x240   : > { %v612_v41 = vld [vmem:[%s8392_s26 + $0x978] sm:$0xff] }
 0x241   : > { %5554 = vmatpush1.bf16.msra.mxu0 %v7158_v54  ;;  %5800 = vmatpush1.bf16.msra.mxu1 %v7160_v11  ;;  %v568_v54 = vld [vmem:[%s8392_s26 + $0x818] sm:$0xff] }
 0x242   : > { %5555 = vmatprep.subr.bf16.mxu0 %v7167_v62  ;;  %5801 = vmatprep.subr.bf16.mxu1 %v7169_v63  ;;  %v572_v11 = vld [vmem:[%s8392_s26 + $0x838] sm:$0xff]  ;;  %v7214_v62 = vcombine.low %v559_v47, %v563_v10  ;;  %v7216_v63 = vcombine.low %v560_v50, %v564_v51  ;;  %v615_v47 = vld [vmem:[%s8392_s26 + $0x990] sm:$0xff] }
 0x243   : > { %v7225_v2 = vcombine.high %v568_v54, %v572_v11  ;;  %v619_v10 = vld [vmem:[%s8392_s26 + $0x9b0] sm:$0xff]  ;;  %v616_v50 = vld [vmem:[%s8392_s26 + $0x998] sm:$0xff] }
 0x244   : > { %v620_v51 = vld [vmem:[%s8392_s26 + $0x9b8] sm:$0xff] }
 0x245   : > { %5556 = vmatpush1.bf16.msra.mxu0 %v7166_v4  ;;  %5802 = vmatpush1.bf16.msra.mxu1 %v7168_v5  ;;  %v576_v4 = vld [vmem:[%s8392_s26 + $0x858] sm:$0xff] }
 0x246   : > { %5557 = vmatprep.subr.bf16.mxu0 %v7175_v30  ;;  %5803 = vmatprep.subr.bf16.mxu1 %v7177_v7  ;;  %v580_v5 = vld [vmem:[%s8392_s26 + $0x878] sm:$0xff]  ;;  %v7222_v30 = vcombine.low %v567_v57, %v571_v58  ;;  %v7224_v7 = vcombine.low %v568_v54, %v572_v11  ;;  %v623_v57 = vld [vmem:[%s8392_s26 + $0x9d0] sm:$0xff] }
 0x247   : > { %v7233_v9 = vcombine.high %v576_v4, %v580_v5  ;;  %v627_v58 = vld [vmem:[%s8392_s26 + $0x9f0] sm:$0xff]  ;;  %v624_v54 = vld [vmem:[%s8392_s26 + $0x9d8] sm:$0xff] }
 0x248   : > { %v628_v11 = vld [vmem:[%s8392_s26 + $0x9f8] sm:$0xff] }
 0x249   : > { %5558 = vmatpush1.bf16.msra.mxu0 %v7174_v13  ;;  %5804 = vmatpush1.bf16.msra.mxu1 %v7176_v14  ;;  %v584_v13 = vld [vmem:[%s8392_s26 + $0x898] sm:$0xff] }
 0x24a   : > { %5559 = vmatprep.subr.bf16.mxu0 %v7183_v16  ;;  %5805 = vmatprep.subr.bf16.mxu1 %v7185_v17  ;;  %v588_v14 = vld [vmem:[%s8392_s26 + $0x8b8] sm:$0xff]  ;;  %v7230_v16 = vcombine.low %v575_v24, %v579_v3  ;;  %v7232_v17 = vcombine.low %v576_v4, %v580_v5  ;;  %v631_v24 = vld [vmem:[%s8392_s26 + $0xa10] sm:$0xff] }
 0x24b   : > { %v7241_v20 = vcombine.high %v584_v13, %v588_v14  ;;  %v635_v3 = vld [vmem:[%s8392_s26 + $0xa30] sm:$0xff]  ;;  %v632_v4 = vld [vmem:[%s8392_s26 + $0xa18] sm:$0xff] }
 0x24c   : > { %v636_v5 = vld [vmem:[%s8392_s26 + $0xa38] sm:$0xff] }
 0x24d   : > { %5560 = vmatpush1.bf16.msra.mxu0 %v7182_v23  ;;  %5806 = vmatpush1.bf16.msra.mxu1 %v7184_v25  ;;  %v592_v23 = vld [vmem:[%s8392_s26 + $0x8d8] sm:$0xff] }
 0x24e   : > { %5561 = vmatprep.subr.bf16.mxu0 %v7191_v26  ;;  %5807 = vmatprep.subr.bf16.mxu1 %v7193_v27  ;;  %v596_v25 = vld [vmem:[%s8392_s26 + $0x8f8] sm:$0xff]  ;;  %v7240_v26 = vcombine.low %v584_v13, %v588_v14  ;;  %v7247_v27 = vcombine.high %v591_v21, %v595_v22 }
 0x24f   : > { %v7249_v28 = vcombine.high %v592_v23, %v596_v25  ;;  %v640_v13 = vld [vmem:[%s8392_s26 + $0xa58] sm:$0xff] }
 0x250   : > { %v644_v14 = vld [vmem:[%s8392_s26 + $0xa78] sm:$0xff] }
 0x251   : > { %5562 = vmatpush1.bf16.msra.mxu0 %v7190_v0  ;;  %5808 = vmatpush1.bf16.msra.mxu1 %v7192_v34  ;;  %v604_v0 = vld [vmem:[%s8392_s26 + $0x938] sm:$0xff]  ;;  %v7246_v34 = vcombine.low %v591_v21, %v595_v22  ;;  %v647_v21 = vld [vmem:[%s8392_s26 + $0xa90] sm:$0xff] }
 0x252   : > { %5563 = vmatprep.subr.bf16.mxu0 %v7199_v35  ;;  %5809 = vmatprep.subr.bf16.mxu1 %v7201_v36  ;;  %v7255_v35 = vcombine.high %v599_v60, %v603_v31  ;;  %v7257_v36 = vcombine.high %v600_v32, %v604_v0  ;;  %v651_v22 = vld [vmem:[%s8392_s26 + $0xab0] sm:$0xff] }
 0x255   : > { %5564 = vmatpush1.bf16.msra.mxu0 %v7198_v42  ;;  %5810 = vmatpush1.bf16.msra.mxu1 %v7200_v43  ;;  %v7254_v42 = vcombine.low %v599_v60, %v603_v31  ;;  %v7256_v43 = vcombine.low %v600_v32, %v604_v0  ;;  %v655_v60 = vld [vmem:[%s8392_s26 + $0xad0] sm:$0xff]  ;;  %v656_v32 = vld [vmem:[%s8392_s26 + $0xad8] sm:$0xff] }
 0x256   : > { %5565 = vmatprep.subr.bf16.mxu0 %v7207_v44  ;;  %5811 = vmatprep.subr.bf16.mxu1 %v7209_v46  ;;  %v7263_v44 = vcombine.high %v607_v37, %v611_v38  ;;  %v7265_v46 = vcombine.high %v608_v40, %v612_v41  ;;  %v659_v31 = vld [vmem:[%s8392_s26 + $0xaf0] sm:$0xff]  ;;  %v660_v0 = vld [vmem:[%s8392_s26 + $0xaf8] sm:$0xff] }
 0x259   : > { %5566 = vmatpush1.bf16.msra.mxu0 %v7206_v52  ;;  %5812 = vmatpush1.bf16.msra.mxu1 %v7208_v53  ;;  %v7262_v52 = vcombine.low %v607_v37, %v611_v38  ;;  %v7264_v53 = vcombine.low %v608_v40, %v612_v41  ;;  %v663_v37 = vld [vmem:[%s8392_s26 + $0xb10] sm:$0xff]  ;;  %v664_v40 = vld [vmem:[%s8392_s26 + $0xb18] sm:$0xff] }
 0x25a   : > { %5567 = vmatprep.subr.bf16.mxu0 %v7215_v55  ;;  %5813 = vmatprep.subr.bf16.mxu1 %v7217_v56  ;;  %v7271_v55 = vcombine.high %v615_v47, %v619_v10  ;;  %v7273_v56 = vcombine.high %v616_v50, %v620_v51  ;;  %v667_v38 = vld [vmem:[%s8392_s26 + $0xb30] sm:$0xff]  ;;  %v668_v41 = vld [vmem:[%s8392_s26 + $0xb38] sm:$0xff] }
 0x25d   : > { %5568 = vmatpush1.bf16.msra.mxu0 %v7214_v62  ;;  %5814 = vmatpush1.bf16.msra.mxu1 %v7216_v63  ;;  %v7270_v62 = vcombine.low %v615_v47, %v619_v10  ;;  %v7272_v63 = vcombine.low %v616_v50, %v620_v51  ;;  %v671_v47 = vld [vmem:[%s8392_s26 + $0xb50] sm:$0xff]  ;;  %v672_v50 = vld [vmem:[%s8392_s26 + $0xb58] sm:$0xff] }
 0x25e   : > { %5578 = vmatprep.subr.bf16.mxu0 %v7223_v1  ;;  %5824 = vmatprep.subr.bf16.mxu1 %v7225_v2  ;;  %v7279_v1 = vcombine.high %v623_v57, %v627_v58  ;;  %v7281_v2 = vcombine.high %v624_v54, %v628_v11  ;;  %v675_v10 = vld [vmem:[%s8392_s26 + $0xb70] sm:$0xff]  ;;  %v676_v51 = vld [vmem:[%s8392_s26 + $0xb78] sm:$0xff] }
 0x260   : > { %5570 = vmatmul.mubr.bf16.vlgmr.msra.gmra.mrb[4].mxu0 %v8583_v39  ;;  %5816 = vmatmul.mubr.bf16.vlgmr.msra.gmra.mrb[4].mxu1 %v8583_v39  ;;  %v7238_v39 = vcombine.low %v583_v12, %v587_v33  ;;  %v639_v12 = vld [vmem:[%s8392_s26 + $0xa50] sm:$0xff] }
 0x261   : > { %5579 = vmatpush1.bf16.msra.mxu0 %v7222_v30  ;;  %5825 = vmatpush1.bf16.msra.mxu1 %v7224_v7  ;;  %v7278_v30 = vcombine.low %v623_v57, %v627_v58  ;;  %v7280_v7 = vcombine.low %v624_v54, %v628_v11  ;;  %v643_v33 = vld [vmem:[%s8392_s26 + $0xa70] sm:$0xff]  ;;  %v680_v54 = vld [vmem:[%s8392_s26 + $0xb98] sm:$0xff] }
 0x262   : > { %5580 = vmatprep.subr.bf16.mxu0 %v7231_v8  ;;  %5826 = vmatprep.subr.bf16.mxu1 %v7233_v9  ;;  %v7287_v8 = vcombine.high %v631_v24, %v635_v3  ;;  %v7289_v9 = vcombine.high %v632_v4, %v636_v5  ;;  %v679_v57 = vld [vmem:[%s8392_s26 + $0xb90] sm:$0xff]  ;;  %v684_v11 = vld [vmem:[%s8392_s26 + $0xbb8] sm:$0xff] }
 0x263   : > { %5610 = vmatprep.mubr.bf16.mxu0 %v8590_v49  ;;  %5856 = vmatprep.mubr.bf16.mxu1 %v8590_v49  ;;  %v7248_v49 = vcombine.low %v592_v23, %v596_v25  ;;  %v648_v23 = vld [vmem:[%s8392_s26 + $0xa98] sm:$0xff]  ;;  %v683_v58 = vld [vmem:[%s8392_s26 + $0xbb0] sm:$0xff] }
 0x264   : > { %v652_v25 = vld [vmem:[%s8392_s26 + $0xab8] sm:$0xff] }
 0x265   : > { %5581 = vmatpush1.bf16.msra.mxu0 %v7230_v16  ;;  %5827 = vmatpush1.bf16.msra.mxu1 %v7232_v17  ;;  %v7286_v16 = vcombine.low %v631_v24, %v635_v3  ;;  %v7288_v17 = vcombine.low %v632_v4, %v636_v5  ;;  %v687_v24 = vld [vmem:[%s8392_s26 + $0xbd0] sm:$0xff]  ;;  %v688_v4 = vld [vmem:[%s8392_s26 + $0xbd8] sm:$0xff] }
 0x266   : > { %5582 = vmatprep.subr.bf16.mxu0 %v7239_v18  ;;  %5828 = vmatprep.subr.bf16.mxu1 %v7241_v20  ;;  %v7295_v18 = vcombine.high %v639_v12, %v643_v33  ;;  %v7297_v20 = vcombine.high %v640_v13, %v644_v14  ;;  %v691_v3 = vld [vmem:[%s8392_s26 + $0xbf0] sm:$0xff]  ;;  %v692_v5 = vld [vmem:[%s8392_s26 + $0xbf8] sm:$0xff] }
 0x269   : > { %5583 = vmatpush1.bf16.msra.mxu0 %v7238_v39  ;;  %5829 = vmatpush1.bf16.msra.mxu1 %v7240_v26  ;;  %v7294_v39 = vcombine.low %v639_v12, %v643_v33  ;;  %v7296_v26 = vcombine.low %v640_v13, %v644_v14  ;;  %v695_v12 = vld [vmem:[%s8392_s26 + $0xc10] sm:$0xff]  ;;  %v696_v13 = vld [vmem:[%s8392_s26 + $0xc18] sm:$0xff] }
 0x26a   : > { %5584 = vmatprep.subr.bf16.mxu0 %v7247_v27  ;;  %5830 = vmatprep.subr.bf16.mxu1 %v7249_v28  ;;  %v7303_v27 = vcombine.high %v647_v21, %v651_v22  ;;  %v7305_v28 = vcombine.high %v648_v23, %v652_v25  ;;  %v699_v33 = vld [vmem:[%s8392_s26 + $0xc30] sm:$0xff]  ;;  %v700_v14 = vld [vmem:[%s8392_s26 + $0xc38] sm:$0xff] }
 0x26d   : > { %5585 = vmatpush1.bf16.msra.mxu0 %v7246_v34  ;;  %5831 = vmatpush1.bf16.msra.mxu1 %v7248_v49  ;;  %v7302_v34 = vcombine.low %v647_v21, %v651_v22  ;;  %v7304_v49 = vcombine.low %v648_v23, %v652_v25  ;;  %v703_v21 = vld [vmem:[%s8392_s26 + $0xc50] sm:$0xff]  ;;  %v704_v23 = vld [vmem:[%s8392_s26 + $0xc58] sm:$0xff] }
 0x26e   : > { %5586 = vmatprep.subr.bf16.mxu0 %v7255_v35  ;;  %5832 = vmatprep.subr.bf16.mxu1 %v7257_v36  ;;  %v7311_v35 = vcombine.high %v655_v60, %v659_v31  ;;  %v7313_v36 = vcombine.high %v656_v32, %v660_v0  ;;  %v707_v22 = vld [vmem:[%s8392_s26 + $0xc70] sm:$0xff]  ;;  %v708_v25 = vld [vmem:[%s8392_s26 + $0xc78] sm:$0xff] }
 0x271   : > { %5587 = vmatpush1.bf16.msra.mxu0 %v7254_v42  ;;  %5833 = vmatpush1.bf16.msra.mxu1 %v7256_v43  ;;  %v7310_v42 = vcombine.low %v655_v60, %v659_v31  ;;  %v7312_v43 = vcombine.low %v656_v32, %v660_v0  ;;  %v711_v60 = vld [vmem:[%s8392_s26 + $0xc90] sm:$0xff]  ;;  %v712_v32 = vld [vmem:[%s8392_s26 + $0xc98] sm:$0xff] }
 0x272   : > { %5588 = vmatprep.subr.bf16.mxu0 %v7263_v44  ;;  %5834 = vmatprep.subr.bf16.mxu1 %v7265_v46  ;;  %v7319_v44 = vcombine.high %v663_v37, %v667_v38  ;;  %v7321_v46 = vcombine.high %v664_v40, %v668_v41  ;;  %v715_v31 = vld [vmem:[%s8392_s26 + $0xcb0] sm:$0xff]  ;;  %v716_v0 = vld [vmem:[%s8392_s26 + $0xcb8] sm:$0xff] }
 0x275   : > { %5589 = vmatpush1.bf16.msra.mxu0 %v7262_v52  ;;  %5835 = vmatpush1.bf16.msra.mxu1 %v7264_v53  ;;  %v7318_v52 = vcombine.low %v663_v37, %v667_v38  ;;  %v7320_v53 = vcombine.low %v664_v40, %v668_v41  ;;  %v719_v37 = vld [vmem:[%s8392_s26 + $0xcd0] sm:$0xff]  ;;  %v720_v40 = vld [vmem:[%s8392_s26 + $0xcd8] sm:$0xff] }
 0x276   : > { %5590 = vmatprep.subr.bf16.mxu0 %v7271_v55  ;;  %5836 = vmatprep.subr.bf16.mxu1 %v7273_v56  ;;  %v7327_v55 = vcombine.high %v671_v47, %v675_v10  ;;  %v7329_v56 = vcombine.high %v672_v50, %v676_v51  ;;  %v723_v38 = vld [vmem:[%s8392_s26 + $0xcf0] sm:$0xff]  ;;  %v724_v41 = vld [vmem:[%s8392_s26 + $0xcf8] sm:$0xff] }
 0x279   : > { %5591 = vmatpush1.bf16.msra.mxu0 %v7270_v62  ;;  %5837 = vmatpush1.bf16.msra.mxu1 %v7272_v63  ;;  %v7326_v62 = vcombine.low %v671_v47, %v675_v10  ;;  %v7328_v63 = vcombine.low %v672_v50, %v676_v51  ;;  %v731_v47 = vld [vmem:[%s8392_s26 + $0xd30] sm:$0xff]  ;;  %v728_v10 = vld [vmem:[%s8392_s26 + $0xd18] sm:$0xff]  ;;  %v7374_v51 = vcombine.low %v719_v37, %v723_v38 }
 0x27a   : > { %5592 = vmatprep.subr.bf16.mxu0 %v7279_v1  ;;  %5838 = vmatprep.subr.bf16.mxu1 %v7281_v2  ;;  %v7335_v1 = vcombine.high %v679_v57, %v683_v58  ;;  %v7337_v2 = vcombine.high %v680_v54, %v684_v11  ;;  %v732_v50 = vld [vmem:[%s8392_s26 + $0xd38] sm:$0xff] }
 0x27d   : > { %5593 = vmatpush1.bf16.msra.mxu0 %v7278_v30  ;;  %5839 = vmatpush1.bf16.msra.mxu1 %v7280_v7  ;;  %v7334_v30 = vcombine.low %v679_v57, %v683_v58  ;;  %v7336_v7 = vcombine.low %v680_v54, %v684_v11  ;;  %v735_v57 = vld [vmem:[%s8392_s26 + $0xd50] sm:$0xff]  ;;  %v736_v54 = vld [vmem:[%s8392_s26 + $0xd58] sm:$0xff] }
 0x27e   : > { %5594 = vmatprep.subr.bf16.mxu0 %v7287_v8  ;;  %5840 = vmatprep.subr.bf16.mxu1 %v7289_v9  ;;  %v7343_v8 = vcombine.high %v687_v24, %v691_v3  ;;  %v7345_v9 = vcombine.high %v688_v4, %v692_v5  ;;  %v739_v58 = vld [vmem:[%s8392_s26 + $0xd70] sm:$0xff]  ;;  %v740_v11 = vld [vmem:[%s8392_s26 + $0xd78] sm:$0xff] }
 0x281   : > { %5595 = vmatpush1.bf16.msra.mxu0 %v7286_v16  ;;  %5841 = vmatpush1.bf16.msra.mxu1 %v7288_v17  ;;  %v7342_v16 = vcombine.low %v687_v24, %v691_v3  ;;  %v7344_v17 = vcombine.low %v688_v4, %v692_v5  ;;  %v7393_v24 = vcombine.high %v736_v54, %v740_v11  ;;  %v743_v3 = vld [vmem:[%s8392_s26 + $0xd90] sm:$0xff]  ;;  %v744_v5 = vld [vmem:[%s8392_s26 + $0xd98] sm:$0xff] }
 0x282   : > { %5596 = vmatprep.subr.bf16.mxu0 %v7295_v18  ;;  %5842 = vmatprep.subr.bf16.mxu1 %v7297_v20  ;;  %v7351_v18 = vcombine.high %v695_v12, %v699_v33  ;;  %v7353_v20 = vcombine.high %v696_v13, %v700_v14  ;;  %v747_v4 = vld [vmem:[%s8392_s26 + $0xdb0] sm:$0xff] }
 0x285   : > { %5597 = vmatpush1.bf16.msra.mxu0 %v7294_v39  ;;  %5843 = vmatpush1.bf16.msra.mxu1 %v7296_v26  ;;  %v7350_v39 = vcombine.low %v695_v12, %v699_v33  ;;  %v7352_v26 = vcombine.low %v696_v13, %v700_v14  ;;  %v751_v14 = vld [vmem:[%s8392_s26 + $0xdd0] sm:$0xff] }
 0x286   : > { %5598 = vmatprep.subr.bf16.mxu0 %v7303_v27  ;;  %5844 = vmatprep.subr.bf16.mxu1 %v7305_v28  ;;  %v7359_v27 = vcombine.high %v703_v21, %v707_v22  ;;  %v7361_v28 = vcombine.high %v704_v23, %v708_v25 }
 0x289   : > { %5599 = vmatpush1.bf16.msra.mxu0 %v7302_v34  ;;  %5845 = vmatpush1.bf16.msra.mxu1 %v7304_v49  ;;  %v7358_v34 = vcombine.low %v703_v21, %v707_v22  ;;  %v7360_v49 = vcombine.low %v704_v23, %v708_v25  ;;  %v756_v21 = vld [vmem:[%s8392_s26 + $0xdf8] sm:$0xff] }
 0x28a   : > { %5600 = vmatprep.subr.bf16.mxu0 %v7311_v35  ;;  %5846 = vmatprep.subr.bf16.mxu1 %v7313_v36  ;;  %v7367_v35 = vcombine.high %v711_v60, %v715_v31  ;;  %v7369_v36 = vcombine.high %v712_v32, %v716_v0 }
 0x28d   : > { %5601 = vmatpush1.bf16.msra.mxu0 %v7310_v42  ;;  %5847 = vmatpush1.bf16.msra.mxu1 %v7312_v43  ;;  %v7368_v42 = vcombine.low %v712_v32, %v716_v0  ;;  %v7375_v43 = vcombine.high %v719_v37, %v723_v38  ;;  %v760_v37 = vld [vmem:[%s8392_s26 + $0xe18] sm:$0xff] }
 0x28e   : > { %5602 = vmatprep.subr.bf16.mxu0 %v7319_v44  ;;  %5848 = vmatprep.subr.bf16.mxu1 %v7321_v46  ;;  %v7377_v44 = vcombine.high %v720_v40, %v724_v41  ;;  %v727_v46 = vld [vmem:[%s8392_s26 + $0xd10] sm:$0xff]  ;;  %v764_v38 = vld [vmem:[%s8392_s26 + $0xe38] sm:$0xff] }
 0x291   : > { %5603 = vmatpush1.bf16.msra.mxu0 %v7318_v52  ;;  %5849 = vmatpush1.bf16.msra.mxu1 %v7320_v53  ;;  %v7383_v52 = vcombine.high %v727_v46, %v731_v47  ;;  %v7385_v53 = vcombine.high %v728_v10, %v732_v50 }
 0x292   : > { %5604 = vmatprep.subr.bf16.mxu0 %v7327_v55  ;;  %5850 = vmatprep.subr.bf16.mxu1 %v7329_v56  ;;  %v8227_v55 = vmov 1983009808  }
 0x293   : > { %v5999_v56 = vunpack.c.l.s4 %v8227_v55 }
 0x295   : > { %5605 = vmatpush1.bf16.msra.mxu0 %v7326_v62  ;;  %5851 = vmatpush1.bf16.msra.mxu1 %v7328_v63  ;;  %v7382_v62 = vcombine.low %v727_v46, %v731_v47  ;;  %v7384_v63 = vcombine.low %v728_v10, %v732_v50  ;;  %v767_v46 = vld [vmem:[%s8392_s26 + $0xe50] sm:$0xff]  ;;  %v768_v50 = vld [vmem:[%s8392_s26 + $0xe58] sm:$0xff] }
 0x296   : > { %5606 = vmatprep.subr.bf16.mxu0 %v7335_v1  ;;  %5852 = vmatprep.subr.bf16.mxu1 %v7337_v2  ;;  %v7391_v1 = vcombine.high %v735_v57, %v739_v58  ;;  %v6000_v2 = vunpack.c.0.s8 %v5999_v56  ;;  %v771_v47 = vld [vmem:[%s8392_s26 + $0xe70] sm:$0xff] }
 0x297   : > { %v775_v56 = vld [vmem:[%s8392_s26 + $0xe90] sm:$0xff] }
 0x298   : > { %v9123_v33 = vsub.s32 %v6000_v2, %v8431_v45  ;;  %v783_v2 = vld [vmem:[%s8392_s26 + $0xed0] sm:$0xff] }
 0x299   : > { %5607 = vmatpush1.bf16.msra.mxu0 %v7334_v30  ;;  %5853 = vmatpush1.bf16.msra.mxu1 %v7336_v7  ;;  %v748_v30 = vld [vmem:[%s8392_s26 + $0xdb8] sm:$0xff]  ;;  %v7390_v7 = vcombine.low %v735_v57, %v739_v58  ;;  %v779_v57 = vld [vmem:[%s8392_s26 + $0xeb0] sm:$0xff] }
 0x29a   : > { %5608 = vmatprep.subr.bf16.mxu0 %v7343_v8  ;;  %5854 = vmatprep.subr.bf16.mxu1 %v7345_v9  ;;  %v7392_v8 = vcombine.low %v736_v54, %v740_v11  ;;  %v7399_v9 = vcombine.high %v743_v3, %v747_v4  ;;  %v7401_v13 = vcombine.high %v744_v5, %v748_v30  ;;  %v776_v58 = vld [vmem:[%s8392_s26 + $0xe98] sm:$0xff] }
 0x29b   : > { %v780_v54 = vld [vmem:[%s8392_s26 + $0xeb8] sm:$0xff]  ;;  %v7422_v11 = vcombine.low %v767_v46, %v771_v47 }
 0x29d   : > { %5609 = vmatpush1.bf16.msra.mxu0 %v7342_v16  ;;  %5855 = vmatpush1.bf16.msra.mxu1 %v7344_v17  ;;  %v755_v16 = vld [vmem:[%s8392_s26 + $0xdf0] sm:$0xff] }
 0x29e   : > { %5619 = vmatprep.subr.bf16.mxu0 %v7351_v18  ;;  %5865 = vmatprep.subr.bf16.mxu1 %v7353_v20  ;;  %v752_v20 = vld [vmem:[%s8392_s26 + $0xdd8] sm:$0xff] }
 0x2a0   : > { %5611 = vmatmul.mubr.bf16.vlgmr.msra.gmra.mrb[4].mxu0 %v8658_v59  ;;  %5857 = vmatmul.mubr.bf16.vlgmr.msra.gmra.mrb[4].mxu1 %v8658_v59  ;;  %v7366_v59 = vcombine.low %v711_v60, %v715_v31  ;;  %v7400_v60 = vcombine.low %v744_v5, %v748_v30  ;;  %v7407_v31 = vcombine.high %v751_v14, %v755_v16 }
 0x2a1   : > { %5620 = vmatpush1.bf16.msra.mxu0 %v7350_v39  ;;  %5866 = vmatpush1.bf16.msra.mxu1 %v7352_v26  ;;  %v7398_v39 = vcombine.low %v743_v3, %v747_v4  ;;  %v784_v3 = vld [vmem:[%s8392_s26 + $0xed8] sm:$0xff]  ;;  %v7430_v5 = vcombine.low %v775_v56, %v779_v57  ;;  %v7432_v30 = vcombine.low %v776_v58, %v780_v54 }
 0x2a2   : > { %5621 = vmatprep.subr.bf16.mxu0 %v7359_v27  ;;  %5867 = vmatprep.subr.bf16.mxu1 %v7361_v28  ;;  %v788_v4 = vld [vmem:[%s8392_s26 + $0xef8] sm:$0xff] }
 0x2a3   : > { %5651 = vmatprep.mubr.bf16.mxu0 %v8666_v6  ;;  %5897 = vmatprep.mubr.bf16.mxu1 %v8666_v6  ;;  %v7376_v6 = vcombine.low %v720_v40, %v724_v41  ;;  %v305_v40 = vld [vmem:[#allocation2] sm:$0xff]  ;;  %v7406_v41 = vcombine.low %v751_v14, %v755_v16  ;;  %v796_v14 = vld [vmem:[%s8392_s26 + $0xf38] sm:$0xff] }
 0x2a5   : > { %5622 = vmatpush1.bf16.msra.mxu0 %v7358_v34  ;;  %5868 = vmatpush1.bf16.msra.mxu1 %v7360_v49  ;;  %v7409_v34 = vcombine.high %v752_v20, %v756_v21  ;;  %v759_v49 = vld [vmem:[%s8392_s26 + $0xe10] sm:$0xff] }
 0x2a6   : > { %5623 = vmatprep.subr.bf16.mxu0 %v7367_v35  ;;  %5869 = vmatprep.subr.bf16.mxu1 %v7369_v36  ;;  %v763_v35 = vld [vmem:[%s8392_s26 + $0xe30] sm:$0xff] }
 0x2a9   : > { %5624 = vmatpush1.bf16.msra.mxu0 %v7366_v59  ;;  %5870 = vmatpush1.bf16.msra.mxu1 %v7368_v42  ;;  %v7408_v42 = vcombine.low %v752_v20, %v756_v21  ;;  %v799_v21 = vld [vmem:[%s8392_s26 + $0xf50] sm:$0xff] }
 0x2aa   : > { %5625 = vmatprep.subr.bf16.mxu0 %v7375_v43  ;;  %5871 = vmatprep.subr.bf16.mxu1 %v7377_v44  ;;  %v7415_v43 = vcombine.high %v759_v49, %v763_v35  ;;  %v7417_v44 = vcombine.high %v760_v37, %v764_v38 }
 0x2ad   : > { %5626 = vmatpush1.bf16.msra.mxu0 %v7374_v51  ;;  %5872 = vmatpush1.bf16.msra.mxu1 %v7376_v6  ;;  %v772_v51 = vld [vmem:[%s8392_s26 + $0xe78] sm:$0xff]  ;;  %v7414_v6 = vcombine.low %v759_v49, %v763_v35 }
 0x2ae   : > { %5627 = vmatprep.subr.bf16.mxu0 %v7383_v52  ;;  %5873 = vmatprep.subr.bf16.mxu1 %v7385_v53  ;;  %v7416_v52 = vcombine.low %v760_v37, %v764_v38  ;;  %v7423_v53 = vcombine.high %v767_v46, %v771_v47  ;;  %v7425_v55 = vcombine.high %v768_v50, %v772_v51  ;;  %v815_v37 = vld [vmem:[%s8392_s26 + $0xfd0] sm:$0xff] }
 0x2af   : > { %v819_v38 = vld [vmem:[%s8392_s26 + $0xff0] sm:$0xff] }
 0x2b0   : > { %v823_v46 = vld [vmem:[%s8392_s26 + $0x1010] sm:$0xff] }
 0x2b1   : > { %5628 = vmatpush1.bf16.msra.mxu0 %v7382_v62  ;;  %5874 = vmatpush1.bf16.msra.mxu1 %v7384_v63  ;;  %v7424_v62 = vcombine.low %v768_v50, %v772_v51  ;;  %v7431_v63 = vcombine.high %v775_v56, %v779_v57  ;;  %v827_v47 = vld [vmem:[%s8392_s26 + $0x1030] sm:$0xff]  ;;  %v828_v50 = vld [vmem:[%s8392_s26 + $0x1038] sm:$0xff]  ;;  %v7470_v51 = vcombine.low %v815_v37, %v819_v38 }
 0x2b2   : > { %5629 = vmatprep.subr.bf16.mxu0 %v7391_v1  ;;  %5875 = vmatprep.subr.bf16.mxu1 %v7393_v24  ;;  %v7433_v1 = vcombine.high %v776_v58, %v780_v54  ;;  %v787_v24 = vld [vmem:[%s8392_s26 + $0xef0] sm:$0xff]  ;;  %v832_v57 = vld [vmem:[%s8392_s26 + $0x1058] sm:$0xff]  ;;  %v7478_v54 = vcombine.low %v823_v46, %v827_v47 }
 0x2b3   : > { %v5243_v12 = vpop.f32.mrb[0].mxu0  ;;  %v5489_v17 = vpop.f32.mrb[0].mxu1  ;;  %v7438_v16 = vcombine.low %v783_v2, %v787_v24  ;;  %v835_v56 = vld [vmem:[%s8392_s26 + $0x1070] sm:$0xff]  ;;  %v836_v58 = vld [vmem:[%s8392_s26 + $0x1078] sm:$0xff] }
 0x2b4   : > { %v5245_v18 = vpop.f32.mrb[1].mxu0  ;;  %v5491_v23 = vpop.f32.mrb[1].mxu1 }
 0x2b5   : > { %v5996_v22 = vcombine.low %v5243_v12, %v5245_v18  ;;  %v5247_v25 = vpop.f32.mrb[2].mxu0  ;;  %5630 = vmatpush1.bf16.msra.mxu0 %v7390_v7  ;;  %v5997_v26 = vcombine.low %v5489_v17, %v5491_v23  ;;  %v5493_v27 = vpop.f32.mrb[2].mxu1  ;;  %5876 = vmatpush1.bf16.msra.mxu1 %v7392_v8  ;;  %v7439_v7 = vcombine.high %v783_v2, %v787_v24  ;;  %v795_v12 = vld [vmem:[%s8392_s26 + $0xf30] sm:$0xff]  ;;  %v800_v23 = vld [vmem:[%s8392_s26 + $0xf58] sm:$0xff] }
 0x2b6   : > { %v5248_v28 = vpop.f32.mrb[3].mxu0  ;;  %5631 = vmatprep.subr.bf16.mxu0 %v7399_v9  ;;  %v5494_v0 = vpop.f32.mrb[3].mxu1  ;;  %5877 = vmatprep.subr.bf16.mxu1 %v7401_v13  ;;  %v7441_v8 = vcombine.high %v784_v3, %v788_v4  ;;  %v791_v9 = vld [vmem:[%s8392_s26 + $0xf10] sm:$0xff]  ;;  %v792_v13 = vld [vmem:[%s8392_s26 + $0xf18] sm:$0xff]  ;;  %v7440_v17 = vcombine.low %v784_v3, %v788_v4 }
 0x2b7   : > { %v6004_v32 = vrot.slane %v5996_v22, %v9123_v33  ;;  %v6011_v36 = vrot.slane %v5997_v26, %v9123_v33  ;;  %v7447_v18 = vcombine.high %v791_v9, %v795_v12  ;;  %v7449_v20 = vcombine.high %v792_v13, %v796_v14  ;;  %v803_v22 = vld [vmem:[%s8392_s26 + $0xf70] sm:$0xff]  ;;  %v804_v25 = vld [vmem:[%s8392_s26 + $0xf78] sm:$0xff] }
 0x2b8   : > { %v7448_v26 = vcombine.low %v792_v13, %v796_v14  ;;  %v7455_v27 = vcombine.high %v799_v21, %v803_v22  ;;  %v7457_v28 = vcombine.high %v800_v23, %v804_v25  ;;  %v812_v0 = vld [vmem:[%s8392_s26 + $0xfb8] sm:$0xff]  ;;  %v7456_v49 = vcombine.low %v800_v23, %v804_v25  ;;  %v843_v2 = vld [vmem:[%s8392_s26 + $0x10b0] sm:$0xff] }
 0x2b9   : > { %5632 = vmatpush1.bf16.msra.mxu0 %v7398_v39  ;;  %v6012_v59 = vcombine.low %v6004_v32, %v6011_v36  ;;  %5878 = vmatpush1.bf16.msra.mxu1 %v7400_v60  ;;  %v7446_v39 = vcombine.low %v791_v9, %v795_v12  ;;  %v807_v60 = vld [vmem:[%s8392_s26 + $0xf90] sm:$0xff]  ;;  %v808_v32 = vld [vmem:[%s8392_s26 + $0xf98] sm:$0xff] }
 0x2ba   : > { %5633 = vmatprep.subr.bf16.mxu0 %v7407_v31  ;;  %5879 = vmatprep.subr.bf16.mxu1 %v7409_v34  ;;  %v811_v31 = vld [vmem:[%s8392_s26 + $0xfb0] sm:$0xff]  ;;  %v7454_v34 = vcombine.low %v799_v21, %v803_v22  ;;  %v7465_v36 = vcombine.high %v808_v32, %v812_v0  ;;  %v840_v24 = vld [vmem:[%s8392_s26 + $0x1098] sm:$0xff] }
 0x2bb   : > { %v6032_v10 = vadd.f32 %v6012_v59, %v305_v40  ;;  %v7463_v35 = vcombine.high %v807_v60, %v811_v31  ;;  %v816_v40 = vld [vmem:[%s8392_s26 + $0xfd8] sm:$0xff]  ;;  %v7462_v59 = vcombine.low %v807_v60, %v811_v31  ;;  %v851_v9 = vld [vmem:[%s8392_s26 + $0x10f0] sm:$0xff] }
 0x2bc   : > { %v844_v3 = vld [vmem:[%s8392_s26 + $0x10b8] sm:$0xff] }
 0x2bd   : > { %5634 = vmatpush1.bf16.msra.mxu0 %v7406_v41  ;;  %6034 = vst [vmem:[#allocation2] sm:$0xff] %v6032_v10  ;;  %5880 = vmatpush1.bf16.msra.mxu1 %v7408_v42  ;;  %v820_v41 = vld [vmem:[%s8392_s26 + $0xff8] sm:$0xff]  ;;  %v7464_v42 = vcombine.low %v808_v32, %v812_v0  ;;  %v7496_v14 = vcombine.low %v840_v24, %v844_v3 }
 0x2be   : > { %5635 = vmatprep.subr.bf16.mxu0 %v7415_v43  ;;  %5881 = vmatprep.subr.bf16.mxu1 %v7417_v44  ;;  %v7471_v43 = vcombine.high %v815_v37, %v819_v38  ;;  %v7473_v44 = vcombine.high %v816_v40, %v820_v41  ;;  %v824_v10 = vld [vmem:[%s8392_s26 + $0x1018] sm:$0xff] }
 0x2bf   : > { %v848_v12 = vld [vmem:[%s8392_s26 + $0x10d8] sm:$0xff] }
 0x2c0   : > { %v852_v13 = vld [vmem:[%s8392_s26 + $0x10f8] sm:$0xff] }
 0x2c1   : > { %5636 = vmatpush1.bf16.msra.mxu0 %v7414_v6  ;;  %5882 = vmatpush1.bf16.msra.mxu1 %v7416_v52  ;;  %v7472_v6 = vcombine.low %v816_v40, %v820_v41  ;;  %v7479_v52 = vcombine.high %v823_v46, %v827_v47  ;;  %v856_v21 = vld [vmem:[%s8392_s26 + $0x1118] sm:$0xff] }
 0x2c2   : > { %5637 = vmatprep.subr.bf16.mxu0 %v7423_v53  ;;  %5883 = vmatprep.subr.bf16.mxu1 %v7425_v55  ;;  %v7481_v53 = vcombine.high %v824_v10, %v828_v50  ;;  %v831_v55 = vld [vmem:[%s8392_s26 + $0x1050] sm:$0xff]  ;;  %v860_v22 = vld [vmem:[%s8392_s26 + $0x1138] sm:$0xff] }
 0x2c3   : > { %v7486_v4 = vcombine.low %v831_v55, %v835_v56  ;;  %v868_v60 = vld [vmem:[%s8392_s26 + $0x1178] sm:$0xff]  ;;  %v7512_v32 = vcombine.low %v856_v21, %v860_v22 }
 0x2c4   : > { %v876_v37 = vld [vmem:[%s8392_s26 + $0x11b8] sm:$0xff] }
 0x2c5   : > { %5638 = vmatpush1.bf16.msra.mxu0 %v7422_v11  ;;  %5884 = vmatpush1.bf16.msra.mxu1 %v7424_v62  ;;  %v7480_v11 = vcombine.low %v824_v10, %v828_v50  ;;  %v7487_v62 = vcombine.high %v831_v55, %v835_v56  ;;  %v884_v46 = vld [vmem:[%s8392_s26 + $0x11f8] sm:$0xff] }
 0x2c6   : > { %5639 = vmatprep.subr.bf16.mxu0 %v7431_v63  ;;  %5885 = vmatprep.subr.bf16.mxu1 %v7433_v1  ;;  %v7489_v63 = vcombine.high %v832_v57, %v836_v58  ;;  %v839_v1 = vld [vmem:[%s8392_s26 + $0x1090] sm:$0xff]  ;;  %v892_v55 = vld [vmem:[%s8392_s26 + $0x1238] sm:$0xff] }
 0x2c9   : > { %5640 = vmatpush1.bf16.msra.mxu0 %v7430_v5  ;;  %5886 = vmatpush1.bf16.msra.mxu1 %v7432_v30  ;;  %v7488_v5 = vcombine.low %v832_v57, %v836_v58  ;;  %v7495_v30 = vcombine.high %v839_v1, %v843_v2 }
 0x2ca   : > { %5641 = vmatprep.subr.bf16.mxu0 %v7439_v7  ;;  %5887 = vmatprep.subr.bf16.mxu1 %v7441_v8  ;;  %v7497_v7 = vcombine.high %v840_v24, %v844_v3  ;;  %v847_v8 = vld [vmem:[%s8392_s26 + $0x10d0] sm:$0xff] }
 0x2cb   : > { %v7502_v23 = vcombine.low %v847_v8, %v851_v9 }
 0x2cd   : > { %5642 = vmatpush1.bf16.msra.mxu0 %v7438_v16  ;;  %5888 = vmatpush1.bf16.msra.mxu1 %v7440_v17  ;;  %v7503_v16 = vcombine.high %v847_v8, %v851_v9  ;;  %v7505_v17 = vcombine.high %v848_v12, %v852_v13  ;;  %v908_v8 = vld [vmem:[%s8392_s26 + $0x12b8] sm:$0xff] }
 0x2ce   : > { %5643 = vmatprep.subr.bf16.mxu0 %v7447_v18  ;;  %5889 = vmatprep.subr.bf16.mxu1 %v7449_v20  ;;  %v855_v18 = vld [vmem:[%s8392_s26 + $0x1110] sm:$0xff] }
 0x2cf   : > { %v859_v20 = vld [vmem:[%s8392_s26 + $0x1130] sm:$0xff] }
 0x2d0   : > { %v7511_v25 = vcombine.high %v855_v18, %v859_v20  ;;  %v7510_v31 = vcombine.low %v855_v18, %v859_v20  ;;  %v916_v18 = vld [vmem:[%s8392_s26 + $0x12f8] sm:$0xff] }
 0x2d1   : > { %5644 = vmatpush1.bf16.msra.mxu0 %v7446_v39  ;;  %5890 = vmatpush1.bf16.msra.mxu1 %v7448_v26  ;;  %v7513_v39 = vcombine.high %v856_v21, %v860_v22  ;;  %v863_v26 = vld [vmem:[%s8392_s26 + $0x1150] sm:$0xff] }
 0x2d2   : > { %5645 = vmatprep.subr.bf16.mxu0 %v7455_v27  ;;  %5891 = vmatprep.subr.bf16.mxu1 %v7457_v28  ;;  %v867_v27 = vld [vmem:[%s8392_s26 + $0x1170] sm:$0xff]  ;;  %v864_v28 = vld [vmem:[%s8392_s26 + $0x1158] sm:$0xff] }
 0x2d3   : > { %v7519_v0 = vcombine.high %v863_v26, %v867_v27  ;;  %v7518_v38 = vcombine.low %v863_v26, %v867_v27  ;;  %v7520_v40 = vcombine.low %v864_v28, %v868_v60  ;;  %v924_v26 = vld [vmem:[%s8392_s26 + $0x1338] sm:$0xff] }
 0x2d5   : > { %5646 = vmatpush1.bf16.msra.mxu0 %v7454_v34  ;;  %5892 = vmatpush1.bf16.msra.mxu1 %v7456_v49  ;;  %v7521_v34 = vcombine.high %v864_v28, %v868_v60  ;;  %v871_v49 = vld [vmem:[%s8392_s26 + $0x1190] sm:$0xff] }
 0x2d6   : > { %5647 = vmatprep.subr.bf16.mxu0 %v7463_v35  ;;  %5893 = vmatprep.subr.bf16.mxu1 %v7465_v36  ;;  %v875_v35 = vld [vmem:[%s8392_s26 + $0x11b0] sm:$0xff]  ;;  %v872_v36 = vld [vmem:[%s8392_s26 + $0x1198] sm:$0xff] }
 0x2d7   : > { %v7527_v41 = vcombine.high %v871_v49, %v875_v35  ;;  %v7526_v47 = vcombine.low %v871_v49, %v875_v35  ;;  %v7528_v10 = vcombine.low %v872_v36, %v876_v37  ;;  %v932_v49 = vld [vmem:[%s8392_s26 + $0x1378] sm:$0xff] }
 0x2d9   : > { %5648 = vmatpush1.bf16.msra.mxu0 %v7462_v59  ;;  %5894 = vmatpush1.bf16.msra.mxu1 %v7464_v42  ;;  %v7529_v59 = vcombine.high %v872_v36, %v876_v37  ;;  %v879_v42 = vld [vmem:[%s8392_s26 + $0x11d0] sm:$0xff] }
 0x2da   : > { %5649 = vmatprep.subr.bf16.mxu0 %v7471_v43  ;;  %5895 = vmatprep.subr.bf16.mxu1 %v7473_v44  ;;  %v883_v43 = vld [vmem:[%s8392_s26 + $0x11f0] sm:$0xff]  ;;  %v880_v44 = vld [vmem:[%s8392_s26 + $0x11d8] sm:$0xff] }
 0x2db   : > { %v7535_v50 = vcombine.high %v879_v42, %v883_v43  ;;  %v7534_v56 = vcombine.low %v879_v42, %v883_v43  ;;  %v7536_v57 = vcombine.low %v880_v44, %v884_v46  ;;  %v940_v42 = vld [vmem:[%s8392_s26 + $0x13b8] sm:$0xff] }
 0x2dd   : > { %5650 = vmatpush1.bf16.msra.mxu0 %v7470_v51  ;;  %5896 = vmatpush1.bf16.msra.mxu1 %v7472_v6  ;;  %v7537_v51 = vcombine.high %v880_v44, %v884_v46  ;;  %v887_v6 = vld [vmem:[%s8392_s26 + $0x1210] sm:$0xff] }
 0x2de   : > { %5660 = vmatprep.subr.bf16.mxu0 %v7479_v52  ;;  %5906 = vmatprep.subr.bf16.mxu1 %v7481_v53  ;;  %v891_v52 = vld [vmem:[%s8392_s26 + $0x1230] sm:$0xff]  ;;  %v888_v53 = vld [vmem:[%s8392_s26 + $0x1218] sm:$0xff] }
 0x2df   : > { %v7543_v58 = vcombine.high %v887_v6, %v891_v52  ;;  %v7544_v24 = vcombine.low %v888_v53, %v892_v55 }
 0x2e0   : > { %5652 = vmatmul.mubr.bf16.vlgmr.msra.gmra.mrb[4].mxu0 %v8739_v19  ;;  %5898 = vmatmul.mubr.bf16.vlgmr.msra.gmra.mrb[4].mxu1 %v8739_v19  ;;  %v7494_v19 = vcombine.low %v839_v1, %v843_v2  ;;  %v900_v1 = vld [vmem:[%s8392_s26 + $0x1278] sm:$0xff]  ;;  %v7542_v2 = vcombine.low %v887_v6, %v891_v52 }
 0x2e1   : > { %5661 = vmatpush1.bf16.msra.mxu0 %v7478_v54  ;;  %5907 = vmatpush1.bf16.msra.mxu1 %v7480_v11  ;;  %v7545_v54 = vcombine.high %v888_v53, %v892_v55  ;;  %v895_v11 = vld [vmem:[%s8392_s26 + $0x1250] sm:$0xff]  ;;  %v948_v6 = vld [vmem:[%s8392_s26 + $0x13f8] sm:$0xff] }
 0x2e2   : > { %5662 = vmatprep.subr.bf16.mxu0 %v7487_v62  ;;  %5908 = vmatprep.subr.bf16.mxu1 %v7489_v63  ;;  %v899_v62 = vld [vmem:[%s8392_s26 + $0x1270] sm:$0xff]  ;;  %v896_v63 = vld [vmem:[%s8392_s26 + $0x1258] sm:$0xff] }
 0x2e3   : > { %5692 = vmatprep.mubr.bf16.mxu0 %v8746_v29  ;;  %5938 = vmatprep.mubr.bf16.mxu1 %v8746_v29  ;;  %v7504_v29 = vcombine.low %v848_v12, %v852_v13  ;;  %v7551_v3 = vcombine.high %v895_v11, %v899_v62  ;;  %v7550_v9 = vcombine.low %v895_v11, %v899_v62  ;;  %v956_v11 = vld [vmem:[%s8392_s26 + $0x1438] sm:$0xff] }
 0x2e4   : > { %v7552_v12 = vcombine.low %v896_v63, %v900_v1 }
 0x2e5   : > { %5663 = vmatpush1.bf16.msra.mxu0 %v7486_v4  ;;  %5909 = vmatpush1.bf16.msra.mxu1 %v7488_v5  ;;  %v7553_v4 = vcombine.high %v896_v63, %v900_v1  ;;  %v903_v5 = vld [vmem:[%s8392_s26 + $0x1290] sm:$0xff] }
 0x2e6   : > { %5664 = vmatprep.subr.bf16.mxu0 %v7495_v30  ;;  %5910 = vmatprep.subr.bf16.mxu1 %v7497_v7  ;;  %v907_v30 = vld [vmem:[%s8392_s26 + $0x12b0] sm:$0xff]  ;;  %v904_v7 = vld [vmem:[%s8392_s26 + $0x1298] sm:$0xff] }
 0x2e7   : > { %v7559_v13 = vcombine.high %v903_v5, %v907_v30  ;;  %v7558_v20 = vcombine.low %v903_v5, %v907_v30  ;;  %v7560_v21 = vcombine.low %v904_v7, %v908_v8  ;;  %v964_v5 = vld [vmem:[%s8392_s26 + $0x1478] sm:$0xff] }
 0x2e9   : > { %5665 = vmatpush1.bf16.msra.mxu0 %v7494_v19  ;;  %5911 = vmatpush1.bf16.msra.mxu1 %v7496_v14  ;;  %v7561_v19 = vcombine.high %v904_v7, %v908_v8  ;;  %v911_v14 = vld [vmem:[%s8392_s26 + $0x12d0] sm:$0xff] }
 0x2ea   : > { %5666 = vmatprep.subr.bf16.mxu0 %v7503_v16  ;;  %5912 = vmatprep.subr.bf16.mxu1 %v7505_v17  ;;  %v915_v16 = vld [vmem:[%s8392_s26 + $0x12f0] sm:$0xff]  ;;  %v912_v17 = vld [vmem:[%s8392_s26 + $0x12d8] sm:$0xff] }
 0x2eb   : > { %v7567_v22 = vcombine.high %v911_v14, %v915_v16  ;;  %v7566_v27 = vcombine.low %v911_v14, %v915_v16  ;;  %v7568_v28 = vcombine.low %v912_v17, %v916_v18  ;;  %v972_v14 = vld [vmem:[%s8392_s26 + $0x14b8] sm:$0xff] }
 0x2ed   : > { %5667 = vmatpush1.bf16.msra.mxu0 %v7502_v23  ;;  %5913 = vmatpush1.bf16.msra.mxu1 %v7504_v29  ;;  %v7569_v23 = vcombine.high %v912_v17, %v916_v18  ;;  %v919_v29 = vld [vmem:[%s8392_s26 + $0x1310] sm:$0xff] }
 0x2ee   : > { %5668 = vmatprep.subr.bf16.mxu0 %v7511_v25  ;;  %5914 = vmatprep.subr.bf16.mxu1 %v7513_v39  ;;  %v923_v25 = vld [vmem:[%s8392_s26 + $0x1330] sm:$0xff]  ;;  %v920_v39 = vld [vmem:[%s8392_s26 + $0x1318] sm:$0xff] }
 0x2ef   : > { %v7575_v60 = vcombine.high %v919_v29, %v923_v25  ;;  %v7574_v35 = vcombine.low %v919_v29, %v923_v25  ;;  %v7576_v36 = vcombine.low %v920_v39, %v924_v26  ;;  %v980_v29 = vld [vmem:[%s8392_s26 + $0x14f8] sm:$0xff] }
 0x2f1   : > { %5669 = vmatpush1.bf16.msra.mxu0 %v7510_v31  ;;  %5915 = vmatpush1.bf16.msra.mxu1 %v7512_v32  ;;  %v7577_v31 = vcombine.high %v920_v39, %v924_v26  ;;  %v927_v32 = vld [vmem:[%s8392_s26 + $0x1350] sm:$0xff] }
 0x2f2   : > { %5670 = vmatprep.subr.bf16.mxu0 %v7519_v0  ;;  %5916 = vmatprep.subr.bf16.mxu1 %v7521_v34  ;;  %v931_v0 = vld [vmem:[%s8392_s26 + $0x1370] sm:$0xff]  ;;  %v928_v34 = vld [vmem:[%s8392_s26 + $0x1358] sm:$0xff] }
 0x2f3   : > { %v7583_v37 = vcombine.high %v927_v32, %v931_v0  ;;  %v7582_v43 = vcombine.low %v927_v32, %v931_v0  ;;  %v7584_v44 = vcombine.low %v928_v34, %v932_v49 }
 0x2f5   : > { %5671 = vmatpush1.bf16.msra.mxu0 %v7518_v38  ;;  %5917 = vmatpush1.bf16.msra.mxu1 %v7520_v40  ;;  %v7585_v38 = vcombine.high %v928_v34, %v932_v49  ;;  %v935_v40 = vld [vmem:[%s8392_s26 + $0x1390] sm:$0xff] }
 0x2f6   : > { %5672 = vmatprep.subr.bf16.mxu0 %v7527_v41  ;;  %5918 = vmatprep.subr.bf16.mxu1 %v7529_v59  ;;  %v939_v41 = vld [vmem:[%s8392_s26 + $0x13b0] sm:$0xff]  ;;  %v936_v59 = vld [vmem:[%s8392_s26 + $0x1398] sm:$0xff] }
 0x2f7   : > { %v7591_v46 = vcombine.high %v935_v40, %v939_v41  ;;  %v7590_v52 = vcombine.low %v935_v40, %v939_v41  ;;  %v7592_v53 = vcombine.low %v936_v59, %v940_v42  ;;  %v991_v49 = vld [vmem:[%s8392_s26 + $0x1550] sm:$0xff] }
 0x2f9   : > { %5673 = vmatpush1.bf16.msra.mxu0 %v7526_v47  ;;  %5919 = vmatpush1.bf16.msra.mxu1 %v7528_v10  ;;  %v7593_v47 = vcombine.high %v936_v59, %v940_v42  ;;  %v943_v10 = vld [vmem:[%s8392_s26 + $0x13d0] sm:$0xff] }
 0x2fa   : > { %5674 = vmatprep.subr.bf16.mxu0 %v7535_v50  ;;  %5920 = vmatprep.subr.bf16.mxu1 %v7537_v51  ;;  %v947_v50 = vld [vmem:[%s8392_s26 + $0x13f0] sm:$0xff]  ;;  %v944_v51 = vld [vmem:[%s8392_s26 + $0x13d8] sm:$0xff] }
 0x2fb   : > { %v7599_v55 = vcombine.high %v943_v10, %v947_v50  ;;  %v7598_v62 = vcombine.low %v943_v10, %v947_v50  ;;  %v7600_v63 = vcombine.low %v944_v51, %v948_v6  ;;  %v999_v42 = vld [vmem:[%s8392_s26 + $0x1590] sm:$0xff] }
 0x2fd   : > { %5675 = vmatpush1.bf16.msra.mxu0 %v7534_v56  ;;  %5921 = vmatpush1.bf16.msra.mxu1 %v7536_v57  ;;  %v7601_v56 = vcombine.high %v944_v51, %v948_v6  ;;  %v951_v57 = vld [vmem:[%s8392_s26 + $0x1410] sm:$0xff] }
 0x2fe   : > { %5676 = vmatprep.subr.bf16.mxu0 %v7543_v58  ;;  %5922 = vmatprep.subr.bf16.mxu1 %v7545_v54  ;;  %v955_v58 = vld [vmem:[%s8392_s26 + $0x1430] sm:$0xff]  ;;  %v952_v54 = vld [vmem:[%s8392_s26 + $0x1418] sm:$0xff] }
 0x2ff   : > { %v7607_v1 = vcombine.high %v951_v57, %v955_v58  ;;  %v7606_v30 = vcombine.low %v951_v57, %v955_v58  ;;  %v7608_v7 = vcombine.low %v952_v54, %v956_v11  ;;  %v1007_v6 = vld [vmem:[%s8392_s26 + $0x15d0] sm:$0xff] }
 0x301   : > { %5677 = vmatpush1.bf16.msra.mxu0 %v7542_v2  ;;  %5923 = vmatpush1.bf16.msra.mxu1 %v7544_v24  ;;  %v7609_v2 = vcombine.high %v952_v54, %v956_v11  ;;  %v959_v24 = vld [vmem:[%s8392_s26 + $0x1450] sm:$0xff] }
 0x302   : > { %5678 = vmatprep.subr.bf16.mxu0 %v7551_v3  ;;  %5924 = vmatprep.subr.bf16.mxu1 %v7553_v4  ;;  %v963_v3 = vld [vmem:[%s8392_s26 + $0x1470] sm:$0xff]  ;;  %v960_v4 = vld [vmem:[%s8392_s26 + $0x1458] sm:$0xff] }
 0x303   : > { %v7615_v8 = vcombine.high %v959_v24, %v963_v3  ;;  %v7614_v16 = vcombine.low %v959_v24, %v963_v3  ;;  %v7616_v17 = vcombine.low %v960_v4, %v964_v5  ;;  %v1015_v11 = vld [vmem:[%s8392_s26 + $0x1610] sm:$0xff] }
 0x305   : > { %5679 = vmatpush1.bf16.msra.mxu0 %v7550_v9  ;;  %5925 = vmatpush1.bf16.msra.mxu1 %v7552_v12  ;;  %v7617_v9 = vcombine.high %v960_v4, %v964_v5  ;;  %v967_v12 = vld [vmem:[%s8392_s26 + $0x1490] sm:$0xff] }
 0x306   : > { %5680 = vmatprep.subr.bf16.mxu0 %v7559_v13  ;;  %5926 = vmatprep.subr.bf16.mxu1 %v7561_v19  ;;  %v971_v13 = vld [vmem:[%s8392_s26 + $0x14b0] sm:$0xff]  ;;  %v968_v19 = vld [vmem:[%s8392_s26 + $0x1498] sm:$0xff] }
 0x307   : > { %v7623_v18 = vcombine.high %v967_v12, %v971_v13  ;;  %v7624_v25 = vcombine.low %v968_v19, %v972_v14  ;;  %v1023_v5 = vld [vmem:[%s8392_s26 + $0x1650] sm:$0xff] }
 0x309   : > { %5681 = vmatpush1.bf16.msra.mxu0 %v7558_v20  ;;  %5927 = vmatpush1.bf16.msra.mxu1 %v7560_v21  ;;  %v7625_v20 = vcombine.high %v968_v19, %v972_v14  ;;  %v975_v21 = vld [vmem:[%s8392_s26 + $0x14d0] sm:$0xff] }
 0x30a   : > { %5682 = vmatprep.subr.bf16.mxu0 %v7567_v22  ;;  %5928 = vmatprep.subr.bf16.mxu1 %v7569_v23  ;;  %v979_v22 = vld [vmem:[%s8392_s26 + $0x14f0] sm:$0xff]  ;;  %v976_v23 = vld [vmem:[%s8392_s26 + $0x14d8] sm:$0xff] }
 0x30b   : > { %v7631_v39 = vcombine.high %v975_v21, %v979_v22  ;;  %v7633_v26 = vcombine.high %v976_v23, %v980_v29  ;;  %v7630_v32 = vcombine.low %v975_v21, %v979_v22  ;;  %v1031_v14 = vld [vmem:[%s8392_s26 + $0x1690] sm:$0xff] }
 0x30d   : > { %5683 = vmatpush1.bf16.msra.mxu0 %v7566_v27  ;;  %5929 = vmatpush1.bf16.msra.mxu1 %v7568_v28  ;;  %v983_v27 = vld [vmem:[%s8392_s26 + $0x1510] sm:$0xff] }
 0x30e   : > { %5684 = vmatprep.subr.bf16.mxu0 %v7575_v60  ;;  %5930 = vmatprep.subr.bf16.mxu1 %v7577_v31  ;;  %v987_v28 = vld [vmem:[%s8392_s26 + $0x1530] sm:$0xff]  ;;  %v984_v60 = vld [vmem:[%s8392_s26 + $0x1518] sm:$0xff] }
 0x30f   : > { %v988_v31 = vld [vmem:[%s8392_s26 + $0x1538] sm:$0xff]  ;;  %v7639_v0 = vcombine.high %v983_v27, %v987_v28 }
 0x310   : > { %v7641_v34 = vcombine.high %v984_v60, %v988_v31  ;;  %v7640_v40 = vcombine.low %v984_v60, %v988_v31  ;;  %v1047_v31 = vld [vmem:[%s8392_s26 + $0x1710] sm:$0xff] }
 0x311   : > { %5685 = vmatpush1.bf16.msra.mxu0 %v7574_v35  ;;  %5931 = vmatpush1.bf16.msra.mxu1 %v7576_v36  ;;  %v995_v35 = vld [vmem:[%s8392_s26 + $0x1570] sm:$0xff]  ;;  %v992_v36 = vld [vmem:[%s8392_s26 + $0x1558] sm:$0xff] }
 0x312   : > { %5686 = vmatprep.subr.bf16.mxu0 %v7583_v37  ;;  %5932 = vmatprep.subr.bf16.mxu1 %v7585_v38  ;;  %v996_v37 = vld [vmem:[%s8392_s26 + $0x1578] sm:$0xff]  ;;  %v7638_v38 = vcombine.low %v983_v27, %v987_v28  ;;  %v7647_v41 = vcombine.high %v991_v49, %v995_v35 }
 0x313   : > { %v7649_v59 = vcombine.high %v992_v36, %v996_v37  ;;  %v7648_v10 = vcombine.low %v992_v36, %v996_v37  ;;  %v1055_v37 = vld [vmem:[%s8392_s26 + $0x1750] sm:$0xff] }
 0x315   : > { %5687 = vmatpush1.bf16.msra.mxu0 %v7582_v43  ;;  %5933 = vmatpush1.bf16.msra.mxu1 %v7584_v44  ;;  %v1003_v43 = vld [vmem:[%s8392_s26 + $0x15b0] sm:$0xff]  ;;  %v1000_v44 = vld [vmem:[%s8392_s26 + $0x1598] sm:$0xff] }
 0x316   : > { %5688 = vmatprep.subr.bf16.mxu0 %v7591_v46  ;;  %5934 = vmatprep.subr.bf16.mxu1 %v7593_v47  ;;  %v1004_v46 = vld [vmem:[%s8392_s26 + $0x15b8] sm:$0xff]  ;;  %v7646_v47 = vcombine.low %v991_v49, %v995_v35  ;;  %v7655_v50 = vcombine.high %v999_v42, %v1003_v43 }
 0x317   : > { %v7657_v51 = vcombine.high %v1000_v44, %v1004_v46  ;;  %v7656_v57 = vcombine.low %v1000_v44, %v1004_v46  ;;  %v1063_v46 = vld [vmem:[%s8392_s26 + $0x1790] sm:$0xff] }
 0x319   : > { %5689 = vmatpush1.bf16.msra.mxu0 %v7590_v52  ;;  %5935 = vmatpush1.bf16.msra.mxu1 %v7592_v53  ;;  %v1011_v52 = vld [vmem:[%s8392_s26 + $0x15f0] sm:$0xff]  ;;  %v1008_v53 = vld [vmem:[%s8392_s26 + $0x15d8] sm:$0xff] }
 0x31a   : > { %5690 = vmatprep.subr.bf16.mxu0 %v7599_v55  ;;  %5936 = vmatprep.subr.bf16.mxu1 %v7601_v56  ;;  %v1012_v55 = vld [vmem:[%s8392_s26 + $0x15f8] sm:$0xff]  ;;  %v7654_v56 = vcombine.low %v999_v42, %v1003_v43  ;;  %v7663_v58 = vcombine.high %v1007_v6, %v1011_v52 }
 0x31b   : > { %v7665_v54 = vcombine.high %v1008_v53, %v1012_v55  ;;  %v7664_v24 = vcombine.low %v1008_v53, %v1012_v55  ;;  %v1071_v55 = vld [vmem:[%s8392_s26 + $0x17d0] sm:$0xff] }
 0x31d   : > { %5691 = vmatpush1.bf16.msra.mxu0 %v7598_v62  ;;  %5937 = vmatpush1.bf16.msra.mxu1 %v7600_v63  ;;  %v1019_v62 = vld [vmem:[%s8392_s26 + $0x1630] sm:$0xff]  ;;  %v1016_v63 = vld [vmem:[%s8392_s26 + $0x1618] sm:$0xff] }
 0x31e   : > { %5701 = vmatprep.subr.bf16.mxu0 %v7607_v1  ;;  %5947 = vmatprep.subr.bf16.mxu1 %v7609_v2  ;;  %v1020_v1 = vld [vmem:[%s8392_s26 + $0x1638] sm:$0xff]  ;;  %v7662_v2 = vcombine.low %v1007_v6, %v1011_v52  ;;  %v7671_v3 = vcombine.high %v1015_v11, %v1019_v62 }
 0x31f   : > { %v7673_v4 = vcombine.high %v1016_v63, %v1020_v1 }
 0x320   : > { %5693 = vmatmul.mubr.bf16.vlgmr.msra.gmra.mrb[4].mxu0 %v8814_v48  ;;  %5939 = vmatmul.mubr.bf16.vlgmr.msra.gmra.mrb[4].mxu1 %v8814_v48  ;;  %v7622_v48 = vcombine.low %v967_v12, %v971_v13  ;;  %v7672_v12 = vcombine.low %v1016_v63, %v1020_v1 }
 0x321   : > { %5702 = vmatpush1.bf16.msra.mxu0 %v7606_v30  ;;  %5948 = vmatpush1.bf16.msra.mxu1 %v7608_v7  ;;  %v1027_v30 = vld [vmem:[%s8392_s26 + $0x1670] sm:$0xff]  ;;  %v1024_v7 = vld [vmem:[%s8392_s26 + $0x1658] sm:$0xff] }
 0x322   : > { %5703 = vmatprep.subr.bf16.mxu0 %v7615_v8  ;;  %5949 = vmatprep.subr.bf16.mxu1 %v7617_v9  ;;  %v1028_v8 = vld [vmem:[%s8392_s26 + $0x1678] sm:$0xff]  ;;  %v7670_v9 = vcombine.low %v1015_v11, %v1019_v62  ;;  %v7679_v13 = vcombine.high %v1023_v5, %v1027_v30 }
 0x323   : > { %5733 = vmatprep.mubr.bf16.mxu0 %v8822_v61  ;;  %5979 = vmatprep.mubr.bf16.mxu1 %v8822_v61  ;;  %v7632_v61 = vcombine.low %v976_v23, %v980_v29  ;;  %v7681_v19 = vcombine.high %v1024_v7, %v1028_v8  ;;  %v7680_v21 = vcombine.low %v1024_v7, %v1028_v8  ;;  %v1039_v29 = vld [vmem:[%s8392_s26 + $0x16d0] sm:$0xff] }
 0x325   : > { %5704 = vmatpush1.bf16.msra.mxu0 %v7614_v16  ;;  %5950 = vmatpush1.bf16.msra.mxu1 %v7616_v17  ;;  %v1035_v16 = vld [vmem:[%s8392_s26 + $0x16b0] sm:$0xff]  ;;  %v1032_v17 = vld [vmem:[%s8392_s26 + $0x1698] sm:$0xff] }
 0x326   : > { %5705 = vmatprep.subr.bf16.mxu0 %v7623_v18  ;;  %5951 = vmatprep.subr.bf16.mxu1 %v7625_v20  ;;  %v1036_v18 = vld [vmem:[%s8392_s26 + $0x16b8] sm:$0xff]  ;;  %v7678_v20 = vcombine.low %v1023_v5, %v1027_v30  ;;  %v7687_v22 = vcombine.high %v1031_v14, %v1035_v16 }
 0x327   : > { %v7689_v23 = vcombine.high %v1032_v17, %v1036_v18  ;;  %v7688_v27 = vcombine.low %v1032_v17, %v1036_v18 }
 0x329   : > { %5706 = vmatpush1.bf16.msra.mxu0 %v7622_v48  ;;  %5952 = vmatpush1.bf16.msra.mxu1 %v7624_v25  ;;  %v1043_v48 = vld [vmem:[%s8392_s26 + $0x16f0] sm:$0xff]  ;;  %v1040_v25 = vld [vmem:[%s8392_s26 + $0x16d8] sm:$0xff] }
 0x32a   : > { %5707 = vmatprep.subr.bf16.mxu0 %v7631_v39  ;;  %5953 = vmatprep.subr.bf16.mxu1 %v7633_v26  ;;  %v1044_v39 = vld [vmem:[%s8392_s26 + $0x16f8] sm:$0xff]  ;;  %v7686_v26 = vcombine.low %v1031_v14, %v1035_v16  ;;  %v7695_v28 = vcombine.high %v1039_v29, %v1043_v48 }
 0x32b   : > { %v7697_v60 = vcombine.high %v1040_v25, %v1044_v39  ;;  %v7696_v49 = vcombine.low %v1040_v25, %v1044_v39  ;;  %v306_v16 = vld [vmem:[#allocation2 + $0x8] sm:$0xff]  ;;  %v8051_v39 = vld [vmem:[%s9536_s3 + $0x50] sm:$0xff] (!%p7730_p7)  }
 0x32c   : > { %v8050_v25 = vld [vmem:[%s9536_s3 + $0x88] sm:$0xff] (!%p7730_p7)  }
 0x32d   : > { %5708 = vmatpush1.bf16.msra.mxu0 %v7630_v32  ;;  %5954 = vmatpush1.bf16.msra.mxu1 %v7632_v61  ;;  %v1051_v32 = vld [vmem:[%s8392_s26 + $0x1730] sm:$0xff]  ;;  %v1048_v61 = vld [vmem:[%s8392_s26 + $0x1718] sm:$0xff] }
 0x32e   : > { %5709 = vmatprep.subr.bf16.mxu0 %v7639_v0  ;;  %5955 = vmatprep.subr.bf16.mxu1 %v7641_v34  ;;  %v1052_v0 = vld [vmem:[%s8392_s26 + $0x1738] sm:$0xff]  ;;  %v7694_v34 = vcombine.low %v1039_v29, %v1043_v48  ;;  %v7703_v35 = vcombine.high %v1047_v31, %v1051_v32 }
 0x32f   : > { %v7705_v36 = vcombine.high %v1048_v61, %v1052_v0  ;;  %v7704_v42 = vcombine.low %v1048_v61, %v1052_v0  ;;  %v8048_v29 = vld [vmem:[%s9536_s3 + $0xc8] sm:$0xff] (!%p7730_p7)   ;;  %v8058_v61 = vld [vmem:[%s9536_s3 + $0x98] sm:$0xff] (!%p7730_p7)   ;;  %v8059_v0 = vld [vmem:[%s9536_s3 + $0x60] sm:$0xff] (!%p7730_p7)  }
 0x330   : > { %v8049_v48 = vld [vmem:[%s9536_s3 + $0x8] sm:$0xff] (!%p7730_p7)  }
 0x331   : > { %5710 = vmatpush1.bf16.msra.mxu0 %v7638_v38  ;;  %5956 = vmatpush1.bf16.msra.mxu1 %v7640_v40  ;;  %v1059_v38 = vld [vmem:[%s8392_s26 + $0x1770] sm:$0xff]  ;;  %v1056_v40 = vld [vmem:[%s8392_s26 + $0x1758] sm:$0xff] }
 0x332   : > { %5711 = vmatprep.subr.bf16.mxu0 %v7647_v41  ;;  %5957 = vmatprep.subr.bf16.mxu1 %v7649_v59  ;;  %v1060_v41 = vld [vmem:[%s8392_s26 + $0x1778] sm:$0xff]  ;;  %v7702_v59 = vcombine.low %v1047_v31, %v1051_v32  ;;  %v7711_v43 = vcombine.high %v1055_v37, %v1059_v38  ;;  %v8056_v31 = vld [vmem:[%s9536_s3 + $0xd8] sm:$0xff] (!%p7730_p7)  }
 0x333   : > { %v7713_v44 = vcombine.high %v1056_v40, %v1060_v41  ;;  %v7712_v6 = vcombine.low %v1056_v40, %v1060_v41  ;;  %v8057_v32 = vld [vmem:[%s9536_s3 + $0x18] sm:$0xff] (!%p7730_p7)   ;;  %v8066_v40 = vld [vmem:[%s9536_s3 + $0xa8] sm:$0xff] (!%p7730_p7)   ;;  %v8067_v41 = vld [vmem:[%s9536_s3 + $0x70] sm:$0xff] (!%p7730_p7)  }
 0x335   : > { %5712 = vmatpush1.bf16.msra.mxu0 %v7646_v47  ;;  %5958 = vmatpush1.bf16.msra.mxu1 %v7648_v10  ;;  %v1067_v47 = vld [vmem:[%s8392_s26 + $0x17b0] sm:$0xff]  ;;  %v1064_v10 = vld [vmem:[%s8392_s26 + $0x1798] sm:$0xff] }
 0x336   : > { %5713 = vmatprep.subr.bf16.mxu0 %v7655_v50  ;;  %5959 = vmatprep.subr.bf16.mxu1 %v7657_v51  ;;  %v1068_v50 = vld [vmem:[%s8392_s26 + $0x17b8] sm:$0xff]  ;;  %v7710_v51 = vcombine.low %v1055_v37, %v1059_v38  ;;  %v7719_v52 = vcombine.high %v1063_v46, %v1067_v47 }
 0x337   : > { %v7721_v53 = vcombine.high %v1064_v10, %v1068_v50  ;;  %v7720_v11 = vcombine.low %v1064_v10, %v1068_v50  ;;  %v8064_v37 = vld [vmem:[%s9536_s3 + $0xe8] sm:$0xff] (!%p7730_p7)   ;;  %v6054_v10 = vsub.s32 (!%p7730_p7), 2, %v8431_v45  ;;  %v8072_v50 = vld [vmem:[%s9536_s3 + $0xf8] sm:$0xff] (!%p7730_p7)  }
 0x338   : > { %v8065_v38 = vld [vmem:[%s9536_s3 + $0x28] sm:$0xff] (!%p7730_p7)  }
 0x339   : > { %5714 = vmatpush1.bf16.msra.mxu0 %v7654_v56  ;;  %5960 = vmatpush1.bf16.msra.mxu1 %v7656_v57  ;;  %v1075_v56 = vld [vmem:[%s8392_s26 + $0x17f0] sm:$0xff]  ;;  %v1072_v57 = vld [vmem:[%s8392_s26 + $0x17d8] sm:$0xff] }
 0x33a   : > { %5715 = vmatprep.subr.bf16.mxu0 %v7663_v58  ;;  %5961 = vmatprep.subr.bf16.mxu1 %v7665_v54  ;;  %v1076_v58 = vld [vmem:[%s8392_s26 + $0x17f8] sm:$0xff]  ;;  %v7718_v54 = vcombine.low %v1063_v46, %v1067_v47  ;;  %v7727_v62 = vcombine.high %v1071_v55, %v1075_v56  ;;  %v7726_v1 = vcombine.low %v1071_v55, %v1075_v56  ;;  %v6050_v46 = vsub.s32 (!%p7730_p7), 1, %v8431_v45  ;;  %v8071_v47 = vld [vmem:[%s9536_s3 + $0x78] sm:$0xff] (!%p7730_p7)  }
 0x33b   : > { %v7729_v63 = vcombine.high %v1072_v57, %v1076_v58 }
 0x33d   : > { %5716 = vmatpush1.bf16.msra.mxu0 %v7662_v2  ;;  %5962 = vmatpush1.bf16.msra.mxu1 %v7664_v24  ;;  %v7728_v2 = vcombine.low %v1072_v57, %v1076_v58 }
 0x33e   : > { %5717 = vmatprep.subr.bf16.mxu0 %v7671_v3  ;;  %5963 = vmatprep.subr.bf16.mxu1 %v7673_v4 }
 0x341   : > { %5718 = vmatpush1.bf16.msra.mxu0 %v7670_v9  ;;  %5964 = vmatpush1.bf16.msra.mxu1 %v7672_v12 }
 0x342   : > { %5719 = vmatprep.subr.bf16.mxu0 %v7679_v13  ;;  %5965 = vmatprep.subr.bf16.mxu1 %v7681_v19 }
 0x345   : > { %5720 = vmatpush1.bf16.msra.mxu0 %v7678_v20  ;;  %5966 = vmatpush1.bf16.msra.mxu1 %v7680_v21  ;;  %v8044_v20 = vld [vmem:[%s9536_s3 + $0xc0] sm:$0xff] (!%p7730_p7)  }
 0x346   : > { %5721 = vmatprep.subr.bf16.mxu0 %v7687_v22  ;;  %5967 = vmatprep.subr.bf16.mxu1 %v7689_v23  ;;  %v8045_v21 = vld [vmem:[%s9536_s3] sm:$0xff] (!%p7730_p7)   ;;  %v8047_v23 = vld [vmem:[%s9536_s3 + $0x48] sm:$0xff] (!%p7730_p7)  }
 0x347   : > { %v8046_v22 = vld [vmem:[%s9536_s3 + $0x80] sm:$0xff] (!%p7730_p7)  }
 0x349   : > { %5722 = vmatpush1.bf16.msra.mxu0 %v7686_v26  ;;  %5968 = vmatpush1.bf16.msra.mxu1 %v7688_v27  ;;  %v8052_v26 = vld [vmem:[%s9536_s3 + $0xd0] sm:$0xff] (!%p7730_p7)  }
 0x34a   : > { %5723 = vmatprep.subr.bf16.mxu0 %v7695_v28  ;;  %5969 = vmatprep.subr.bf16.mxu1 %v7697_v60  ;;  %v8053_v27 = vld [vmem:[%s9536_s3 + $0x10] sm:$0xff] (!%p7730_p7)   ;;  %v8055_v60 = vld [vmem:[%s9536_s3 + $0x58] sm:$0xff] (!%p7730_p7)  }
 0x34b   : > { %v8054_v28 = vld [vmem:[%s9536_s3 + $0x90] sm:$0xff] (!%p7730_p7)  }
 0x34d   : > { %5724 = vmatpush1.bf16.msra.mxu0 %v7694_v34  ;;  %5970 = vmatpush1.bf16.msra.mxu1 %v7696_v49  ;;  %v8060_v34 = vld [vmem:[%s9536_s3 + $0xe0] sm:$0xff] (!%p7730_p7)  }
 0x34e   : > { %5725 = vmatprep.subr.bf16.mxu0 %v7703_v35  ;;  %5971 = vmatprep.subr.bf16.mxu1 %v7705_v36  ;;  %v8061_v49 = vld [vmem:[%s9536_s3 + $0x20] sm:$0xff] (!%p7730_p7)   ;;  %v8063_v36 = vld [vmem:[%s9536_s3 + $0x68] sm:$0xff] (!%p7730_p7)  }
 0x34f   : > { %v8062_v35 = vld [vmem:[%s9536_s3 + $0xa0] sm:$0xff] (!%p7730_p7)  }
 0x351   : > { %5726 = vmatpush1.bf16.msra.mxu0 %v7702_v59  ;;  %5972 = vmatpush1.bf16.msra.mxu1 %v7704_v42  ;;  %v8068_v59 = vld [vmem:[%s9536_s3 + $0xf0] sm:$0xff] (!%p7730_p7)  }
 0x352   : > { %5727 = vmatprep.subr.bf16.mxu0 %v7711_v43  ;;  %5973 = vmatprep.subr.bf16.mxu1 %v7713_v44  ;;  %v8069_v42 = vld [vmem:[%s9536_s3 + $0x30] sm:$0xff] (!%p7730_p7)   ;;  %v6046_v43 = vsub.s32 (!%p7730_p7), 0, %v8431_v45 }
 0x353   : > { %v8070_v44 = vld [vmem:[%s9536_s3 + $0xb0] sm:$0xff] (!%p7730_p7)  }
 0x355   : > { %5728 = vmatpush1.bf16.msra.mxu0 %v7710_v51  ;;  %5974 = vmatpush1.bf16.msra.mxu1 %v7712_v6  ;;  %v6058_v51 = vsub.s32 (!%p7730_p7), 3, %v8431_v45  ;;  %v8073_v6 = vld [vmem:[%s9536_s3 + $0x38] sm:$0xff] (!%p7730_p7)  }
 0x356   : > { %5729 = vmatprep.subr.bf16.mxu0 %v7719_v52  ;;  %5975 = vmatprep.subr.bf16.mxu1 %v7721_v53  ;;  %v8074_v52 = vld [vmem:[%s9536_s3 + $0xb8] sm:$0xff] (!%p7730_p7)   ;;  %v6042_v53 = vld [vmem:[#allocation5] sm:$0xff] (!%p7730_p7) }
 0x357   : > { %v6047_v55 = vrot.slane (!%p7730_p7), %v6042_v53, %v6046_v43  ;;  %v6051_v56 = vrot.slane (!%p7730_p7), %v6042_v53, %v6050_v46  ;;  %v6055_v57 = vrot.slane (!%p7730_p7), %v6042_v53, %v6054_v10  ;;  %v6059_v58 = vrot.slane (!%p7730_p7), %v6042_v53, %v6058_v51  ;;  %v8093_v43 = vld [vmem:[%s9536_s3 + $0x120] sm:$0xff] (!%p7730_p7)   ;;  %v8095_v46 = vld [vmem:[%s9536_s3 + $0x168] sm:$0xff] (!%p7730_p7)  }
 0x358   : > { %v8097_v51 = vld [vmem:[%s9536_s3 + $0x128] sm:$0xff] (!%p7730_p7)  }
 0x359   : > { %5730 = vmatpush1.bf16.msra.mxu0 %v7718_v54  ;;  %5976 = vmatpush1.bf16.msra.mxu1 %v7720_v11  ;;  %v8075_v54 = vld [vmem:[%s9536_s3 + $0x140] sm:$0xff] (!%p7730_p7)  }
 0x35a   : > { %5731 = vmatprep.subr.bf16.mxu0 %v7727_v62  ;;  %5977 = vmatprep.subr.bf16.mxu1 %v7729_v63  ;;  %v8076_v11 = vld [vmem:[%s9536_s3 + $0x1c0] sm:$0xff] (!%p7730_p7)   ;;  %v6076_v62 = vcombine.low (!%p7730_p7), %v6047_v55, %v6051_v56  ;;  %v6077_v63 = vcombine.low (!%p7730_p7), %v6055_v57, %v6059_v58  ;;  %v8098_v55 = vld [vmem:[%s9536_s3 + $0x1a8] sm:$0xff] (!%p7730_p7)   ;;  %v8100_v58 = vld [vmem:[%s9536_s3 + $0x1f0] sm:$0xff] (!%p7730_p7)  }
 0x35d   : > { %5732 = vmatpush1.bf16.msra.mxu0 %v7726_v1  ;;  %5978 = vmatpush1.bf16.msra.mxu1 %v7728_v2  ;;  %v6084_v1 = vrot.slane (!%p7730_p7), %v6076_v62, %v9123_v33  ;;  %v6091_v2 = vrot.slane (!%p7730_p7), %v6077_v63, %v9123_v33  ;;  %v8103_v63 = vld [vmem:[%s9536_s3 + $0x178] sm:$0xff] (!%p7730_p7)  }
 0x35e   : > { %7823 = vmatprep.subr.bf16.mxu1 (!%p7730_p7), %v8044_v20 }
 0x360   : > { %5734 = vmatmul.mubr.bf16.vlgmr.msra.gmra.mrb[4].mxu0 %v8890_v15  ;;  %5980 = vmatmul.mubr.bf16.vlgmr.msra.gmra.mrb[4].mxu1 %v8890_v15  ;;  %v8043_v15 = vld [vmem:[%s9536_s3 + $0x40] sm:$0xff] (!%p7730_p7)  }
 0x361   : > { %7801 = vmatprep.subr.bf16.mxu0 (!%p7730_p7), %v8043_v15  ;;  %7824 = vmatpush3.bf16.msra.mxu1 (!%p7730_p7), %v8046_v22 }
 0x362   : > { %7802 = vmatpush3.bf16.msra.mxu0 (!%p7730_p7), %v8045_v21  ;;  %7825 = vmatprep.subr.bf16.mxu1 (!%p7730_p7), %v8048_v29  ;;  %v8077_v21 = vld [vmem:[%s9536_s3 + $0x100] sm:$0xff] (!%p7730_p7)  }
 0x363   : > { %7803 = vmatprep.subr.bf16.mxu0 (!%p7730_p7), %v8047_v23 }
 0x365   : > { %7826 = vmatpush3.bf16.msra.mxu1 (!%p7730_p7), %v8050_v25  ;;  %v8078_v25 = vld [vmem:[%s9536_s3 + $0x180] sm:$0xff] (!%p7730_p7)  }
 0x366   : > { %7804 = vmatpush3.bf16.msra.mxu0 (!%p7730_p7), %v8049_v48  ;;  %7827 = vmatprep.subr.bf16.mxu1 (!%p7730_p7), %v8052_v26  ;;  %v8079_v48 = vld [vmem:[%s9536_s3 + $0x148] sm:$0xff] (!%p7730_p7)  }
 0x367   : > { %7805 = vmatprep.subr.bf16.mxu0 (!%p7730_p7), %v8051_v39  ;;  %v8080_v39 = vld [vmem:[%s9536_s3 + $0x1c8] sm:$0xff] (!%p7730_p7)  }
 0x368   : > { %v8081_v26 = vld [vmem:[%s9536_s3 + $0x108] sm:$0xff] (!%p7730_p7)  }
 0x369   : > { %7828 = vmatpush3.bf16.msra.mxu1 (!%p7730_p7), %v8054_v28 }
 0x36a   : > { %7806 = vmatpush3.bf16.msra.mxu0 (!%p7730_p7), %v8053_v27  ;;  %7829 = vmatprep.subr.bf16.mxu1 (!%p7730_p7), %v8056_v31  ;;  %v8082_v31 = vld [vmem:[%s9536_s3 + $0x188] sm:$0xff] (!%p7730_p7)  }
 0x36b   : > { %7807 = vmatprep.subr.bf16.mxu0 (!%p7730_p7), %v8055_v60  ;;  %v8083_v60 = vld [vmem:[%s9536_s3 + $0x150] sm:$0xff] (!%p7730_p7)  }
 0x36d   : > { %7830 = vmatpush3.bf16.msra.mxu1 (!%p7730_p7), %v8058_v61  ;;  %v8085_v61 = vld [vmem:[%s9536_s3 + $0x110] sm:$0xff] (!%p7730_p7)  }
 0x36e   : > { %7808 = vmatpush3.bf16.msra.mxu0 (!%p7730_p7), %v8057_v32  ;;  %7831 = vmatprep.subr.bf16.mxu1 (!%p7730_p7), %v8060_v34  ;;  %v8084_v32 = vld [vmem:[%s9536_s3 + $0x1d0] sm:$0xff] (!%p7730_p7)  }
 0x36f   : > { %7809 = vmatprep.subr.bf16.mxu0 (!%p7730_p7), %v8059_v0 }
 0x371   : > { %7832 = vmatpush3.bf16.msra.mxu1 (!%p7730_p7), %v8062_v35  ;;  %v8086_v35 = vld [vmem:[%s9536_s3 + $0x190] sm:$0xff] (!%p7730_p7)  }
 0x372   : > { %7810 = vmatpush3.bf16.msra.mxu0 (!%p7730_p7), %v8061_v49  ;;  %7833 = vmatprep.subr.bf16.mxu1 (!%p7730_p7), %v8064_v37  ;;  %v8087_v49 = vld [vmem:[%s9536_s3 + $0x158] sm:$0xff] (!%p7730_p7)  }
 0x373   : > { %7811 = vmatprep.subr.bf16.mxu0 (!%p7730_p7), %v8063_v36  ;;  %v8088_v36 = vld [vmem:[%s9536_s3 + $0x1d8] sm:$0xff] (!%p7730_p7)  }
 0x374   : > { %v8089_v37 = vld [vmem:[%s9536_s3 + $0x118] sm:$0xff] (!%p7730_p7)  }
 0x375   : > { %7834 = vmatpush3.bf16.msra.mxu1 (!%p7730_p7), %v8066_v40  ;;  %v8091_v40 = vld [vmem:[%s9536_s3 + $0x160] sm:$0xff] (!%p7730_p7)  }
 0x376   : > { %7812 = vmatpush3.bf16.msra.mxu0 (!%p7730_p7), %v8065_v38  ;;  %7835 = vmatprep.subr.bf16.mxu1 (!%p7730_p7), %v8068_v59  ;;  %v8092_v59 = vld [vmem:[%s9536_s3 + $0x1e0] sm:$0xff] (!%p7730_p7)  }
 0x377   : > { %7813 = vmatprep.subr.bf16.mxu0 (!%p7730_p7), %v8067_v41  ;;  %v8090_v41 = vld [vmem:[%s9536_s3 + $0x198] sm:$0xff] (!%p7730_p7)  }
 0x379   : > { %7836 = vmatpush3.bf16.msra.mxu1 (!%p7730_p7), %v8070_v44 }
 0x37a   : > { %7814 = vmatpush3.bf16.msra.mxu0 (!%p7730_p7), %v8069_v42  ;;  %7837 = vmatprep.subr.bf16.mxu1 (!%p7730_p7), %v8072_v50  ;;  %v8096_v50 = vld [vmem:[%s9536_s3 + $0x1e8] sm:$0xff] (!%p7730_p7)  }
 0x37b   : > { %7815 = vmatprep.subr.bf16.mxu0 (!%p7730_p7), %v8071_v47  ;;  %v8094_v47 = vld [vmem:[%s9536_s3 + $0x1a0] sm:$0xff] (!%p7730_p7)  }
 0x37d   : > { %7838 = vmatpush3.bf16.msra.mxu1 (!%p7730_p7), %v8074_v52 }
 0x37e   : > { %7816 = vmatpush3.bf16.msra.mxu0 (!%p7730_p7), %v8073_v6  ;;  %7867 = vmatprep.subr.bf16.mxu1 (!%p7730_p7), %v8076_v11 }
 0x37f   : > { %7845 = vmatprep.subr.bf16.mxu0 (!%p7730_p7), %v8075_v54  ;;  %v8101_v54 = vld [vmem:[%s9536_s3 + $0x130] sm:$0xff] (!%p7730_p7)  }
 0x433   : > { %v5735_v24 = vpop.f32.mrb[4].mxu0  ;;  %v5981_v3 = vpop.f32.mrb[4].mxu1 }
 0x434   : > { %v5737_v4 = vpop.f32.mrb[5].mxu0  ;;  %v5983_v30 = vpop.f32.mrb[5].mxu1 }
 0x435   : > { %v6013_v5 = vcombine.low %v5735_v24, %v5737_v4  ;;  %v5739_v7 = vpop.f32.mrb[6].mxu0  ;;  %v6014_v8 = vcombine.low %v5981_v3, %v5983_v30  ;;  %v5985_v9 = vpop.f32.mrb[6].mxu1  ;;  %v6040_v24 = vld [vmem:[#allocation2] sm:$0xff] (!%p7730_p7)  ;;  %v6092_v3 = vcombine.low (!%p7730_p7), %v6084_v1, %v6091_v2  ;;  %v6062_v30 = vsub.s32 (!%p7730_p7), 4, %v8431_v45  ;;  %v8104_v2 = vld [vmem:[%s9536_s3 + $0x1f8] sm:$0xff] (!%p7730_p7)  }
 0x436   : > { %v5740_v12 = vpop.f32.mrb[7].mxu0  ;;  %v5986_v19 = vpop.f32.mrb[7].mxu1  ;;  %v6066_v7 = vsub.s32 (!%p7730_p7), 5, %v8431_v45 }
 0x437   : > { %v6021_v13 = vrot.slane %v6013_v5, %v9123_v33  ;;  %v6028_v14 = vrot.slane %v6014_v8, %v9123_v33  ;;  %6039 = sbr.rel (%p7730_p7) target bundleno = 1342 (0x53e), region = 52  ;;  %v6112_v4 = vadd.f32 (!%p7730_p7), %v6092_v3, %v6040_v24  ;;  %v6070_v12 = vsub.s32 (!%p7730_p7), 6, %v8431_v45  ;;  %v8105_v24 = vld [vmem:[%s9536_s3 + $0x138] sm:$0xff] (!%p7730_p7)  }
 0x438   : > { %v8106_v3 = vld [vmem:[%s9536_s3 + $0x1b8] sm:$0xff] (!%p7730_p7)  }
 0x439   : > { %v6029_v17 = vcombine.low %v6021_v13, %v6028_v14  ;;  %v6114_v5 = vmax.f32 (!%p7730_p7), %v6112_v4, 0.0  ;;  %v6074_v13 = vsub.s32 (!%p7730_p7), 7, %v8431_v45  ;;  %v6071_v22 = vrot.slane (!%p7730_p7), %v6042_v53, %v6070_v12 }
 0x43b   : > { %v6033_v18 = vadd.f32 %v6029_v17, %v306_v16  ;;  %v6125_v8 = vrot.slane (!%p7730_p7), %v6114_v5, %v9123_v33  ;;  %v6118_v9 = vcombine.high (!%p7730_p7), %v6114_v5, %v6114_v5  ;;  %v6063_v17 = vrot.slane (!%p7730_p7), %v6042_v53, %v6062_v30 }
 0x43c   : > { %v6075_v23 = vrot.slane (!%p7730_p7), %v6042_v53, %v6074_v13 }
 0x43d   : > { %6035 = vst [vmem:[#allocation2 + $0x8] sm:$0xff] %v6033_v18  ;;  %v6133_v19 = vcombine.high (!%p7730_p7), %v6125_v8, %v6125_v8  ;;  %v6132_v14 = vrot.slane (!%p7730_p7), %v6118_v9, %v9123_v33  ;;  %v6160_v16 = vpack.c.bf16 (!%p7730_p7), %v6125_v8, %v6125_v8  ;;  %v6067_v18 = vrot.slane (!%p7730_p7), %v6042_v53, %v6066_v7  ;;  %v8099_v53 = vld [vmem:[%s9536_s3 + $0x170] sm:$0xff] (!%p7730_p7)  }
 0x43e   : > { %v6094_v28 = vcombine.low %v6071_v22, %v6075_v23 }
 0x43f   : > { %v6161_v15 = vpack.c.bf16 %v6133_v19, %v6133_v19  ;;  %v6134_v20 = vcombine.high %v6132_v14, %v6132_v14  ;;  %v6162_v29 = vpack.c.bf16 %v6132_v14, %v6132_v14  ;;  %v6093_v27 = vcombine.low %v6063_v17, %v6067_v18 }
 0x440   : > { %v6108_v34 = vrot.slane %v6094_v28, %v9123_v33 }
 0x441   : > { %6712 = vmatprep.mubr.bf16.mxu0 %v6161_v15  ;;  %v6163_v45 = vpack.c.bf16 %v6134_v20, %v6134_v20  ;;  %v6101_v0 = vrot.slane %v6093_v27, %v9123_v33 }
 0x442   : > { %6713 = vmatmul.mubr.bf16.vlgmr.msra.gmra.mrb[0].mxu0 %v6160_v16 }
 0x443   : > { %6752 = vmatprep.mubr.bf16.mxu1 %v6163_v45  ;;  %7846 = vmatpush3.bf16.msra.mxu0 %v8077_v21  ;;  %v6109_v38 = vcombine.low %v6101_v0, %v6108_v34 }
 0x444   : > { %6753 = vmatmul.mubr.bf16.vlgmr.msra.gmra.mrb[0].mxu1 %v6162_v29  ;;  %7847 = vmatprep.subr.bf16.mxu0 %v8079_v48  ;;  %v6041_v42 = vld [vmem:[#allocation2 + $0x8] sm:$0xff] }
 0x445   : > { %7868 = vmatpush3.bf16.msra.mxu1 %v8078_v25  ;;  %v6113_v44 = vadd.f32 %v6109_v38, %v6041_v42 }
 0x446   : > { %7869 = vmatprep.subr.bf16.mxu1 %v8080_v39 }
 0x447   : > { %7848 = vmatpush3.bf16.msra.mxu0 %v8081_v26  ;;  %v6115_v10 = vmax.f32 %v6113_v44, 0.0 }
 0x448   : > { %7849 = vmatprep.subr.bf16.mxu0 %v8083_v60 }
 0x449   : > { %7870 = vmatpush3.bf16.msra.mxu1 %v8082_v31  ;;  %v6142_v6 = vrot.slane %v6115_v10, %v9123_v33  ;;  %v6135_v52 = vcombine.high %v6115_v10, %v6115_v10 }
 0x44a   : > { %7871 = vmatprep.subr.bf16.mxu1 %v8084_v32 }
 0x44b   : > { %7850 = vmatpush3.bf16.msra.mxu0 %v8085_v61  ;;  %v6150_v56 = vcombine.high %v6142_v6, %v6142_v6  ;;  %v6149_v57 = vrot.slane %v6135_v52, %v9123_v33  ;;  %v8102_v33 = vld [vmem:[%s9536_s3 + $0x1b0] sm:$0xff]   ;;  %v6164_v4 = vpack.c.bf16 %v6142_v6, %v6142_v6 }
 0x44c   : > { %7851 = vmatprep.subr.bf16.mxu0 %v8087_v49 }
 0x44d   : > { %7872 = vmatpush3.bf16.msra.mxu1 %v8086_v35  ;;  %v6165_v11 = vpack.c.bf16 %v6150_v56, %v6150_v56  ;;  %v6151_v62 = vcombine.high %v6149_v57, %v6149_v57  ;;  %v6166_v5 = vpack.c.bf16 %v6149_v57, %v6149_v57 }
 0x44e   : > { %7873 = vmatprep.subr.bf16.mxu1 %v8088_v36 }
 0x44f   : > { %7852 = vmatpush3.bf16.msra.mxu0 %v8089_v37  ;;  %6792 = vmatprep.mubr.bf16.mxu0 %v6165_v11  ;;  %v6167_v1 = vpack.c.bf16 %v6151_v62, %v6151_v62 }
 0x450   : > { %7853 = vmatprep.subr.bf16.mxu0 %v8091_v40 }
 0x451   : > { %7874 = vmatpush3.bf16.msra.mxu1 %v8090_v41  ;;  %6832 = vmatprep.mubr.bf16.mxu1 %v6167_v1 }
 0x452   : > { %7875 = vmatprep.subr.bf16.mxu1 %v8092_v59 }
 0x453   : > { %7854 = vmatpush3.bf16.msra.mxu0 %v8093_v43 }
 0x454   : > { %7855 = vmatprep.subr.bf16.mxu0 %v8095_v46 }
 0x455   : > { %7876 = vmatpush3.bf16.msra.mxu1 %v8094_v47 }
 0x456   : > { %7877 = vmatprep.subr.bf16.mxu1 %v8096_v50 }
 0x457   : > { %7856 = vmatpush3.bf16.msra.mxu0 %v8097_v51 }
 0x458   : > { %7857 = vmatprep.subr.bf16.mxu0 %v8099_v53 }
 0x459   : > { %7878 = vmatpush3.bf16.msra.mxu1 %v8098_v55 }
 0x45a   : > { %7879 = vmatprep.subr.bf16.mxu1 %v8100_v58 }
 0x45b   : > { %7858 = vmatpush3.bf16.msra.mxu0 %v8101_v54 }
 0x45c   : > { %7859 = vmatprep.subr.bf16.mxu0 %v8103_v63 }
 0x45d   : > { %7880 = vmatpush3.bf16.msra.mxu1 %v8102_v33 }
 0x45e   : > { %7881 = vmatprep.subr.bf16.mxu1 %v8104_v2 }
 0x45f   : > { %7860 = vmatpush3.bf16.msra.mxu0 %v8105_v24 }
 0x461   : > { %7882 = vmatpush3.bf16.msra.mxu1 %v8106_v3 }
 0x462   : > { %6793 = vmatmul.mubr.bf16.vlgmr.msra.gmra.mrb[4].mxu0 %v6164_v4 }
 0x464   : > { %6833 = vmatmul.mubr.bf16.vlgmr.msra.gmra.mrb[4].mxu1 %v6166_v5 }
 0x515   : > { %v7817_v30 = vpop.f32.mrb[0].mxu0 }
 0x516   : > { %v7818_v7 = vpop.f32.mrb[1].mxu0 }
 0x517   : > { %v7839_v8 = vpop.f32.mrb[0].mxu1  ;;  %v7819_v9 = vadd.f32 %v7818_v7, %v7817_v30  ;;  %v7820_v12 = vpop.f32.mrb[2].mxu0 }
 0x518   : > { %v7840_v13 = vpop.f32.mrb[1].mxu1  ;;  %v7821_v19 = vpop.f32.mrb[3].mxu0 }
 0x519   : > { %v7841_v14 = vadd.f32 %v7840_v13, %v7839_v8  ;;  %v7842_v16 = vpop.f32.mrb[2].mxu1 }
 0x51a   : > { %v7843_v17 = vpop.f32.mrb[3].mxu1 }
 0x51b   : > { %v6755_v18 = vadd.f32 %v7841_v14, %v7819_v9 }
 0x535   : > { %v7861_v15 = vpop.f32.mrb[4].mxu0 }
 0x536   : > { %v7862_v20 = vpop.f32.mrb[5].mxu0 }
 0x537   : > { %v7883_v21 = vpop.f32.mrb[4].mxu1  ;;  %v7863_v22 = vadd.f32 %v7862_v20, %v7861_v15  ;;  %v7864_v23 = vpop.f32.mrb[6].mxu0 }
 0x538   : > { %v7884_v29 = vpop.f32.mrb[5].mxu1  ;;  %v7865_v48 = vpop.f32.mrb[7].mxu0 }
 0x539   : > { %v6795_v45 = vadd.f32 %v7863_v22, %v6755_v18  ;;  %v7885_v25 = vadd.f32 %v7884_v29, %v7883_v21  ;;  %v7886_v39 = vpop.f32.mrb[6].mxu1 }
 0x53a   : > { %v7887_v26 = vpop.f32.mrb[7].mxu1 }
 0x53b   : > { %v6835_v27 = vadd.f32 %v7885_v25, %v6795_v45 }
 0x53d   : > { %6841 = vst.msk [vmem:[%s9537_s4] sm:$0x3] %vm6840_vm0, %v6835_v27 }
 0x53e PF: > { %s18_s20 = sadd.s32 1, %s8219_s20   ;;  %s9553_s8 = smov %s9560_s15 }
 0x53f   : > { %p15_p9 = scmp.ge.s32.totalorder %s18_s20, 4   ;;  %s9554_s15 = smov %s8203_s16 }
 0x540   : > { %s9555_s16 = smov %s8207_s17  ;;  %s9556_s17 = smov %s8387_s12 }
 0x541   : > { %s9557_s18 = smov %s8215_s19  ;;  %s9558_s19 = smov %s9553_s8 }
 0x542   :  { %17 = sbr.rel (!%p15_p9) target bundleno = 5 (0x5), region = 95 }
 0x549   :  { %6861 = vsyncpa [#allocation4], 1 }
 0x54a   :  { %6863 = vsyncpa [#allocation4 + $0x1], 1 }
 0x54b   :  { %6864 = vsyncpa [#allocation6], 1 }

</bundles_post_ra>
